<compile_context>
chip_gen: v7x
topology: tpu7x:2x2x1
jax: 0.10.0
libtpu: 0.0.40
codegen_flags: <defaults>
</compile_context>

<pallas_src>
import jax
import jax.numpy as jnp
from jax.experimental import pallas as pl
from jax.experimental.pallas import tpu as pltpu

NEG_INF = -1e30


# ---------------------------------------------------------------------------
# In-kernel helpers (operate on values / refs inside the fused kernel)
# ---------------------------------------------------------------------------
def _relu(x):
    return jnp.maximum(x, 0.0)


def _elu(x):
    # exp(min(x,0)) keeps the unselected branch finite for large positive x.
    return jnp.where(x > 0, x, jnp.exp(jnp.minimum(x, 0.0)) - 1.0)


def _leaky_relu(x):
    return jnp.where(x > 0, x, 0.2 * x)


def _linear(x, w_ref, b_ref, act=None):
    y = jnp.dot(x, w_ref[...], preferred_element_type=jnp.float32) + b_ref[...]
    if act == "relu":
        y = _relu(y)
    return y


def _gatv2_layer(x, wlr_ref, blr_ref, att_ref, bias_ref, adj_bias, adj01, concat):
    """Dense GATv2Conv (PyG semantics, add_self_loops, eval mode).

    x:        (N, in_ch)
    wlr_ref:  (in_ch, 2*H*C)   concatenated [lin_l | lin_r] weights
    blr_ref:  (1, 2*H*C)       concatenated biases
    att_ref:  (H, C)           per-head attention vectors
    bias_ref: (1, H*C) or (1, C)
    adj_bias: (N, N)           0 where edge j->i (incl. self loops), -1e30 else
    adj01:    (N, N)           1/0 mask matching adj_bias
    Returns (N, H*C) if concat else (N, C) — lane-dense.
    """
    att = att_ref[...]                       # (H, C)
    heads, c = att.shape
    hc = heads * c

    xlr = jnp.dot(x, wlr_ref[...], preferred_element_type=jnp.float32) + blr_ref[...]
    xl, xr = xlr[:, :hc], xlr[:, hc:]        # (N, H*C) each

    head_outs = []
    for h in range(heads):                   # static unroll; heads <= 4
        xl_h = xl[:, h * c:(h + 1) * c]      # (N, C) lane-column slice
        xr_h = xr[:, h * c:(h + 1) * c]
        att_h = att[h:h + 1, :]              # (1, C)

        # e[i, j] = att . leaky_relu(xr[i] + xl[j])   (target i, source j)
        s = _leaky_relu(xr_h[:, None, :] + xl_h[None, :, :])     # (N, N, C)
        e = jnp.sum(s * att_h[None, :, :], axis=-1)              # (N, N)

        # masked softmax over incoming edges (source axis j)
        e = e + adj_bias
        m = jnp.max(e, axis=1, keepdims=True)
        p = jnp.exp(e - m) * adj01
        alpha = p / jnp.sum(p, axis=1, keepdims=True)            # (N, N)

        head_outs.append(
            jnp.dot(alpha, xl_h, preferred_element_type=jnp.float32))

    if concat:
        y = jnp.concatenate(head_outs, axis=1)                   # (N, H*C)
    else:
        y = head_outs[0]
        for ho in head_outs[1:]:
            y = y + ho
        if heads > 1:
            y = y / float(heads)
    return y + bias_ref[...]


# ---------------------------------------------------------------------------
# The single fused forward kernel
# ---------------------------------------------------------------------------
def _fused_forward_kernel(*refs):
    (agent_x, adjb_a, adj01_a, focal_oh,
     lane_x, adjb_l, adj01_l, cl_means,
     emb_w, emb_b,
     c1_wlr, c1_blr, c1_att, c1_bias,
     c2_wlr, c2_blr, c2_att, c2_bias,
     c3_wlr, c3_blr, c3_att, c3_bias,
     memb_w, memb_b,
     mc_wlr, mc_blr, mc_att, mc_bias,
     clp_w, clp_b,
     fc1_w, fc1_b, fc2_w, fc2_b, fco_w, fco_b,
     out_ref) = refs

    # ---- agent branch ------------------------------------------------------
    adjb_a_v = adjb_a[...]                  # loaded once, reused by 3 layers
    adj01_a_v = adj01_a[...]

    x = _linear(agent_x[...], emb_w, emb_b, act="relu")          # (N, hidden)
    # F.dropout(p=0.6) in eval mode == identity
    x = _elu(_gatv2_layer(x, c1_wlr, c1_blr, c1_att, c1_bias,
                          adjb_a_v, adj01_a_v, concat=True))     # (N, H*hidden)
    x = _elu(_gatv2_layer(x, c2_wlr, c2_blr, c2_att, c2_bias,
                          adjb_a_v, adj01_a_v, concat=True))     # (N, H*hidden)
    x = _gatv2_layer(x, c3_wlr, c3_blr, c3_att, c3_bias,
                     adjb_a_v, adj01_a_v, concat=False)          # (N, hidden)

    # focal gather as a one-hot matmul (F, N) @ (N, hidden)
    focal = jnp.dot(focal_oh[...], x, preferred_element_type=jnp.float32)

    # ---- map branch --------------------------------------------------------
    mx = _linear(lane_x[...], memb_w, memb_b, act="relu")        # (M, hidden)
    mf = _gatv2_layer(mx, mc_wlr, mc_blr, mc_att, mc_bias,
                      adjb_l[...], adj01_l[...], concat=False)   # (M, hidden)
    map_global = jnp.mean(mf, axis=0, keepdims=True)             # (1, hidden)
    map_global = jnp.broadcast_to(map_global,
                                  (focal.shape[0], map_global.shape[1]))

    # ---- centerline branch -------------------------------------------------
    cl = _linear(cl_means[...], clp_w, clp_b)                    # (F, hidden)

    # ---- head MLP ----------------------------------------------------------
    combined = jnp.concatenate([focal, map_global, cl], axis=1)  # (F, 3*hidden)
    h = _linear(combined, fc1_w, fc1_b, act="relu")
    # nn.Dropout(0.3) in eval mode == identity
    h = _linear(h, fc2_w, fc2_b, act="relu")
    out_ref[...] = _linear(h, fco_w, fco_b)


# ---------------------------------------------------------------------------
# Host-side wrapper
# ---------------------------------------------------------------------------
def forward(params, agent_x, agent_mask, focal_idx, lane_x, lane_mask, centerlines):
    n = agent_x.shape[0]
    f = focal_idx.shape[0]
    hidden = params["agent_embedding"]["w"].shape[1]
    out_channels = params["fc_out"]["w"].shape[1]

    agent_x_flat = agent_x.reshape(n, -1)
    adjb_a = jnp.where(agent_mask > 0, 0.0, NEG_INF).astype(jnp.float32)
    adj01_a = (agent_mask > 0).astype(jnp.float32)
    adjb_l = jnp.where(lane_mask > 0, 0.0, NEG_INF).astype(jnp.float32)
    adj01_l = (lane_mask > 0).astype(jnp.float32)
    focal_oh = jax.nn.one_hot(focal_idx, n, dtype=jnp.float32)   # (F, N)

    # ragged per-polyline means (kept in plain JAX; ragged list can't be a
    # single kernel input), then PyTorch-style broadcast if counts mismatch.
    cl_means = jnp.stack([jnp.mean(cl, axis=0) for cl in centerlines], axis=0)
    if cl_means.shape[0] != f:
        cl_means = jnp.broadcast_to(cl_means[0:1], (f, cl_means.shape[1]))

    p = params
    inputs = (
        agent_x_flat, adjb_a, adj01_a, focal_oh,
        lane_x, adjb_l, adj01_l, cl_means,
        p["agent_embedding"]["w"], p["agent_embedding"]["b"],
        p["conv1"]["wlr"], p["conv1"]["blr"], p["conv1"]["att"], p["conv1"]["bias"],
        p["conv2"]["wlr"], p["conv2"]["blr"], p["conv2"]["att"], p["conv2"]["bias"],
        p["conv3"]["wlr"], p["conv3"]["blr"], p["conv3"]["att"], p["conv3"]["bias"],
        p["map_embedding"]["w"], p["map_embedding"]["b"],
        p["map_conv"]["wlr"], p["map_conv"]["blr"], p["map_conv"]["att"], p["map_conv"]["bias"],
        p["centerline_processor"]["w"], p["centerline_processor"]["b"],
        p["fc1"]["w"], p["fc1"]["b"],
        p["fc2"]["w"], p["fc2"]["b"],
        p["fc_out"]["w"], p["fc_out"]["b"],
    )

    return pl.pallas_call(
        _fused_forward_kernel,
        out_shape=jax.ShapeDtypeStruct((f, out_channels), jnp.float32),
        in_specs=[pl.BlockSpec(memory_space=pltpu.MemorySpace.VMEM)] * len(inputs),
        out_specs=pl.BlockSpec(memory_space=pltpu.MemorySpace.VMEM),
    )(*inputs)


# ---------------------------------------------------------------------------
# Parameter init / graph helpers
# ---------------------------------------------------------------------------
def _glorot(key, shape):
    fan_in, fan_out = shape[0], shape[-1]
    lim = (6.0 / (fan_in + fan_out)) ** 0.5
    return jax.random.uniform(key, shape, jnp.float32, -lim, lim)


def init_linear(key, in_f, out_f):
    kw, kb = jax.random.split(key)
    return {"w": _glorot(kw, (in_f, out_f)),
            "b": 0.02 * jax.random.normal(kb, (1, out_f), jnp.float32)}


def init_gat(key, in_ch, out_ch, heads, concat):
    ks = jax.random.split(key, 6)
    hc = heads * out_ch
    wl = _glorot(ks[0], (in_ch, hc))
    bl = 0.02 * jax.random.normal(ks[1], (1, hc), jnp.float32)
    wr = _glorot(ks[2], (in_ch, hc))
    br = 0.02 * jax.random.normal(ks[3], (1, hc), jnp.float32)
    return {
        "wlr": jnp.concatenate([wl, wr], axis=1),                 # (in, 2*H*C)
        "blr": jnp.concatenate([bl, br], axis=1),                 # (1, 2*H*C)
        "att": 0.1 * jax.random.normal(ks[4], (heads, out_ch), jnp.float32),
        "bias": 0.02 * jax.random.normal(
            ks[5], (1, hc if concat else out_ch), jnp.float32),
    }


def init_params(key, in_channels, hidden, out_channels, num_heads, seq_len):
    ks = jax.random.split(key, 11)
    return {
        "agent_embedding": init_linear(ks[0], in_channels * seq_len, hidden),
        "conv1": init_gat(ks[1], hidden, hidden, num_heads, True),
        "conv2": init_gat(ks[2], hidden * num_heads, hidden, num_heads, True),
        "conv3": init_gat(ks[3], hidden * num_heads, hidden, 1, False),
        "map_embedding": init_linear(ks[4], 2, hidden),
        "map_conv": init_gat(ks[5], hidden, hidden, 1, False),
        "centerline_processor": init_linear(ks[6], 2, hidden),
        "fc1": init_linear(ks[7], 3 * hidden, hidden),
        "fc2": init_linear(ks[8], hidden, hidden // 2),
        "fc_out": init_linear(ks[9], hidden // 2, out_channels),
    }


def build_mask(n, edges):
    """Dense adjacency mask: mask[dst, src] = 1, plus self loops."""
    m = jnp.zeros((n, n), jnp.float32)
    src = jnp.array([e[0] for e in edges], jnp.int32)
    dst = jnp.array([e[1] for e in edges], jnp.int32)
    m = m.at[dst, src].set(1.0)
    return jnp.maximum(m, jnp.eye(n, dtype=jnp.float32))


# ---------------------------------------------------------------------------
if __name__ == "__main__":
    # TODO(synk): torch_geometric-style dynamic hasattr()/empty-tensor branches
    # and the debug print are resolved statically here (map + centerline data
    # are both present).

    in_channels, hidden, out_channels = 2, 32, 60
    num_heads, seq_len = 4, 8
    num_agents, num_lane_nodes = 8, 6

    key = jax.random.PRNGKey(0)
    kp, kx, kl, kc1, kc2 = jax.random.split(key, 5)
    params = init_params(kp, in_channels, hidden, out_channels, num_heads, seq_len)

    # data.x: (num_agents, seq_len, in_channels)
    agent_x = jax.random.normal(kx, (num_agents, seq_len, in_channels), jnp.float32)
    agent_edges = [(0, 1), (1, 0), (1, 2), (2, 1), (2, 3), (3, 2),
                   (3, 4), (4, 5), (5, 6), (6, 7), (7, 0)]
    agent_mask = build_mask(num_agents, agent_edges)
    focal_idx = jnp.array([0, 3], jnp.int32)

    # data.lane_x: (num_lane_nodes, 2), data.lane_edge_index
    lane_x = jax.random.normal(kl, (num_lane_nodes, 2), jnp.float32)
    lane_edges = [(0, 1), (1, 2), (2, 3), (3, 4), (4, 5), (1, 0), (2, 1)]
    lane_mask = build_mask(num_lane_nodes, lane_edges)

    # data.centerline: list of (P_i, 2) polylines (one per focal agent)
    centerlines = [jax.random.normal(kc1, (5, 2), jnp.float32),
                   jax.random.normal(kc2, (7, 2), jnp.float32)]

    fwd = jax.jit(forward)
    out = fwd(params, agent_x, agent_mask, focal_idx, lane_x, lane_mask, centerlines)
    out = jax.block_until_ready(out)
    assert out.shape == (focal_idx.shape[0], out_channels)
    assert bool(jnp.all(jnp.isfinite(out)))
    print("KERNEL_OK")
</pallas_src>

<mosaic_0001>
module attributes {stable_mosaic.version = 11 : i64} {
  func.func @_fused_forward_kernel(%arg0: memref<8x16xf32, #tpu.memory_space<vmem>>, %arg1: memref<8x8xf32, #tpu.memory_space<vmem>>, %arg2: memref<8x8xf32, #tpu.memory_space<vmem>>, %arg3: memref<2x8xf32, #tpu.memory_space<vmem>>, %arg4: memref<6x2xf32, #tpu.memory_space<vmem>>, %arg5: memref<6x6xf32, #tpu.memory_space<vmem>>, %arg6: memref<6x6xf32, #tpu.memory_space<vmem>>, %arg7: memref<2x2xf32, #tpu.memory_space<vmem>>, %arg8: memref<16x32xf32, #tpu.memory_space<vmem>>, %arg9: memref<1x32xf32, #tpu.memory_space<vmem>>, %arg10: memref<32x256xf32, #tpu.memory_space<vmem>>, %arg11: memref<1x256xf32, #tpu.memory_space<vmem>>, %arg12: memref<4x32xf32, #tpu.memory_space<vmem>>, %arg13: memref<1x128xf32, #tpu.memory_space<vmem>>, %arg14: memref<128x256xf32, #tpu.memory_space<vmem>>, %arg15: memref<1x256xf32, #tpu.memory_space<vmem>>, %arg16: memref<4x32xf32, #tpu.memory_space<vmem>>, %arg17: memref<1x128xf32, #tpu.memory_space<vmem>>, %arg18: memref<128x64xf32, #tpu.memory_space<vmem>>, %arg19: memref<1x64xf32, #tpu.memory_space<vmem>>, %arg20: memref<1x32xf32, #tpu.memory_space<vmem>>, %arg21: memref<1x32xf32, #tpu.memory_space<vmem>>, %arg22: memref<2x32xf32, #tpu.memory_space<vmem>>, %arg23: memref<1x32xf32, #tpu.memory_space<vmem>>, %arg24: memref<32x64xf32, #tpu.memory_space<vmem>>, %arg25: memref<1x64xf32, #tpu.memory_space<vmem>>, %arg26: memref<1x32xf32, #tpu.memory_space<vmem>>, %arg27: memref<1x32xf32, #tpu.memory_space<vmem>>, %arg28: memref<2x32xf32, #tpu.memory_space<vmem>>, %arg29: memref<1x32xf32, #tpu.memory_space<vmem>>, %arg30: memref<96x32xf32, #tpu.memory_space<vmem>>, %arg31: memref<1x32xf32, #tpu.memory_space<vmem>>, %arg32: memref<32x16xf32, #tpu.memory_space<vmem>>, %arg33: memref<1x16xf32, #tpu.memory_space<vmem>>, %arg34: memref<16x60xf32, #tpu.memory_space<vmem>>, %arg35: memref<1x60xf32, #tpu.memory_space<vmem>>, %arg36: memref<2x60xf32, #tpu.memory_space<vmem>>) attributes {dimension_semantics = [], scalar_prefetch = 0 : i64, scratch_operands = 0 : i64, tpu.core_type = #tpu.core_type<tc>} {
    %c0 = arith.constant 0 : index
    %c0_0 = arith.constant 0 : index
    %0 = vector.load %arg1[%c0, %c0_0] : memref<8x8xf32, #tpu.memory_space<vmem>>, vector<8x8xf32>
    %c0_1 = arith.constant 0 : index
    %c0_2 = arith.constant 0 : index
    %1 = vector.load %arg2[%c0_1, %c0_2] : memref<8x8xf32, #tpu.memory_space<vmem>>, vector<8x8xf32>
    %c0_3 = arith.constant 0 : index
    %c0_4 = arith.constant 0 : index
    %2 = vector.load %arg0[%c0_3, %c0_4] : memref<8x16xf32, #tpu.memory_space<vmem>>, vector<8x16xf32>
    %c0_5 = arith.constant 0 : index
    %c0_6 = arith.constant 0 : index
    %3 = vector.load %arg8[%c0_5, %c0_6] : memref<16x32xf32, #tpu.memory_space<vmem>>, vector<16x32xf32>
    %cst = arith.constant dense<0.000000e+00> : vector<8x32xf32>
    %4 = tpu.matmul %2, %3, %cst {dimension_numbers = #tpu.dot_dimension_numbers<[1], [0], [0], [1], [0, 0, 1, 1], [], []>} : vector<8x16xf32>, vector<16x32xf32>, vector<8x32xf32> -> vector<8x32xf32>
    %c0_7 = arith.constant 0 : index
    %c0_8 = arith.constant 0 : index
    %5 = vector.load %arg9[%c0_7, %c0_8] : memref<1x32xf32, #tpu.memory_space<vmem>>, vector<1x32xf32>
    %6 = vector.broadcast %5 : vector<1x32xf32> to vector<8x32xf32>
    %7 = arith.addf %4, %6 : vector<8x32xf32>
    %cst_9 = arith.constant 0.000000e+00 : f32
    %8 = vector.broadcast %cst_9 : f32 to vector<8x32xf32>
    %9 = arith.maximumf %7, %8 : vector<8x32xf32>
    %c0_10 = arith.constant 0 : index
    %c0_11 = arith.constant 0 : index
    %10 = vector.load %arg12[%c0_10, %c0_11] : memref<4x32xf32, #tpu.memory_space<vmem>>, vector<4x32xf32>
    %c0_12 = arith.constant 0 : index
    %c0_13 = arith.constant 0 : index
    %11 = vector.load %arg10[%c0_12, %c0_13] : memref<32x256xf32, #tpu.memory_space<vmem>>, vector<32x256xf32>
    %cst_14 = arith.constant dense<0.000000e+00> : vector<8x256xf32>
    %12 = tpu.matmul %9, %11, %cst_14 {dimension_numbers = #tpu.dot_dimension_numbers<[1], [0], [0], [1], [0, 0, 1, 1], [], []>} : vector<8x32xf32>, vector<32x256xf32>, vector<8x256xf32> -> vector<8x256xf32>
    %c0_15 = arith.constant 0 : index
    %c0_16 = arith.constant 0 : index
    %13 = vector.load %arg11[%c0_15, %c0_16] : memref<1x256xf32, #tpu.memory_space<vmem>>, vector<1x256xf32>
    %14 = vector.broadcast %13 : vector<1x256xf32> to vector<8x256xf32>
    %15 = arith.addf %12, %14 : vector<8x256xf32>
    %16 = vector.extract_strided_slice %15 {offsets = [0, 0], sizes = [8, 128], strides = [1, 1]} : vector<8x256xf32> to vector<8x128xf32>
    %17 = vector.extract_strided_slice %15 {offsets = [0, 128], sizes = [8, 128], strides = [1, 1]} : vector<8x256xf32> to vector<8x128xf32>
    %18 = vector.extract_strided_slice %16 {offsets = [0, 0], sizes = [8, 32], strides = [1, 1]} : vector<8x128xf32> to vector<8x32xf32>
    %19 = vector.extract_strided_slice %17 {offsets = [0, 0], sizes = [8, 32], strides = [1, 1]} : vector<8x128xf32> to vector<8x32xf32>
    %20 = vector.extract_strided_slice %10 {offsets = [0, 0], sizes = [1, 32], strides = [1, 1]} : vector<4x32xf32> to vector<1x32xf32>
    %21 = vector.shape_cast %19 : vector<8x32xf32> to vector<8x1x32xf32>
    %22 = vector.shape_cast %18 : vector<8x32xf32> to vector<1x8x32xf32>
    %23 = vector.broadcast %21 : vector<8x1x32xf32> to vector<8x8x32xf32>
    %24 = vector.broadcast %22 : vector<1x8x32xf32> to vector<8x8x32xf32>
    %25 = arith.addf %23, %24 : vector<8x8x32xf32>
    %cst_17 = arith.constant 0.000000e+00 : f32
    %26 = vector.broadcast %cst_17 : f32 to vector<8x8x32xf32>
    %27 = arith.cmpf ogt, %25, %26 : vector<8x8x32xf32>
    %cst_18 = arith.constant 2.000000e-01 : f32
    %28 = vector.broadcast %cst_18 : f32 to vector<8x8x32xf32>
    %29 = arith.mulf %28, %25 : vector<8x8x32xf32>
    %30 = arith.select %27, %25, %29 : vector<8x8x32xi1>, vector<8x8x32xf32>
    %31 = vector.shape_cast %20 : vector<1x32xf32> to vector<1x1x32xf32>
    %32 = vector.broadcast %31 : vector<1x1x32xf32> to vector<8x8x32xf32>
    %33 = arith.mulf %30, %32 : vector<8x8x32xf32>
    %cst_19 = arith.constant dense<0.000000e+00> : vector<8x8xf32>
    %34 = vector.multi_reduction <add>, %33, %cst_19 [2] : vector<8x8x32xf32> to vector<8x8xf32>
    %35 = arith.addf %34, %0 : vector<8x8xf32>
    %cst_20 = arith.constant dense<0xFF800000> : vector<8xf32>
    %36 = vector.multi_reduction <maximumf>, %35, %cst_20 [1] : vector<8x8xf32> to vector<8xf32>
    %37 = vector.shape_cast %36 : vector<8xf32> to vector<8x1xf32>
    %38 = vector.broadcast %37 : vector<8x1xf32> to vector<8x8xf32>
    %39 = arith.subf %35, %38 : vector<8x8xf32>
    %40 = math.exp %39 : vector<8x8xf32>
    %41 = arith.mulf %40, %1 : vector<8x8xf32>
    %cst_21 = arith.constant dense<0.000000e+00> : vector<8xf32>
    %42 = vector.multi_reduction <add>, %41, %cst_21 [1] : vector<8x8xf32> to vector<8xf32>
    %43 = vector.shape_cast %42 : vector<8xf32> to vector<8x1xf32>
    %44 = vector.broadcast %43 : vector<8x1xf32> to vector<8x8xf32>
    %45 = arith.divf %41, %44 : vector<8x8xf32>
    %cst_22 = arith.constant dense<0.000000e+00> : vector<8x32xf32>
    %46 = tpu.matmul %45, %18, %cst_22 {dimension_numbers = #tpu.dot_dimension_numbers<[1], [0], [0], [1], [0, 0, 1, 1], [], []>} : vector<8x8xf32>, vector<8x32xf32>, vector<8x32xf32> -> vector<8x32xf32>
    %47 = vector.extract_strided_slice %16 {offsets = [0, 32], sizes = [8, 32], strides = [1, 1]} : vector<8x128xf32> to vector<8x32xf32>
    %48 = vector.extract_strided_slice %17 {offsets = [0, 32], sizes = [8, 32], strides = [1, 1]} : vector<8x128xf32> to vector<8x32xf32>
    %49 = vector.extract_strided_slice %10 {offsets = [1, 0], sizes = [1, 32], strides = [1, 1]} : vector<4x32xf32> to vector<1x32xf32>
    %50 = vector.shape_cast %48 : vector<8x32xf32> to vector<8x1x32xf32>
    %51 = vector.shape_cast %47 : vector<8x32xf32> to vector<1x8x32xf32>
    %52 = vector.broadcast %50 : vector<8x1x32xf32> to vector<8x8x32xf32>
    %53 = vector.broadcast %51 : vector<1x8x32xf32> to vector<8x8x32xf32>
    %54 = arith.addf %52, %53 : vector<8x8x32xf32>
    %cst_23 = arith.constant 0.000000e+00 : f32
    %55 = vector.broadcast %cst_23 : f32 to vector<8x8x32xf32>
    %56 = arith.cmpf ogt, %54, %55 : vector<8x8x32xf32>
    %cst_24 = arith.constant 2.000000e-01 : f32
    %57 = vector.broadcast %cst_24 : f32 to vector<8x8x32xf32>
    %58 = arith.mulf %57, %54 : vector<8x8x32xf32>
    %59 = arith.select %56, %54, %58 : vector<8x8x32xi1>, vector<8x8x32xf32>
    %60 = vector.shape_cast %49 : vector<1x32xf32> to vector<1x1x32xf32>
    %61 = vector.broadcast %60 : vector<1x1x32xf32> to vector<8x8x32xf32>
    %62 = arith.mulf %59, %61 : vector<8x8x32xf32>
    %cst_25 = arith.constant dense<0.000000e+00> : vector<8x8xf32>
    %63 = vector.multi_reduction <add>, %62, %cst_25 [2] : vector<8x8x32xf32> to vector<8x8xf32>
    %64 = arith.addf %63, %0 : vector<8x8xf32>
    %cst_26 = arith.constant dense<0xFF800000> : vector<8xf32>
    %65 = vector.multi_reduction <maximumf>, %64, %cst_26 [1] : vector<8x8xf32> to vector<8xf32>
    %66 = vector.shape_cast %65 : vector<8xf32> to vector<8x1xf32>
    %67 = vector.broadcast %66 : vector<8x1xf32> to vector<8x8xf32>
    %68 = arith.subf %64, %67 : vector<8x8xf32>
    %69 = math.exp %68 : vector<8x8xf32>
    %70 = arith.mulf %69, %1 : vector<8x8xf32>
    %cst_27 = arith.constant dense<0.000000e+00> : vector<8xf32>
    %71 = vector.multi_reduction <add>, %70, %cst_27 [1] : vector<8x8xf32> to vector<8xf32>
    %72 = vector.shape_cast %71 : vector<8xf32> to vector<8x1xf32>
    %73 = vector.broadcast %72 : vector<8x1xf32> to vector<8x8xf32>
    %74 = arith.divf %70, %73 : vector<8x8xf32>
    %cst_28 = arith.constant dense<0.000000e+00> : vector<8x32xf32>
    %75 = tpu.matmul %74, %47, %cst_28 {dimension_numbers = #tpu.dot_dimension_numbers<[1], [0], [0], [1], [0, 0, 1, 1], [], []>} : vector<8x8xf32>, vector<8x32xf32>, vector<8x32xf32> -> vector<8x32xf32>
    %76 = vector.extract_strided_slice %16 {offsets = [0, 64], sizes = [8, 32], strides = [1, 1]} : vector<8x128xf32> to vector<8x32xf32>
    %77 = vector.extract_strided_slice %17 {offsets = [0, 64], sizes = [8, 32], strides = [1, 1]} : vector<8x128xf32> to vector<8x32xf32>
    %78 = vector.extract_strided_slice %10 {offsets = [2, 0], sizes = [1, 32], strides = [1, 1]} : vector<4x32xf32> to vector<1x32xf32>
    %79 = vector.shape_cast %77 : vector<8x32xf32> to vector<8x1x32xf32>
    %80 = vector.shape_cast %76 : vector<8x32xf32> to vector<1x8x32xf32>
    %81 = vector.broadcast %79 : vector<8x1x32xf32> to vector<8x8x32xf32>
    %82 = vector.broadcast %80 : vector<1x8x32xf32> to vector<8x8x32xf32>
    %83 = arith.addf %81, %82 : vector<8x8x32xf32>
    %cst_29 = arith.constant 0.000000e+00 : f32
    %84 = vector.broadcast %cst_29 : f32 to vector<8x8x32xf32>
    %85 = arith.cmpf ogt, %83, %84 : vector<8x8x32xf32>
    %cst_30 = arith.constant 2.000000e-01 : f32
    %86 = vector.broadcast %cst_30 : f32 to vector<8x8x32xf32>
    %87 = arith.mulf %86, %83 : vector<8x8x32xf32>
    %88 = arith.select %85, %83, %87 : vector<8x8x32xi1>, vector<8x8x32xf32>
    %89 = vector.shape_cast %78 : vector<1x32xf32> to vector<1x1x32xf32>
    %90 = vector.broadcast %89 : vector<1x1x32xf32> to vector<8x8x32xf32>
    %91 = arith.mulf %88, %90 : vector<8x8x32xf32>
    %cst_31 = arith.constant dense<0.000000e+00> : vector<8x8xf32>
    %92 = vector.multi_reduction <add>, %91, %cst_31 [2] : vector<8x8x32xf32> to vector<8x8xf32>
    %93 = arith.addf %92, %0 : vector<8x8xf32>
    %cst_32 = arith.constant dense<0xFF800000> : vector<8xf32>
    %94 = vector.multi_reduction <maximumf>, %93, %cst_32 [1] : vector<8x8xf32> to vector<8xf32>
    %95 = vector.shape_cast %94 : vector<8xf32> to vector<8x1xf32>
    %96 = vector.broadcast %95 : vector<8x1xf32> to vector<8x8xf32>
    %97 = arith.subf %93, %96 : vector<8x8xf32>
    %98 = math.exp %97 : vector<8x8xf32>
    %99 = arith.mulf %98, %1 : vector<8x8xf32>
    %cst_33 = arith.constant dense<0.000000e+00> : vector<8xf32>
    %100 = vector.multi_reduction <add>, %99, %cst_33 [1] : vector<8x8xf32> to vector<8xf32>
    %101 = vector.shape_cast %100 : vector<8xf32> to vector<8x1xf32>
    %102 = vector.broadcast %101 : vector<8x1xf32> to vector<8x8xf32>
    %103 = arith.divf %99, %102 : vector<8x8xf32>
    %cst_34 = arith.constant dense<0.000000e+00> : vector<8x32xf32>
    %104 = tpu.matmul %103, %76, %cst_34 {dimension_numbers = #tpu.dot_dimension_numbers<[1], [0], [0], [1], [0, 0, 1, 1], [], []>} : vector<8x8xf32>, vector<8x32xf32>, vector<8x32xf32> -> vector<8x32xf32>
    %105 = vector.extract_strided_slice %16 {offsets = [0, 96], sizes = [8, 32], strides = [1, 1]} : vector<8x128xf32> to vector<8x32xf32>
    %106 = vector.extract_strided_slice %17 {offsets = [0, 96], sizes = [8, 32], strides = [1, 1]} : vector<8x128xf32> to vector<8x32xf32>
    %107 = vector.extract_strided_slice %10 {offsets = [3, 0], sizes = [1, 32], strides = [1, 1]} : vector<4x32xf32> to vector<1x32xf32>
    %108 = vector.shape_cast %106 : vector<8x32xf32> to vector<8x1x32xf32>
    %109 = vector.shape_cast %105 : vector<8x32xf32> to vector<1x8x32xf32>
    %110 = vector.broadcast %108 : vector<8x1x32xf32> to vector<8x8x32xf32>
    %111 = vector.broadcast %109 : vector<1x8x32xf32> to vector<8x8x32xf32>
    %112 = arith.addf %110, %111 : vector<8x8x32xf32>
    %cst_35 = arith.constant 0.000000e+00 : f32
    %113 = vector.broadcast %cst_35 : f32 to vector<8x8x32xf32>
    %114 = arith.cmpf ogt, %112, %113 : vector<8x8x32xf32>
    %cst_36 = arith.constant 2.000000e-01 : f32
    %115 = vector.broadcast %cst_36 : f32 to vector<8x8x32xf32>
    %116 = arith.mulf %115, %112 : vector<8x8x32xf32>
    %117 = arith.select %114, %112, %116 : vector<8x8x32xi1>, vector<8x8x32xf32>
    %118 = vector.shape_cast %107 : vector<1x32xf32> to vector<1x1x32xf32>
    %119 = vector.broadcast %118 : vector<1x1x32xf32> to vector<8x8x32xf32>
    %120 = arith.mulf %117, %119 : vector<8x8x32xf32>
    %cst_37 = arith.constant dense<0.000000e+00> : vector<8x8xf32>
    %121 = vector.multi_reduction <add>, %120, %cst_37 [2] : vector<8x8x32xf32> to vector<8x8xf32>
    %122 = arith.addf %121, %0 : vector<8x8xf32>
    %cst_38 = arith.constant dense<0xFF800000> : vector<8xf32>
    %123 = vector.multi_reduction <maximumf>, %122, %cst_38 [1] : vector<8x8xf32> to vector<8xf32>
    %124 = vector.shape_cast %123 : vector<8xf32> to vector<8x1xf32>
    %125 = vector.broadcast %124 : vector<8x1xf32> to vector<8x8xf32>
    %126 = arith.subf %122, %125 : vector<8x8xf32>
    %127 = math.exp %126 : vector<8x8xf32>
    %128 = arith.mulf %127, %1 : vector<8x8xf32>
    %cst_39 = arith.constant dense<0.000000e+00> : vector<8xf32>
    %129 = vector.multi_reduction <add>, %128, %cst_39 [1] : vector<8x8xf32> to vector<8xf32>
    %130 = vector.shape_cast %129 : vector<8xf32> to vector<8x1xf32>
    %131 = vector.broadcast %130 : vector<8x1xf32> to vector<8x8xf32>
    %132 = arith.divf %128, %131 : vector<8x8xf32>
    %cst_40 = arith.constant dense<0.000000e+00> : vector<8x32xf32>
    %133 = tpu.matmul %132, %105, %cst_40 {dimension_numbers = #tpu.dot_dimension_numbers<[1], [0], [0], [1], [0, 0, 1, 1], [], []>} : vector<8x8xf32>, vector<8x32xf32>, vector<8x32xf32> -> vector<8x32xf32>
    %134 = tpu.concatenate %46, %75, %104, %133 in 1 : vector<8x32xf32>, vector<8x32xf32>, vector<8x32xf32>, vector<8x32xf32> -> vector<8x128xf32>
    %c0_41 = arith.constant 0 : index
    %c0_42 = arith.constant 0 : index
    %135 = vector.load %arg13[%c0_41, %c0_42] : memref<1x128xf32, #tpu.memory_space<vmem>>, vector<1x128xf32>
    %136 = vector.broadcast %135 : vector<1x128xf32> to vector<8x128xf32>
    %137 = arith.addf %134, %136 : vector<8x128xf32>
    %cst_43 = arith.constant 0.000000e+00 : f32
    %138 = vector.broadcast %cst_43 : f32 to vector<8x128xf32>
    %139 = arith.cmpf ogt, %137, %138 : vector<8x128xf32>
    %cst_44 = arith.constant 0.000000e+00 : f32
    %140 = vector.broadcast %cst_44 : f32 to vector<8x128xf32>
    %141 = arith.minimumf %137, %140 : vector<8x128xf32>
    %142 = math.exp %141 : vector<8x128xf32>
    %cst_45 = arith.constant 1.000000e+00 : f32
    %143 = vector.broadcast %cst_45 : f32 to vector<8x128xf32>
    %144 = arith.subf %142, %143 : vector<8x128xf32>
    %145 = arith.select %139, %137, %144 : vector<8x128xi1>, vector<8x128xf32>
    %c0_46 = arith.constant 0 : index
    %c0_47 = arith.constant 0 : index
    %146 = vector.load %arg16[%c0_46, %c0_47] : memref<4x32xf32, #tpu.memory_space<vmem>>, vector<4x32xf32>
    %c0_48 = arith.constant 0 : index
    %c0_49 = arith.constant 0 : index
    %147 = vector.load %arg14[%c0_48, %c0_49] : memref<128x256xf32, #tpu.memory_space<vmem>>, vector<128x256xf32>
    %cst_50 = arith.constant dense<0.000000e+00> : vector<8x256xf32>
    %148 = tpu.matmul %145, %147, %cst_50 {dimension_numbers = #tpu.dot_dimension_numbers<[1], [0], [0], [1], [0, 0, 1, 1], [], []>} : vector<8x128xf32>, vector<128x256xf32>, vector<8x256xf32> -> vector<8x256xf32>
    %c0_51 = arith.constant 0 : index
    %c0_52 = arith.constant 0 : index
    %149 = vector.load %arg15[%c0_51, %c0_52] : memref<1x256xf32, #tpu.memory_space<vmem>>, vector<1x256xf32>
    %150 = vector.broadcast %149 : vector<1x256xf32> to vector<8x256xf32>
    %151 = arith.addf %148, %150 : vector<8x256xf32>
    %152 = vector.extract_strided_slice %151 {offsets = [0, 0], sizes = [8, 128], strides = [1, 1]} : vector<8x256xf32> to vector<8x128xf32>
    %153 = vector.extract_strided_slice %151 {offsets = [0, 128], sizes = [8, 128], strides = [1, 1]} : vector<8x256xf32> to vector<8x128xf32>
    %154 = vector.extract_strided_slice %152 {offsets = [0, 0], sizes = [8, 32], strides = [1, 1]} : vector<8x128xf32> to vector<8x32xf32>
    %155 = vector.extract_strided_slice %153 {offsets = [0, 0], sizes = [8, 32], strides = [1, 1]} : vector<8x128xf32> to vector<8x32xf32>
    %156 = vector.extract_strided_slice %146 {offsets = [0, 0], sizes = [1, 32], strides = [1, 1]} : vector<4x32xf32> to vector<1x32xf32>
    %157 = vector.shape_cast %155 : vector<8x32xf32> to vector<8x1x32xf32>
    %158 = vector.shape_cast %154 : vector<8x32xf32> to vector<1x8x32xf32>
    %159 = vector.broadcast %157 : vector<8x1x32xf32> to vector<8x8x32xf32>
    %160 = vector.broadcast %158 : vector<1x8x32xf32> to vector<8x8x32xf32>
    %161 = arith.addf %159, %160 : vector<8x8x32xf32>
    %cst_53 = arith.constant 0.000000e+00 : f32
    %162 = vector.broadcast %cst_53 : f32 to vector<8x8x32xf32>
    %163 = arith.cmpf ogt, %161, %162 : vector<8x8x32xf32>
    %cst_54 = arith.constant 2.000000e-01 : f32
    %164 = vector.broadcast %cst_54 : f32 to vector<8x8x32xf32>
    %165 = arith.mulf %164, %161 : vector<8x8x32xf32>
    %166 = arith.select %163, %161, %165 : vector<8x8x32xi1>, vector<8x8x32xf32>
    %167 = vector.shape_cast %156 : vector<1x32xf32> to vector<1x1x32xf32>
    %168 = vector.broadcast %167 : vector<1x1x32xf32> to vector<8x8x32xf32>
    %169 = arith.mulf %166, %168 : vector<8x8x32xf32>
    %cst_55 = arith.constant dense<0.000000e+00> : vector<8x8xf32>
    %170 = vector.multi_reduction <add>, %169, %cst_55 [2] : vector<8x8x32xf32> to vector<8x8xf32>
    %171 = arith.addf %170, %0 : vector<8x8xf32>
    %cst_56 = arith.constant dense<0xFF800000> : vector<8xf32>
    %172 = vector.multi_reduction <maximumf>, %171, %cst_56 [1] : vector<8x8xf32> to vector<8xf32>
    %173 = vector.shape_cast %172 : vector<8xf32> to vector<8x1xf32>
    %174 = vector.broadcast %173 : vector<8x1xf32> to vector<8x8xf32>
    %175 = arith.subf %171, %174 : vector<8x8xf32>
    %176 = math.exp %175 : vector<8x8xf32>
    %177 = arith.mulf %176, %1 : vector<8x8xf32>
    %cst_57 = arith.constant dense<0.000000e+00> : vector<8xf32>
    %178 = vector.multi_reduction <add>, %177, %cst_57 [1] : vector<8x8xf32> to vector<8xf32>
    %179 = vector.shape_cast %178 : vector<8xf32> to vector<8x1xf32>
    %180 = vector.broadcast %179 : vector<8x1xf32> to vector<8x8xf32>
    %181 = arith.divf %177, %180 : vector<8x8xf32>
    %cst_58 = arith.constant dense<0.000000e+00> : vector<8x32xf32>
    %182 = tpu.matmul %181, %154, %cst_58 {dimension_numbers = #tpu.dot_dimension_numbers<[1], [0], [0], [1], [0, 0, 1, 1], [], []>} : vector<8x8xf32>, vector<8x32xf32>, vector<8x32xf32> -> vector<8x32xf32>
    %183 = vector.extract_strided_slice %152 {offsets = [0, 32], sizes = [8, 32], strides = [1, 1]} : vector<8x128xf32> to vector<8x32xf32>
    %184 = vector.extract_strided_slice %153 {offsets = [0, 32], sizes = [8, 32], strides = [1, 1]} : vector<8x128xf32> to vector<8x32xf32>
    %185 = vector.extract_strided_slice %146 {offsets = [1, 0], sizes = [1, 32], strides = [1, 1]} : vector<4x32xf32> to vector<1x32xf32>
    %186 = vector.shape_cast %184 : vector<8x32xf32> to vector<8x1x32xf32>
    %187 = vector.shape_cast %183 : vector<8x32xf32> to vector<1x8x32xf32>
    %188 = vector.broadcast %186 : vector<8x1x32xf32> to vector<8x8x32xf32>
    %189 = vector.broadcast %187 : vector<1x8x32xf32> to vector<8x8x32xf32>
    %190 = arith.addf %188, %189 : vector<8x8x32xf32>
    %cst_59 = arith.constant 0.000000e+00 : f32
    %191 = vector.broadcast %cst_59 : f32 to vector<8x8x32xf32>
    %192 = arith.cmpf ogt, %190, %191 : vector<8x8x32xf32>
    %cst_60 = arith.constant 2.000000e-01 : f32
    %193 = vector.broadcast %cst_60 : f32 to vector<8x8x32xf32>
    %194 = arith.mulf %193, %190 : vector<8x8x32xf32>
    %195 = arith.select %192, %190, %194 : vector<8x8x32xi1>, vector<8x8x32xf32>
    %196 = vector.shape_cast %185 : vector<1x32xf32> to vector<1x1x32xf32>
    %197 = vector.broadcast %196 : vector<1x1x32xf32> to vector<8x8x32xf32>
    %198 = arith.mulf %195, %197 : vector<8x8x32xf32>
    %cst_61 = arith.constant dense<0.000000e+00> : vector<8x8xf32>
    %199 = vector.multi_reduction <add>, %198, %cst_61 [2] : vector<8x8x32xf32> to vector<8x8xf32>
    %200 = arith.addf %199, %0 : vector<8x8xf32>
    %cst_62 = arith.constant dense<0xFF800000> : vector<8xf32>
    %201 = vector.multi_reduction <maximumf>, %200, %cst_62 [1] : vector<8x8xf32> to vector<8xf32>
    %202 = vector.shape_cast %201 : vector<8xf32> to vector<8x1xf32>
    %203 = vector.broadcast %202 : vector<8x1xf32> to vector<8x8xf32>
    %204 = arith.subf %200, %203 : vector<8x8xf32>
    %205 = math.exp %204 : vector<8x8xf32>
    %206 = arith.mulf %205, %1 : vector<8x8xf32>
    %cst_63 = arith.constant dense<0.000000e+00> : vector<8xf32>
    %207 = vector.multi_reduction <add>, %206, %cst_63 [1] : vector<8x8xf32> to vector<8xf32>
    %208 = vector.shape_cast %207 : vector<8xf32> to vector<8x1xf32>
    %209 = vector.broadcast %208 : vector<8x1xf32> to vector<8x8xf32>
    %210 = arith.divf %206, %209 : vector<8x8xf32>
    %cst_64 = arith.constant dense<0.000000e+00> : vector<8x32xf32>
    %211 = tpu.matmul %210, %183, %cst_64 {dimension_numbers = #tpu.dot_dimension_numbers<[1], [0], [0], [1], [0, 0, 1, 1], [], []>} : vector<8x8xf32>, vector<8x32xf32>, vector<8x32xf32> -> vector<8x32xf32>
    %212 = vector.extract_strided_slice %152 {offsets = [0, 64], sizes = [8, 32], strides = [1, 1]} : vector<8x128xf32> to vector<8x32xf32>
    %213 = vector.extract_strided_slice %153 {offsets = [0, 64], sizes = [8, 32], strides = [1, 1]} : vector<8x128xf32> to vector<8x32xf32>
    %214 = vector.extract_strided_slice %146 {offsets = [2, 0], sizes = [1, 32], strides = [1, 1]} : vector<4x32xf32> to vector<1x32xf32>
    %215 = vector.shape_cast %213 : vector<8x32xf32> to vector<8x1x32xf32>
    %216 = vector.shape_cast %212 : vector<8x32xf32> to vector<1x8x32xf32>
    %217 = vector.broadcast %215 : vector<8x1x32xf32> to vector<8x8x32xf32>
    %218 = vector.broadcast %216 : vector<1x8x32xf32> to vector<8x8x32xf32>
    %219 = arith.addf %217, %218 : vector<8x8x32xf32>
    %cst_65 = arith.constant 0.000000e+00 : f32
    %220 = vector.broadcast %cst_65 : f32 to vector<8x8x32xf32>
    %221 = arith.cmpf ogt, %219, %220 : vector<8x8x32xf32>
    %cst_66 = arith.constant 2.000000e-01 : f32
    %222 = vector.broadcast %cst_66 : f32 to vector<8x8x32xf32>
    %223 = arith.mulf %222, %219 : vector<8x8x32xf32>
    %224 = arith.select %221, %219, %223 : vector<8x8x32xi1>, vector<8x8x32xf32>
    %225 = vector.shape_cast %214 : vector<1x32xf32> to vector<1x1x32xf32>
    %226 = vector.broadcast %225 : vector<1x1x32xf32> to vector<8x8x32xf32>
    %227 = arith.mulf %224, %226 : vector<8x8x32xf32>
    %cst_67 = arith.constant dense<0.000000e+00> : vector<8x8xf32>
    %228 = vector.multi_reduction <add>, %227, %cst_67 [2] : vector<8x8x32xf32> to vector<8x8xf32>
    %229 = arith.addf %228, %0 : vector<8x8xf32>
    %cst_68 = arith.constant dense<0xFF800000> : vector<8xf32>
    %230 = vector.multi_reduction <maximumf>, %229, %cst_68 [1] : vector<8x8xf32> to vector<8xf32>
    %231 = vector.shape_cast %230 : vector<8xf32> to vector<8x1xf32>
    %232 = vector.broadcast %231 : vector<8x1xf32> to vector<8x8xf32>
    %233 = arith.subf %229, %232 : vector<8x8xf32>
    %234 = math.exp %233 : vector<8x8xf32>
    %235 = arith.mulf %234, %1 : vector<8x8xf32>
    %cst_69 = arith.constant dense<0.000000e+00> : vector<8xf32>
    %236 = vector.multi_reduction <add>, %235, %cst_69 [1] : vector<8x8xf32> to vector<8xf32>
    %237 = vector.shape_cast %236 : vector<8xf32> to vector<8x1xf32>
    %238 = vector.broadcast %237 : vector<8x1xf32> to vector<8x8xf32>
    %239 = arith.divf %235, %238 : vector<8x8xf32>
    %cst_70 = arith.constant dense<0.000000e+00> : vector<8x32xf32>
    %240 = tpu.matmul %239, %212, %cst_70 {dimension_numbers = #tpu.dot_dimension_numbers<[1], [0], [0], [1], [0, 0, 1, 1], [], []>} : vector<8x8xf32>, vector<8x32xf32>, vector<8x32xf32> -> vector<8x32xf32>
    %241 = vector.extract_strided_slice %152 {offsets = [0, 96], sizes = [8, 32], strides = [1, 1]} : vector<8x128xf32> to vector<8x32xf32>
    %242 = vector.extract_strided_slice %153 {offsets = [0, 96], sizes = [8, 32], strides = [1, 1]} : vector<8x128xf32> to vector<8x32xf32>
    %243 = vector.extract_strided_slice %146 {offsets = [3, 0], sizes = [1, 32], strides = [1, 1]} : vector<4x32xf32> to vector<1x32xf32>
    %244 = vector.shape_cast %242 : vector<8x32xf32> to vector<8x1x32xf32>
    %245 = vector.shape_cast %241 : vector<8x32xf32> to vector<1x8x32xf32>
    %246 = vector.broadcast %244 : vector<8x1x32xf32> to vector<8x8x32xf32>
    %247 = vector.broadcast %245 : vector<1x8x32xf32> to vector<8x8x32xf32>
    %248 = arith.addf %246, %247 : vector<8x8x32xf32>
    %cst_71 = arith.constant 0.000000e+00 : f32
    %249 = vector.broadcast %cst_71 : f32 to vector<8x8x32xf32>
    %250 = arith.cmpf ogt, %248, %249 : vector<8x8x32xf32>
    %cst_72 = arith.constant 2.000000e-01 : f32
    %251 = vector.broadcast %cst_72 : f32 to vector<8x8x32xf32>
    %252 = arith.mulf %251, %248 : vector<8x8x32xf32>
    %253 = arith.select %250, %248, %252 : vector<8x8x32xi1>, vector<8x8x32xf32>
    %254 = vector.shape_cast %243 : vector<1x32xf32> to vector<1x1x32xf32>
    %255 = vector.broadcast %254 : vector<1x1x32xf32> to vector<8x8x32xf32>
    %256 = arith.mulf %253, %255 : vector<8x8x32xf32>
    %cst_73 = arith.constant dense<0.000000e+00> : vector<8x8xf32>
    %257 = vector.multi_reduction <add>, %256, %cst_73 [2] : vector<8x8x32xf32> to vector<8x8xf32>
    %258 = arith.addf %257, %0 : vector<8x8xf32>
    %cst_74 = arith.constant dense<0xFF800000> : vector<8xf32>
    %259 = vector.multi_reduction <maximumf>, %258, %cst_74 [1] : vector<8x8xf32> to vector<8xf32>
    %260 = vector.shape_cast %259 : vector<8xf32> to vector<8x1xf32>
    %261 = vector.broadcast %260 : vector<8x1xf32> to vector<8x8xf32>
    %262 = arith.subf %258, %261 : vector<8x8xf32>
    %263 = math.exp %262 : vector<8x8xf32>
    %264 = arith.mulf %263, %1 : vector<8x8xf32>
    %cst_75 = arith.constant dense<0.000000e+00> : vector<8xf32>
    %265 = vector.multi_reduction <add>, %264, %cst_75 [1] : vector<8x8xf32> to vector<8xf32>
    %266 = vector.shape_cast %265 : vector<8xf32> to vector<8x1xf32>
    %267 = vector.broadcast %266 : vector<8x1xf32> to vector<8x8xf32>
    %268 = arith.divf %264, %267 : vector<8x8xf32>
    %cst_76 = arith.constant dense<0.000000e+00> : vector<8x32xf32>
    %269 = tpu.matmul %268, %241, %cst_76 {dimension_numbers = #tpu.dot_dimension_numbers<[1], [0], [0], [1], [0, 0, 1, 1], [], []>} : vector<8x8xf32>, vector<8x32xf32>, vector<8x32xf32> -> vector<8x32xf32>
    %270 = tpu.concatenate %182, %211, %240, %269 in 1 : vector<8x32xf32>, vector<8x32xf32>, vector<8x32xf32>, vector<8x32xf32> -> vector<8x128xf32>
    %c0_77 = arith.constant 0 : index
    %c0_78 = arith.constant 0 : index
    %271 = vector.load %arg17[%c0_77, %c0_78] : memref<1x128xf32, #tpu.memory_space<vmem>>, vector<1x128xf32>
    %272 = vector.broadcast %271 : vector<1x128xf32> to vector<8x128xf32>
    %273 = arith.addf %270, %272 : vector<8x128xf32>
    %cst_79 = arith.constant 0.000000e+00 : f32
    %274 = vector.broadcast %cst_79 : f32 to vector<8x128xf32>
    %275 = arith.cmpf ogt, %273, %274 : vector<8x128xf32>
    %cst_80 = arith.constant 0.000000e+00 : f32
    %276 = vector.broadcast %cst_80 : f32 to vector<8x128xf32>
    %277 = arith.minimumf %273, %276 : vector<8x128xf32>
    %278 = math.exp %277 : vector<8x128xf32>
    %cst_81 = arith.constant 1.000000e+00 : f32
    %279 = vector.broadcast %cst_81 : f32 to vector<8x128xf32>
    %280 = arith.subf %278, %279 : vector<8x128xf32>
    %281 = arith.select %275, %273, %280 : vector<8x128xi1>, vector<8x128xf32>
    %c0_82 = arith.constant 0 : index
    %c0_83 = arith.constant 0 : index
    %282 = vector.load %arg20[%c0_82, %c0_83] : memref<1x32xf32, #tpu.memory_space<vmem>>, vector<1x32xf32>
    %c0_84 = arith.constant 0 : index
    %c0_85 = arith.constant 0 : index
    %283 = vector.load %arg18[%c0_84, %c0_85] : memref<128x64xf32, #tpu.memory_space<vmem>>, vector<128x64xf32>
    %cst_86 = arith.constant dense<0.000000e+00> : vector<8x64xf32>
    %284 = tpu.matmul %281, %283, %cst_86 {dimension_numbers = #tpu.dot_dimension_numbers<[1], [0], [0], [1], [0, 0, 1, 1], [], []>} : vector<8x128xf32>, vector<128x64xf32>, vector<8x64xf32> -> vector<8x64xf32>
    %c0_87 = arith.constant 0 : index
    %c0_88 = arith.constant 0 : index
    %285 = vector.load %arg19[%c0_87, %c0_88] : memref<1x64xf32, #tpu.memory_space<vmem>>, vector<1x64xf32>
    %286 = vector.broadcast %285 : vector<1x64xf32> to vector<8x64xf32>
    %287 = arith.addf %284, %286 : vector<8x64xf32>
    %288 = vector.extract_strided_slice %287 {offsets = [0, 0], sizes = [8, 32], strides = [1, 1]} : vector<8x64xf32> to vector<8x32xf32>
    %289 = vector.extract_strided_slice %287 {offsets = [0, 32], sizes = [8, 32], strides = [1, 1]} : vector<8x64xf32> to vector<8x32xf32>
    %290 = vector.shape_cast %289 : vector<8x32xf32> to vector<8x1x32xf32>
    %291 = vector.shape_cast %288 : vector<8x32xf32> to vector<1x8x32xf32>
    %292 = vector.broadcast %290 : vector<8x1x32xf32> to vector<8x8x32xf32>
    %293 = vector.broadcast %291 : vector<1x8x32xf32> to vector<8x8x32xf32>
    %294 = arith.addf %292, %293 : vector<8x8x32xf32>
    %cst_89 = arith.constant 0.000000e+00 : f32
    %295 = vector.broadcast %cst_89 : f32 to vector<8x8x32xf32>
    %296 = arith.cmpf ogt, %294, %295 : vector<8x8x32xf32>
    %cst_90 = arith.constant 2.000000e-01 : f32
    %297 = vector.broadcast %cst_90 : f32 to vector<8x8x32xf32>
    %298 = arith.mulf %297, %294 : vector<8x8x32xf32>
    %299 = arith.select %296, %294, %298 : vector<8x8x32xi1>, vector<8x8x32xf32>
    %300 = vector.shape_cast %282 : vector<1x32xf32> to vector<1x1x32xf32>
    %301 = vector.broadcast %300 : vector<1x1x32xf32> to vector<8x8x32xf32>
    %302 = arith.mulf %299, %301 : vector<8x8x32xf32>
    %cst_91 = arith.constant dense<0.000000e+00> : vector<8x8xf32>
    %303 = vector.multi_reduction <add>, %302, %cst_91 [2] : vector<8x8x32xf32> to vector<8x8xf32>
    %304 = arith.addf %303, %0 : vector<8x8xf32>
    %cst_92 = arith.constant dense<0xFF800000> : vector<8xf32>
    %305 = vector.multi_reduction <maximumf>, %304, %cst_92 [1] : vector<8x8xf32> to vector<8xf32>
    %306 = vector.shape_cast %305 : vector<8xf32> to vector<8x1xf32>
    %307 = vector.broadcast %306 : vector<8x1xf32> to vector<8x8xf32>
    %308 = arith.subf %304, %307 : vector<8x8xf32>
    %309 = math.exp %308 : vector<8x8xf32>
    %310 = arith.mulf %309, %1 : vector<8x8xf32>
    %cst_93 = arith.constant dense<0.000000e+00> : vector<8xf32>
    %311 = vector.multi_reduction <add>, %310, %cst_93 [1] : vector<8x8xf32> to vector<8xf32>
    %312 = vector.shape_cast %311 : vector<8xf32> to vector<8x1xf32>
    %313 = vector.broadcast %312 : vector<8x1xf32> to vector<8x8xf32>
    %314 = arith.divf %310, %313 : vector<8x8xf32>
    %cst_94 = arith.constant dense<0.000000e+00> : vector<8x32xf32>
    %315 = tpu.matmul %314, %288, %cst_94 {dimension_numbers = #tpu.dot_dimension_numbers<[1], [0], [0], [1], [0, 0, 1, 1], [], []>} : vector<8x8xf32>, vector<8x32xf32>, vector<8x32xf32> -> vector<8x32xf32>
    %c0_95 = arith.constant 0 : index
    %c0_96 = arith.constant 0 : index
    %316 = vector.load %arg21[%c0_95, %c0_96] : memref<1x32xf32, #tpu.memory_space<vmem>>, vector<1x32xf32>
    %317 = vector.broadcast %316 : vector<1x32xf32> to vector<8x32xf32>
    %318 = arith.addf %315, %317 : vector<8x32xf32>
    %c0_97 = arith.constant 0 : index
    %c0_98 = arith.constant 0 : index
    %319 = vector.load %arg3[%c0_97, %c0_98] : memref<2x8xf32, #tpu.memory_space<vmem>>, vector<2x8xf32>
    %cst_99 = arith.constant dense<0.000000e+00> : vector<2x32xf32>
    %320 = tpu.matmul %319, %318, %cst_99 {dimension_numbers = #tpu.dot_dimension_numbers<[1], [0], [0], [1], [0, 0, 1, 1], [], []>} : vector<2x8xf32>, vector<8x32xf32>, vector<2x32xf32> -> vector<2x32xf32>
    %c0_100 = arith.constant 0 : index
    %c0_101 = arith.constant 0 : index
    %321 = vector.load %arg4[%c0_100, %c0_101] : memref<6x2xf32, #tpu.memory_space<vmem>>, vector<6x2xf32>
    %c0_102 = arith.constant 0 : index
    %c0_103 = arith.constant 0 : index
    %322 = vector.load %arg22[%c0_102, %c0_103] : memref<2x32xf32, #tpu.memory_space<vmem>>, vector<2x32xf32>
    %cst_104 = arith.constant dense<0.000000e+00> : vector<6x32xf32>
    %323 = tpu.matmul %321, %322, %cst_104 {dimension_numbers = #tpu.dot_dimension_numbers<[1], [0], [0], [1], [0, 0, 1, 1], [], []>} : vector<6x2xf32>, vector<2x32xf32>, vector<6x32xf32> -> vector<6x32xf32>
    %c0_105 = arith.constant 0 : index
    %c0_106 = arith.constant 0 : index
    %324 = vector.load %arg23[%c0_105, %c0_106] : memref<1x32xf32, #tpu.memory_space<vmem>>, vector<1x32xf32>
    %325 = vector.broadcast %324 : vector<1x32xf32> to vector<6x32xf32>
    %326 = arith.addf %323, %325 : vector<6x32xf32>
    %cst_107 = arith.constant 0.000000e+00 : f32
    %327 = vector.broadcast %cst_107 : f32 to vector<6x32xf32>
    %328 = arith.maximumf %326, %327 : vector<6x32xf32>
    %c0_108 = arith.constant 0 : index
    %c0_109 = arith.constant 0 : index
    %329 = vector.load %arg5[%c0_108, %c0_109] : memref<6x6xf32, #tpu.memory_space<vmem>>, vector<6x6xf32>
    %c0_110 = arith.constant 0 : index
    %c0_111 = arith.constant 0 : index
    %330 = vector.load %arg6[%c0_110, %c0_111] : memref<6x6xf32, #tpu.memory_space<vmem>>, vector<6x6xf32>
    %c0_112 = arith.constant 0 : index
    %c0_113 = arith.constant 0 : index
    %331 = vector.load %arg26[%c0_112, %c0_113] : memref<1x32xf32, #tpu.memory_space<vmem>>, vector<1x32xf32>
    %c0_114 = arith.constant 0 : index
    %c0_115 = arith.constant 0 : index
    %332 = vector.load %arg24[%c0_114, %c0_115] : memref<32x64xf32, #tpu.memory_space<vmem>>, vector<32x64xf32>
    %cst_116 = arith.constant dense<0.000000e+00> : vector<6x64xf32>
    %333 = tpu.matmul %328, %332, %cst_116 {dimension_numbers = #tpu.dot_dimension_numbers<[1], [0], [0], [1], [0, 0, 1, 1], [], []>} : vector<6x32xf32>, vector<32x64xf32>, vector<6x64xf32> -> vector<6x64xf32>
    %c0_117 = arith.constant 0 : index
    %c0_118 = arith.constant 0 : index
    %334 = vector.load %arg25[%c0_117, %c0_118] : memref<1x64xf32, #tpu.memory_space<vmem>>, vector<1x64xf32>
    %335 = vector.broadcast %334 : vector<1x64xf32> to vector<6x64xf32>
    %336 = arith.addf %333, %335 : vector<6x64xf32>
    %337 = vector.extract_strided_slice %336 {offsets = [0, 0], sizes = [6, 32], strides = [1, 1]} : vector<6x64xf32> to vector<6x32xf32>
    %338 = vector.extract_strided_slice %336 {offsets = [0, 32], sizes = [6, 32], strides = [1, 1]} : vector<6x64xf32> to vector<6x32xf32>
    %339 = vector.shape_cast %338 : vector<6x32xf32> to vector<6x1x32xf32>
    %340 = vector.shape_cast %337 : vector<6x32xf32> to vector<1x6x32xf32>
    %341 = vector.broadcast %339 : vector<6x1x32xf32> to vector<6x6x32xf32>
    %342 = vector.broadcast %340 : vector<1x6x32xf32> to vector<6x6x32xf32>
    %343 = arith.addf %341, %342 : vector<6x6x32xf32>
    %cst_119 = arith.constant 0.000000e+00 : f32
    %344 = vector.broadcast %cst_119 : f32 to vector<6x6x32xf32>
    %345 = arith.cmpf ogt, %343, %344 : vector<6x6x32xf32>
    %cst_120 = arith.constant 2.000000e-01 : f32
    %346 = vector.broadcast %cst_120 : f32 to vector<6x6x32xf32>
    %347 = arith.mulf %346, %343 : vector<6x6x32xf32>
    %348 = arith.select %345, %343, %347 : vector<6x6x32xi1>, vector<6x6x32xf32>
    %349 = vector.shape_cast %331 : vector<1x32xf32> to vector<1x1x32xf32>
    %350 = vector.broadcast %349 : vector<1x1x32xf32> to vector<6x6x32xf32>
    %351 = arith.mulf %348, %350 : vector<6x6x32xf32>
    %cst_121 = arith.constant dense<0.000000e+00> : vector<6x6xf32>
    %352 = vector.multi_reduction <add>, %351, %cst_121 [2] : vector<6x6x32xf32> to vector<6x6xf32>
    %353 = arith.addf %352, %329 : vector<6x6xf32>
    %cst_122 = arith.constant dense<0xFF800000> : vector<6xf32>
    %354 = vector.multi_reduction <maximumf>, %353, %cst_122 [1] : vector<6x6xf32> to vector<6xf32>
    %355 = vector.shape_cast %354 : vector<6xf32> to vector<6x1xf32>
    %356 = vector.broadcast %355 : vector<6x1xf32> to vector<6x6xf32>
    %357 = arith.subf %353, %356 : vector<6x6xf32>
    %358 = math.exp %357 : vector<6x6xf32>
    %359 = arith.mulf %358, %330 : vector<6x6xf32>
    %cst_123 = arith.constant dense<0.000000e+00> : vector<6xf32>
    %360 = vector.multi_reduction <add>, %359, %cst_123 [1] : vector<6x6xf32> to vector<6xf32>
    %361 = vector.shape_cast %360 : vector<6xf32> to vector<6x1xf32>
    %362 = vector.broadcast %361 : vector<6x1xf32> to vector<6x6xf32>
    %363 = arith.divf %359, %362 : vector<6x6xf32>
    %cst_124 = arith.constant dense<0.000000e+00> : vector<6x32xf32>
    %364 = tpu.matmul %363, %337, %cst_124 {dimension_numbers = #tpu.dot_dimension_numbers<[1], [0], [0], [1], [0, 0, 1, 1], [], []>} : vector<6x6xf32>, vector<6x32xf32>, vector<6x32xf32> -> vector<6x32xf32>
    %c0_125 = arith.constant 0 : index
    %c0_126 = arith.constant 0 : index
    %365 = vector.load %arg27[%c0_125, %c0_126] : memref<1x32xf32, #tpu.memory_space<vmem>>, vector<1x32xf32>
    %366 = vector.broadcast %365 : vector<1x32xf32> to vector<6x32xf32>
    %367 = arith.addf %364, %366 : vector<6x32xf32>
    %cst_127 = arith.constant dense<0.000000e+00> : vector<32xf32>
    %368 = vector.multi_reduction <add>, %367, %cst_127 [0] : vector<6x32xf32> to vector<32xf32>
    %369 = vector.shape_cast %368 : vector<32xf32> to vector<1x32xf32>
    %cst_128 = arith.constant 6.000000e+00 : f32
    %370 = vector.broadcast %cst_128 : f32 to vector<1x32xf32>
    %371 = arith.divf %369, %370 : vector<1x32xf32>
    %372 = vector.shape_cast %371 : vector<1x32xf32> to vector<1x32xf32>
    %373 = vector.broadcast %372 : vector<1x32xf32> to vector<2x32xf32>
    %c0_129 = arith.constant 0 : index
    %c0_130 = arith.constant 0 : index
    %374 = vector.load %arg7[%c0_129, %c0_130] : memref<2x2xf32, #tpu.memory_space<vmem>>, vector<2x2xf32>
    %c0_131 = arith.constant 0 : index
    %c0_132 = arith.constant 0 : index
    %375 = vector.load %arg28[%c0_131, %c0_132] : memref<2x32xf32, #tpu.memory_space<vmem>>, vector<2x32xf32>
    %cst_133 = arith.constant dense<0.000000e+00> : vector<2x32xf32>
    %376 = tpu.matmul %374, %375, %cst_133 {dimension_numbers = #tpu.dot_dimension_numbers<[1], [0], [0], [1], [0, 0, 1, 1], [], []>} : vector<2x2xf32>, vector<2x32xf32>, vector<2x32xf32> -> vector<2x32xf32>
    %c0_134 = arith.constant 0 : index
    %c0_135 = arith.constant 0 : index
    %377 = vector.load %arg29[%c0_134, %c0_135] : memref<1x32xf32, #tpu.memory_space<vmem>>, vector<1x32xf32>
    %378 = vector.broadcast %377 : vector<1x32xf32> to vector<2x32xf32>
    %379 = arith.addf %376, %378 : vector<2x32xf32>
    %380 = tpu.concatenate %320, %373, %379 in 1 : vector<2x32xf32>, vector<2x32xf32>, vector<2x32xf32> -> vector<2x96xf32>
    %c0_136 = arith.constant 0 : index
    %c0_137 = arith.constant 0 : index
    %381 = vector.load %arg30[%c0_136, %c0_137] : memref<96x32xf32, #tpu.memory_space<vmem>>, vector<96x32xf32>
    %cst_138 = arith.constant dense<0.000000e+00> : vector<2x32xf32>
    %382 = tpu.matmul %380, %381, %cst_138 {dimension_numbers = #tpu.dot_dimension_numbers<[1], [0], [0], [1], [0, 0, 1, 1], [], []>} : vector<2x96xf32>, vector<96x32xf32>, vector<2x32xf32> -> vector<2x32xf32>
    %c0_139 = arith.constant 0 : index
    %c0_140 = arith.constant 0 : index
    %383 = vector.load %arg31[%c0_139, %c0_140] : memref<1x32xf32, #tpu.memory_space<vmem>>, vector<1x32xf32>
    %384 = vector.broadcast %383 : vector<1x32xf32> to vector<2x32xf32>
    %385 = arith.addf %382, %384 : vector<2x32xf32>
    %cst_141 = arith.constant 0.000000e+00 : f32
    %386 = vector.broadcast %cst_141 : f32 to vector<2x32xf32>
    %387 = arith.maximumf %385, %386 : vector<2x32xf32>
    %c0_142 = arith.constant 0 : index
    %c0_143 = arith.constant 0 : index
    %388 = vector.load %arg32[%c0_142, %c0_143] : memref<32x16xf32, #tpu.memory_space<vmem>>, vector<32x16xf32>
    %cst_144 = arith.constant dense<0.000000e+00> : vector<2x16xf32>
    %389 = tpu.matmul %387, %388, %cst_144 {dimension_numbers = #tpu.dot_dimension_numbers<[1], [0], [0], [1], [0, 0, 1, 1], [], []>} : vector<2x32xf32>, vector<32x16xf32>, vector<2x16xf32> -> vector<2x16xf32>
    %c0_145 = arith.constant 0 : index
    %c0_146 = arith.constant 0 : index
    %390 = vector.load %arg33[%c0_145, %c0_146] : memref<1x16xf32, #tpu.memory_space<vmem>>, vector<1x16xf32>
    %391 = vector.broadcast %390 : vector<1x16xf32> to vector<2x16xf32>
    %392 = arith.addf %389, %391 : vector<2x16xf32>
    %cst_147 = arith.constant 0.000000e+00 : f32
    %393 = vector.broadcast %cst_147 : f32 to vector<2x16xf32>
    %394 = arith.maximumf %392, %393 : vector<2x16xf32>
    %c0_148 = arith.constant 0 : index
    %c0_149 = arith.constant 0 : index
    %395 = vector.load %arg34[%c0_148, %c0_149] : memref<16x60xf32, #tpu.memory_space<vmem>>, vector<16x60xf32>
    %cst_150 = arith.constant dense<0.000000e+00> : vector<2x60xf32>
    %396 = tpu.matmul %394, %395, %cst_150 {dimension_numbers = #tpu.dot_dimension_numbers<[1], [0], [0], [1], [0, 0, 1, 1], [], []>} : vector<2x16xf32>, vector<16x60xf32>, vector<2x60xf32> -> vector<2x60xf32>
    %c0_151 = arith.constant 0 : index
    %c0_152 = arith.constant 0 : index
    %397 = vector.load %arg35[%c0_151, %c0_152] : memref<1x60xf32, #tpu.memory_space<vmem>>, vector<1x60xf32>
    %398 = vector.broadcast %397 : vector<1x60xf32> to vector<2x60xf32>
    %399 = arith.addf %396, %398 : vector<2x60xf32>
    %c0_153 = arith.constant 0 : index
    %c0_154 = arith.constant 0 : index
    %400 = vector.load %arg36[%c0_153, %c0_154] : memref<2x60xf32, #tpu.memory_space<vmem>>, vector<2x60xf32>
    tpu.vector_store %arg36[%c0_153, %c0_154], %399 {strides = array<i32>} : memref<2x60xf32, #tpu.memory_space<vmem>>, vector<2x60xf32>,
    return
  }
}

</mosaic_0001>

<bundles_post_ra>
// kernel: forward.1
= control target key start
LH: loop header
LB: loop body
LE: loop exit
PB: predicated region body
PF: predicated region fallthrough
CT: control target
= control target key end

     0   :  { %s7635_s6 = smov 1   ;;  %s7636_s10 = smov 2   ;;  %s9911_s0 = inlined_call_operand.smem [shape: u32[37], index: -1, kind: input, shape index: {}] }
   0x1   :  { %s7688_s5 = sld [smem:[%s9911_s0]]   ;;  %s7637_s14 = smov 3  }
   0x2   :  { %s7693_s9 = sld [smem:[%s9911_s0 + %s7635_s6]]   ;;  %s7638_s18 = smov 4  }
   0x3   :  { %s7698_s13 = sld [smem:[%s9911_s0 + %s7636_s10]]   ;;  %s7639_s22 = smov 5  }
   0x4   :  { %s7703_s17 = sld [smem:[%s9911_s0 + %s7637_s14]]   ;;  %s7640_s26 = smov 6  }
   0x5   :  { %s7708_s21 = sld [smem:[%s9911_s0 + %s7638_s18]]   ;;  %s7641_s30 = smov 7  }
   0x6   :  { %s7713_s25 = sld [smem:[%s9911_s0 + %s7639_s22]]   ;;  %s7642_s4 = smov 8  }
   0x7   :  { %s7718_s29 = sld [smem:[%s9911_s0 + %s7640_s26]]   ;;  %s7643_s10 = smov 9  }
   0x8   :  { %s7723_s3 = sld [smem:[%s9911_s0 + %s7641_s30]]   ;;  %s7644_s15 = smov 10  }
   0x9   :  { %s7728_s8 = sld [smem:[%s9911_s0 + %s7642_s4]]   ;;  %s7645_s20 = smov 11  }
   0xa   :  { %9987 = sst [smem:[#allocation5_spill]] %s7703_s17  ;;  %s7646_s26 = smov 12  }
   0xb   :  { %9988 = sst [smem:[#allocation6_spill]] %s7708_s21  ;;  %s7647_s1 = smov 13  }
   0xc   :  { %9989 = sst [smem:[#allocation7_spill]] %s7713_s25  ;;  %s7648_s7 = smov 14  }
   0xd   :  { %9990 = sst [smem:[#allocation8_spill]] %s7718_s29  ;;  %s7650_s22 = smov 16  }
   0xe   :  { %9991 = sst [smem:[#allocation9_spill]] %s7723_s3  ;;  %s7651_s28 = smov 17  }
   0xf   :  { %s7733_s14 = sld [smem:[%s9911_s0 + %s7643_s10]]  }
  0x10   :  { %s7738_s19 = sld [smem:[%s9911_s0 + %s7644_s15]]   ;;  %s7649_s15 = smov 15  }
  0x11   :  { %s7743_s24 = sld [smem:[%s9911_s0 + %s7645_s20]]  }
  0x12   :  { %s7748_s30 = sld [smem:[%s9911_s0 + %s7646_s26]]  }
  0x13   :  { %s7753_s6 = sld [smem:[%s9911_s0 + %s7647_s1]]  }
  0x14   :  { %s7758_s12 = sld [smem:[%s9911_s0 + %s7648_s7]]   ;;  %s7652_s7 = smov 18  }
  0x15   :  { %s7763_s20 = sld [smem:[%s9911_s0 + %s7649_s15]]   ;;  %s7653_s15 = smov 19  }
  0x16   :  { %s7768_s27 = sld [smem:[%s9911_s0 + %s7650_s22]]   ;;  %s7654_s22 = smov 20  }
  0x17   :  { %s7773_s4 = sld [smem:[%s9911_s0 + %s7651_s28]]   ;;  %s7655_s28 = smov 21  }
  0x18   :  { %s7778_s3 = sld [smem:[%s9911_s0 + %s7652_s7]]   ;;  %s7656_s7 = smov 22  }
  0x19   :  { %s7783_s29 = sld [smem:[%s9911_s0 + %s7653_s15]]   ;;  %s7657_s15 = smov 23  }
  0x1a   :  { %s7788_s25 = sld [smem:[%s9911_s0 + %s7654_s22]]   ;;  %s7658_s22 = smov 24  }
  0x1b   :  { %s7793_s21 = sld [smem:[%s9911_s0 + %s7655_s28]]   ;;  %s7659_s28 = smov 25  }
  0x1c   :  { %s7798_s17 = sld [smem:[%s9911_s0 + %s7656_s7]]   ;;  %s7660_s7 = smov 26  }
  0x1f   :  { %9992 = sst [smem:[#allocation10_spill]] %s7783_s29 }
  0x20   :  { %9993 = sst [smem:[#allocation11_spill]] %s7788_s25 }
  0x21   :  { %9994 = sst [smem:[#allocation12_spill]] %s7793_s21 }
  0x22   :  { %9995 = sst [smem:[#allocation13_spill]] %s7798_s17 }
  0x23   :  { %s7803_s29 = sld [smem:[%s9911_s0 + %s7657_s15]]   ;;  %s7661_s15 = smov 27  }
  0x24   :  { %s7808_s25 = sld [smem:[%s9911_s0 + %s7658_s22]]   ;;  %s7662_s22 = smov 28  }
  0x25   :  { %s7813_s21 = sld [smem:[%s9911_s0 + %s7659_s28]]   ;;  %s7663_s28 = smov 29  }
  0x26   :  { %s7818_s17 = sld [smem:[%s9911_s0 + %s7660_s7]]   ;;  %s7664_s7 = smov 30  }
  0x29   :  { %9996 = sst [smem:[#allocation14_spill]] %s7803_s29 }
  0x2a   :  { %9997 = sst [smem:[#allocation15_spill]] %s7808_s25 }
  0x2b   :  { %9998 = sst [smem:[#allocation16_spill]] %s7813_s21 }
  0x2c   :  { %9999 = sst [smem:[#allocation17_spill]] %s7818_s17 }
  0x2d   :  { %s7823_s29 = sld [smem:[%s9911_s0 + %s7661_s15]]   ;;  %s7665_s15 = smov 31  }
  0x2e   :  { %s7828_s25 = sld [smem:[%s9911_s0 + %s7662_s22]]   ;;  %s7666_s22 = smov 32  }
  0x2f   :  { %s7833_s21 = sld [smem:[%s9911_s0 + %s7663_s28]]   ;;  %s7667_s28 = smov 33  }
  0x30   :  { %s7838_s17 = sld [smem:[%s9911_s0 + %s7664_s7]]   ;;  %s7668_s7 = smov 34  }
  0x33   :  { %10000 = sst [smem:[#allocation18_spill]] %s7823_s29 }
  0x34   :  { %10001 = sst [smem:[#allocation19_spill]] %s7828_s25 }
  0x35   :  { %10002 = sst [smem:[#allocation20_spill]] %s7833_s21 }
  0x36   :  { %10003 = sst [smem:[#allocation21_spill]] %s7838_s17 }
  0x37   :  { %s7843_s29 = sld [smem:[%s9911_s0 + %s7665_s15]]   ;;  %s7669_s15 = smov 35  }
  0x38   :  { %s7848_s25 = sld [smem:[%s9911_s0 + %s7666_s22]]   ;;  %s7670_s22 = smov 36  }
  0x39   :  { %s7853_s21 = sld [smem:[%s9911_s0 + %s7667_s28]]  }
  0x3a   :  { %s7858_s17 = sld [smem:[%s9911_s0 + %s7668_s7]]  }
  0x3d   :  { %10004 = sst [smem:[#allocation22_spill]] %s7843_s29 }
  0x3e   :  { %10005 = sst [smem:[#allocation23_spill]] %s7848_s25 }
  0x3f   :  { %s7863_s29 = sld [smem:[%s9911_s0 + %s7669_s15]]  }
  0x40   :  { %s7868_s25 = sld [smem:[%s9911_s0 + %s7670_s22]]  }
  0x41   :  { %v154_v0 = vld [vmem:[%s7728_s8] sm:$0xff]  ;;  %v155_v1 = vld [vmem:[%s7728_s8 + $0x8] sm:$0xff]  ;;  %v9915_v2 = vmov 0.0|0.0   ;;  %vm7672_vm0 = vmmov 0   ;;  %v9917_v4 = vmov 0.0   ;;  %v242_v6 = vld [vmem:[%s7738_s19 + $0x18] sm:$0xff] }
  0x42   :  { %7148 = vmatprep.subr.bf16.mxu1 %v9915_v2  ;;  %v7149_v3 = vpack.c.bf16 %v155_v1, %v154_v0  ;;  %6989 = vmatprep.mubr.msk.f32.mxu1 %vm7672_vm0, %v9917_v4  ;;  %v240_v5 = vld [vmem:[%s7738_s19 + $0x8] sm:$0xff]  ;;  %v239_v7 = vld [vmem:[%s7738_s19] sm:$0xff]  ;;  %v241_v9 = vld [vmem:[%s7738_s19 + $0x10] sm:$0xff] }
  0x43   :  { %v7151_v8 = vpack.c.bf16 %v242_v6, %v240_v5  ;;  %6992 = vmatprep.subr.mxu0 %v9917_v4  ;;  %6994 = vmatprep.mubr.msk.f32.mxu0 %vm7672_vm0, %v9917_v4 }
  0x44   :  { %78 = vsyncpa [#allocation3], 0  ;;  %7150 = vmatpush3.bf16.msra.mxu1 %v7149_v3  ;;  %v153_v10 = vld [vmem:[%s7688_s5] sm:$0xff]  ;;  %vm9964_vm1 = vcmask 130048   ;;  %v7153_v11 = vpack.c.bf16 %v241_v9, %v239_v7  ;;  %v244_v12 = vld [vmem:[%s7738_s19 + $0x28] sm:$0xff]  ;;  %v249_v18 = vlaneseq  ;;  %s7674_s0 = smov 32  }
  0x45   :  { %7152 = vmatprep.subr.bf16.mxu1 %v7151_v8  ;;  %v246_v13 = vld [vmem:[%s7738_s19 + $0x38] sm:$0xff]  ;;  %v243_v15 = vld [vmem:[%s7738_s19 + $0x20] sm:$0xff]  ;;  %v245_v16 = vld [vmem:[%s7738_s19 + $0x30] sm:$0xff]  ;;  %s7675_s5 = smov 96   ;;  %s7676_s8 = smov 64   ;;  %vm259_vm2 = vcmask 261120  }
  0x46   :  { %v7155_v14 = vpack.c.bf16 %v246_v13, %v244_v12  ;;  %v7157_v17 = vpack.c.bf16 %v245_v16, %v243_v15  ;;  %v7891_v19 = vshrl.u32 %v249_v18, 7  ;;  %v7894_v20 = vld [vmem:[%s7748_s30] sm:$0xf]  ;;  %v7677_v46 = vmov 1966171168   ;;  %s10091_s19 = sld [smem:[#allocation13_spill]] }
  0x47   :  { %6990 = vmatmul.mubr.msk.f32.vlgmr.msra.gmra.mrb[0].mxu1 %vm9964_vm1, %v153_v10  ;;  %v151_v27 = vld [vmem:[%s7693_s9] sm:$0xff]  ;;  %v337_v47 = vunpack.c.l.s4 %v7677_v46  ;;  %vm631_vm11 = vcmask 1041409   ;;  %vm633_vm12 = vcmask 1042434   ;;  %vm635_vm13 = vcmask 1043459   ;;  %s10075_s9 = sld [smem:[#allocation11_spill]]  ;;  %s10093_s30 = sld [smem:[#allocation15_spill]] }
  0x48   :  { %7154 = vmatpush1.bf16.msra.mxu1 %v7153_v11  ;;  %327 = vmatprep.mubr.f32.mxu1 %v9917_v4  ;;  %v7897_v21 = vsub.s32 1, %v7891_v19  ;;  %v7900_v22 = vsub.s32 3, %v7891_v19  ;;  %v7903_v23 = vsub.s32 2, %v7891_v19  ;;  %v6875_v31 = vld [vmem:[%s7733_s14] ss:$0 sm:$0xff]  ;;  %v7923_v36 = vsub.s32 4, %v7891_v19 }
  0x49   :  { %7156 = vmatprep.subr.bf16.mxu1 %v7155_v14  ;;  %v7927_v38 = vsub.s32 5, %v7891_v19  ;;  %v7931_v40 = vsub.s32 6, %v7891_v19  ;;  %v7935_v42 = vsub.s32 0, %v7891_v19  ;;  %v7938_v43 = vsub.s32 7, %v7891_v19  ;;  %v247_v48 = vld [vmem:[%s7743_s24] sm:$0x3] }
  0x4a   :  { %v1066_v24 = vrot.slane %v7894_v20, %v7897_v21  ;;  %v2079_v25 = vrot.slane %v7894_v20, %v7900_v22  ;;  %v1573_v26 = vrot.slane %v7894_v20, %v7903_v23  ;;  %v503_v28 = vrot.slane %v151_v27, %v7897_v21  ;;  %s10090_s14 = sld [smem:[#allocation5_spill]]  ;;  %s10092_s24 = sld [smem:[#allocation6_spill]] }
  0x4b   :  { %v510_v29 = vrot.slane %v151_v27, %v7903_v23  ;;  %v517_v30 = vrot.slane %v151_v27, %v7900_v22  ;;  %v524_v37 = vrot.slane %v151_v27, %v7923_v36  ;;  %v531_v39 = vrot.slane %v151_v27, %v7927_v38  ;;  %s10099_s28 = sld [smem:[#allocation19_spill]]  ;;  %s10100_s1 = sld [smem:[#allocation9_spill]] }
  0x4c   :  { %7158 = vmatpush1.bf16.msra.mxu1 %v7157_v17  ;;  %1068 = vrot.lane.b32.xlu0 %v1066_v24, %s7674_s0  ;;  %v538_v41 = vrot.slane %v151_v27, %v7931_v40  ;;  %v545_v44 = vrot.slane %v151_v27, %v7938_v43  ;;  %v496_v45 = vrot.slane %v151_v27, %v7935_v42  ;;  %v338_v49 = vunpack.c.0.s8 %v337_v47  ;;  %s10101_s2 = sld [smem:[#allocation20_spill]]  ;;  %s10102_s7 = sld [smem:[#allocation21_spill]] }
  0x4d   :  { %7002 = vmatprep.subr.mxu1 %v9917_v4  ;;  %2081 = vrot.lane.b32.xlu1 %v2079_v25, %s7675_s5  ;;  %v252_v50 = vrot.slane %v247_v48, %v7935_v42  ;;  %v256_v51 = vrot.slane %v247_v48, %v7897_v21  ;;  %v459_v12 = vrot.slane %v7894_v20, %v7935_v42  ;;  %vm637_vm14 = vcmask 1044484   ;;  %s10103_s10 = sld [smem:[#allocation18_spill]]  ;;  %s10104_s11 = sld [smem:[#allocation23_spill]] }
  0x4e   :  { %v7946_v53 = vsub.s32 %v338_v49, %v7891_v19  ;;  %vm639_vm15 = vcmask 1045509   ;;  %s10105_s15 = sld [smem:[#allocation22_spill]]  ;;  %s7679_s16 = smov [#allocation2]  }
  0x4f   :  { %s6831_s18 = sshll.u32 %s7679_s16, 4  ;;  %s6832_s18 = int_to_ptr.vmem [resolvable:$true] %s6831_s18 }
  0x50   :  { %1575 = vrot.lane.b32.xlu0 %v1573_v26, %s7676_s8  ;;  %10006 = vst [vmem:[#allocation24_spill] sm:$0xff] %v7946_v53  ;;  %s7611_s22 = scalar_lea.vmem %s6832_s18, 32  ;;  %p7616_p1 = scmp.lt.s32.totalorder %s6832_s18, %s6832_s18 }
  0x51   :  { %498 = vbcast.lane.b32.xlu1 %v496_v45, 256  ;;  %p7612_p0 = scmp.ne.s32.totalorder %s6832_s18, %s7611_s22  ;;  %p7617_p2 = scmp.lt.s32.totalorder %s7611_s22, %s7611_s22 }
  0x53   :  { %p7618_p3 = por %p7617_p2, %p7616_p1 }
  0x54   :  { %505 = vbcast.lane.b32.xlu0 %v503_v28, 256 }
  0x55   :  { %p7619_p4 = pnand %p7618_p3, %p7612_p0 }
  0x58   :  { %512 = vbcast.lane.b32.xlu0 %v510_v29, 256 }
  0x5c   :  { %519 = vbcast.lane.b32.xlu0 %v517_v30, 256 }
  0x60   :  { %526 = vbcast.lane.b32.xlu0 %v524_v37, 256 }
  0x64   :  { %533 = vbcast.lane.b32.xlu0 %v531_v39, 256 }
  0x68   :  { %540 = vbcast.lane.b32.xlu0 %v538_v41, 256 }
  0x6c   :  { %547 = vbcast.lane.b32.xlu0 %v545_v44, 256 }
  0xbe   :  { %v7957_v3 = vpop.permute.xlu0 %1068 }
  0xc2   :  { %v7972_v25 = vpop.permute.xlu0 %1575 }
 0x11a   :  { %v233_v32 = vpop.f32.mrb[0].mxu1 }
 0x11b   :  { %v234_v33 = vadd.f32 %v6875_v31, %v233_v32  ;;  %v6991_v34 = vpop.f32.mrb[1].mxu1 }
 0x11d   :  { %v237_v35 = vmax.f32 %v234_v33, 0.0 }
 0x11f   :  { %6877 = vmatmul.mubr.msk.f32.vlgmr.msra.gmra.mrb[2].mxu1 %vm259_vm2, %v237_v35  ;;  %v7977_v35 = vpop.permute.xlu1 %2081 }
 0x120   :  { %7004 = vmatprep.mubr.msk.f32.mxu1 %vm7672_vm0, %v9917_v4 }
 0x1f2   :  { %v329_v52 = vpop.f32.mrb[2].mxu1 }
 0x1f3   :  { %v7948_v54 = vadd.f32 %v329_v52, %v252_v50  ;;  %v331_v55 = vpop.f32.mrb[3].mxu1 }
 0x1f4   :  { %v332_v56 = vadd.f32 %v331_v55, %v256_v51 }
 0x1f5   :  { %10007 = vst [vmem:[#allocation25_spill] sm:$0xff] %v7948_v54  ;;  %6993 = vmatpush3.msra.mxu0 %v7948_v54 }
 0x1f6   :  { %v335_v57 = vcombine.high %v332_v56, %v332_v56  ;;  %v342_v58 = vrot.slane %v332_v56, %v7946_v53  ;;  %6997 = vmatprep.subr.mxu0 %v9917_v4 }
 0x1f8   :  { %v349_v59 = vrot.slane %v335_v57, %v7946_v53  ;;  %v350_v60 = vcombine.high %v342_v58, %v342_v58  ;;  %v358_v61 = vrot.slane %v342_v58, %v7946_v53 }
 0x1fa   :  { %v351_v62 = vcombine.high %v349_v59, %v349_v59  ;;  %v365_v63 = vrot.slane %v349_v59, %v7946_v53  ;;  %v372_v0 = vrot.slane %v350_v60, %v7946_v53  ;;  %v380_v1 = vcombine.high %v358_v61, %v358_v61 }
 0x1fb   :  { %v387_v5 = vrot.slane %v358_v61, %v7935_v42 }
 0x1fc   :  { %v379_v6 = vrot.slane %v351_v62, %v7946_v53  ;;  %v382_v7 = vcombine.high %v372_v0, %v372_v0  ;;  %v391_v8 = vrot.slane %v372_v0, %v7935_v42  ;;  %v395_v9 = vrot.slane %v380_v1, %v7935_v42 }
 0x1fd   :  { %v403_v10 = vrot.slane %v365_v63, %v7935_v42  ;;  %v424_v11 = vadd.f32 %v387_v5, %v7948_v54  ;;  %v381_v17 = vcombine.high %v365_v63, %v365_v63 }
 0x1fe   :  { %v399_v13 = vrot.slane %v382_v7, %v7935_v42  ;;  %v425_v14 = vadd.f32 %v391_v8, %v7948_v54  ;;  %v426_v15 = vadd.f32 %v395_v9, %v7948_v54  ;;  %v407_v24 = vrot.slane %v379_v6, %v7935_v42 }
 0x1ff   :  { %v428_v16 = vadd.f32 %v403_v10, %v7948_v54  ;;  %vm432_vm3 = vcmp.gt.f32.partialorder %v424_v11, 0.0  ;;  %v440_v26 = vmul.f32 0.2, %v424_v11  ;;  %v383_v31 = vcombine.high %v379_v6, %v379_v6 }
 0x200   :  { %v427_v27 = vadd.f32 %v399_v13, %v7948_v54  ;;  %vm433_vm4 = vcmp.gt.f32.partialorder %v425_v14, 0.0  ;;  %v441_v28 = vmul.f32 0.2, %v425_v14  ;;  %vm434_vm5 = vcmp.gt.f32.partialorder %v426_v15, 0.0 }
 0x201   :  { %v442_v20 = vmul.f32 0.2, %v426_v15  ;;  %v448_v29 = vsel %vm432_vm3, %v424_v11, %v440_v26  ;;  %vm436_vm6 = vcmp.gt.f32.partialorder %v428_v16, 0.0  ;;  %v444_v30 = vmul.f32 0.2, %v428_v16 }
 0x202   :  { %v1578_v32 = vmul.f32 %v7972_v25, %v448_v29  ;;  %v1071_v33 = vmul.f32 %v7957_v3, %v448_v29  ;;  %v449_v34 = vsel %vm433_vm4, %v425_v14, %v441_v28  ;;  %v460_v41 = vmul.f32 %v459_v12, %v448_v29 }
 0x203   :  { %v450_v37 = vsel %vm434_vm5, %v426_v15, %v442_v20  ;;  %v452_v39 = vsel %vm436_vm6, %v428_v16, %v444_v30  ;;  %v411_v44 = vrot.slane %v381_v17, %v7935_v42  ;;  %v461_v45 = vmul.f32 %v459_v12, %v449_v34 }
 0x204   :  { %1594 = vrot.lane.b32.xlu0 %v1578_v32, %s7676_s8  ;;  %1087 = vrot.lane.b32.xlu1 %v1071_v33, %s7675_s5  ;;  %v443_v46 = vmul.f32 0.2, %v427_v27  ;;  %v429_v47 = vadd.f32 %v407_v24, %v7948_v54  ;;  %v462_v48 = vmul.f32 %v459_v12, %v450_v37  ;;  %v464_v49 = vmul.f32 %v459_v12, %v452_v39 }
 0x205   :  { %vm435_vm7 = vcmp.gt.f32.partialorder %v427_v27, 0.0  ;;  %v415_v50 = vrot.slane %v383_v31, %v7935_v42  ;;  %v2084_v51 = vmul.f32 %v7977_v35, %v448_v29  ;;  %v430_v56 = vadd.f32 %v411_v44, %v7948_v54 }
 0x206   :  { %v451_v52 = vsel %vm435_vm7, %v427_v27, %v443_v46  ;;  %vm437_vm8 = vcmp.gt.f32.partialorder %v429_v47, 0.0  ;;  %v445_v55 = vmul.f32 0.2, %v429_v47  ;;  %v1072_v57 = vmul.f32 %v7957_v3, %v449_v34 }
 0x207   :  { %v463_v58 = vmul.f32 %v459_v12, %v451_v52  ;;  %vm438_vm9 = vcmp.gt.f32.partialorder %v430_v56, 0.0  ;;  %v446_v60 = vmul.f32 0.2, %v430_v56  ;;  %v431_v61 = vadd.f32 %v415_v50, %v7948_v54 }
 0x208   :  { %2100 = vrot.lane.b32.xlu0 %v2084_v51, %s7674_s0  ;;  %v453_v59 = vsel %vm437_vm8, %v429_v47, %v445_v55  ;;  %v2086_v5 = vmul.f32 %v7977_v35, %v450_v37  ;;  %v1582_v8 = vmul.f32 %v7972_v25, %v452_v39  ;;  %v468_v9 = vsel %vm259_vm2, %v460_v41, 0.0 }
 0x209   :  { %v454_v62 = vsel %vm438_vm9, %v430_v56, %v446_v60  ;;  %v465_v63 = vmul.f32 %v459_v12, %v453_v59  ;;  %vm439_vm10 = vcmp.gt.f32.partialorder %v431_v61, 0.0  ;;  %v447_v0 = vmul.f32 0.2, %v431_v61 }
 0x20a   :  { %v466_v1 = vmul.f32 %v459_v12, %v454_v62  ;;  %v471_v10 = vsel %vm259_vm2, %v461_v45, 0.0  ;;  %v474_v11 = vsel %vm259_vm2, %v462_v48, 0.0  ;;  %v1073_v13 = vmul.f32 %v7957_v3, %v450_v37 }
 0x20b   :  { %v455_v6 = vsel %vm439_vm10, %v431_v61, %v447_v0  ;;  %v1075_v14 = vmul.f32 %v7957_v3, %v452_v39  ;;  %v1579_v15 = vmul.f32 %v7972_v25, %v449_v34  ;;  %v1580_v16 = vmul.f32 %v7972_v25, %v450_v37 }
 0x20c   :  { %1089 = vrot.lane.b32.xlu0 %v1072_v57, %s7675_s5  ;;  %v7992_v7 = vmul.f32 %v459_v12, %v455_v6  ;;  %v480_v12 = vsel %vm259_vm2, %v464_v49, 0.0  ;;  %v2085_v17 = vmul.f32 %v7977_v35, %v449_v34  ;;  %v2088_v24 = vmul.f32 %v7977_v35, %v452_v39  ;;  %v8030_v34 = vpop.permute.xlu0 %505 }
 0x20d   :  { %v1074_v26 = vmul.f32 %v7957_v3, %v451_v52  ;;  %v1581_v27 = vmul.f32 %v7972_v25, %v451_v52  ;;  %v1076_v28 = vmul.f32 %v7957_v3, %v453_v59  ;;  %v2087_v20 = vmul.f32 %v7977_v35, %v451_v52  ;;  %10008 = vst [vmem:[#allocation26_spill] sm:$0xff] %v8030_v34 }
 0x20e   :  { %v1077_v29 = vmul.f32 %v7957_v3, %v454_v62  ;;  %v2089_v30 = vmul.f32 %v7977_v35, %v453_v59  ;;  %v1583_v31 = vmul.f32 %v7972_v25, %v453_v59  ;;  %v2090_v32 = vmul.f32 %v7977_v35, %v454_v62 }
 0x20f   :  { %v1584_v33 = vmul.f32 %v7972_v25, %v454_v62  ;;  %v486_v37 = vsel %vm259_vm2, %v466_v1, 0.0  ;;  %v477_v41 = vsel %vm259_vm2, %v463_v58, 0.0  ;;  %v483_v44 = vsel %vm259_vm2, %v465_v63, 0.0 }
 0x210   :  { %2104 = vrot.lane.b32.xlu0 %v2086_v5, %s7674_s0  ;;  %v8033_v39 = vpop.permute.xlu0 %512  ;;  %v1585_v48 = vmul.f32 %v7972_v25, %v455_v6  ;;  %v1078_v49 = vmul.f32 %v7957_v3, %v455_v6  ;;  %v2091_v51 = vmul.f32 %v7977_v35, %v455_v6  ;;  %v7678_v52 = vmov 0   ;;  %v8053_v25 = vpop.permute.xlu1 %498 }
 0x211   :  { %10009 = vst [vmem:[#allocation27_spill] sm:$0xff] %v8033_v39  ;;  %7294 = vset.pattern.permute.xlu1 %v7678_v52  ;;  %7293 = vset.pattern.permute.xlu0 %v7678_v52  ;;  %10015 = vst [vmem:[#allocation33_spill] sm:$0xff] %v8053_v25  ;;  %v489_v61 = vsel %vm259_vm2, %v7992_v7, 0.0  ;;  %vm641_vm3 = vcmask 1046534   ;;  %vm643_vm4 = vcmask 1047559   ;;  %vm646_vm5 = vcmask 64512  }
 0x212   :  { %vm9986_vm6 = vcmask 523264   ;;  %vm9985_vm7 = vcmask 785408  }
 0x214   :  { %1602 = vrot.lane.b32.xlu0 %v1582_v8, %s7676_s8  ;;  %v8037_v45 = vpop.permute.xlu0 %519 }
 0x215   :  { %10010 = vst [vmem:[#allocation28_spill] sm:$0xff] %v8037_v45 }
 0x218   :  { %v8039_v46 = vpop.permute.xlu0 %526 }
 0x219   :  { %10011 = vst [vmem:[#allocation29_spill] sm:$0xff] %v8039_v46 }
 0x21c   :  { %v8041_v47 = vpop.permute.xlu0 %533 }
 0x21d   :  { %10012 = vst [vmem:[#allocation30_spill] sm:$0xff] %v8041_v47 }
 0x220   :  { %v8047_v50 = vpop.permute.xlu0 %540 }
 0x221   :  { %10013 = vst [vmem:[#allocation31_spill] sm:$0xff] %v8047_v50 }
 0x224   :  { %v8051_v55 = vpop.permute.xlu0 %547 }
 0x225   :  { %10014 = vst [vmem:[#allocation32_spill] sm:$0xff] %v8051_v55 }
 0x228   :  { %469 = vadd.xlane.f32.xlu1 %v468_v9 }
 0x233   :  { %472 = vadd.xlane.f32.xlu0 %v471_v10 }
 0x237   :  { %475 = vadd.xlane.f32.xlu0 %v474_v11 }
 0x239   :  { %1091 = vrot.lane.b32.xlu1 %v1073_v13, %s7675_s5 }
 0x23b   :  { %481 = vadd.xlane.f32.xlu0 %v480_v12 }
 0x23d   :  { %1095 = vrot.lane.b32.xlu1 %v1075_v14, %s7675_s5 }
 0x241   :  { %1596 = vrot.lane.b32.xlu1 %v1579_v15, %s7676_s8 }
 0x245   :  { %1598 = vrot.lane.b32.xlu1 %v1580_v16, %s7676_s8 }
 0x249   :  { %2102 = vrot.lane.b32.xlu1 %v2085_v17, %s7674_s0 }
 0x24d   :  { %2108 = vrot.lane.b32.xlu1 %v2088_v24, %s7674_s0 }
 0x251   :  { %1093 = vrot.lane.b32.xlu0 %v1074_v26, %s7675_s5  ;;  %1600 = vrot.lane.b32.xlu1 %v1581_v27, %s7676_s8 }
 0x255   :  { %1097 = vrot.lane.b32.xlu0 %v1076_v28, %s7675_s5  ;;  %2106 = vrot.lane.b32.xlu1 %v2087_v20, %s7674_s0 }
 0x259   :  { %1099 = vrot.lane.b32.xlu0 %v1077_v29, %s7675_s5  ;;  %2110 = vrot.lane.b32.xlu1 %v2089_v30, %s7674_s0 }
 0x25d   :  { %1604 = vrot.lane.b32.xlu0 %v1583_v31, %s7676_s8  ;;  %2112 = vrot.lane.b32.xlu1 %v2090_v32, %s7674_s0 }
 0x261   :  { %1606 = vrot.lane.b32.xlu0 %v1584_v33, %s7676_s8 }
 0x276   :  { %v1595_v56 = vpop.permute.xlu0 %1594  ;;  %v1088_v58 = vpop.permute.xlu1 %1087 }
 0x277   :  { %v1618_v62 = vsel %vm259_vm2, %v1595_v56, 0.0  ;;  %v1111_v0 = vsel %vm259_vm2, %v1088_v58, 0.0 }
 0x27a   :  { %v2101_v57 = vpop.permute.xlu0 %2100 }
 0x27b   :  { %v2124_v5 = vsel %vm259_vm2, %v2101_v57, 0.0 }
 0x27e   :  { %v1090_v3 = vpop.permute.xlu0 %1089 }
 0x27f   :  { %v1114_v7 = vsel %vm259_vm2, %v1090_v3, 0.0 }
 0x280   :  { %487 = vadd.xlane.f32.xlu0 %v486_v37 }
 0x281   :  { %478 = vadd.xlane.f32.xlu1 %v477_v41 }
 0x282   :  { %v2105_v60 = vpop.permute.xlu0 %2104 }
 0x283   :  { %v2130_v17 = vsel %vm259_vm2, %v2105_v60, 0.0 }
 0x285   :  { %484 = vadd.xlane.f32.xlu1 %v483_v44 }
 0x286   :  { %v1603_v63 = vpop.permute.xlu0 %1602 }
 0x287   :  { %v1630_v28 = vsel %vm259_vm2, %v1603_v63, 0.0 }
 0x296   :  { %1608 = vrot.lane.b32.xlu0 %v1585_v48, %s7676_s8  ;;  %1101 = vrot.lane.b32.xlu1 %v1078_v49, %s7675_s5 }
 0x29a   :  { %2114 = vrot.lane.b32.xlu0 %v2091_v51, %s7674_s0 }
 0x2b5   :  { %v8055_v59 = vpop.xlane.xlu1 %469 }
 0x2b9   :  { %490 = vadd.xlane.f32.xlu0 %v489_v61  ;;  %v1092_v35 = vpop.permute.xlu1 %1091 }
 0x2ba   :  { %1619 = vadd.xlane.f32.xlu1 %v1618_v62  ;;  %v1117_v12 = vsel %vm259_vm2, %v1092_v35, 0.0 }
 0x2bd   :  { %1112 = vadd.xlane.f32.xlu0 %v1111_v0  ;;  %v1096_v1 = vpop.permute.xlu1 %1095 }
 0x2be   :  { %2125 = vadd.xlane.f32.xlu1 %v2124_v5  ;;  %v1123_v8 = vsel %vm259_vm2, %v1096_v1, 0.0 }
 0x2c0   :  { %v8062_v6 = vpop.xlane.xlu0 %472 }
 0x2c1   :  { %1124 = vadd.xlane.f32.xlu0 %v1123_v8  ;;  %v1597_v9 = vpop.permute.xlu1 %1596 }
 0x2c2   :  { %1115 = vadd.xlane.f32.xlu1 %v1114_v7  ;;  %v1621_v11 = vsel %vm259_vm2, %v1597_v9, 0.0  ;;  %v8089_v7 = vadd.f32 %v8030_v34, %v8062_v6 }
 0x2c4   :  { %v8066_v10 = vpop.xlane.xlu0 %475 }
 0x2c5   :  { %1622 = vadd.xlane.f32.xlu0 %v1621_v11  ;;  %v1599_v13 = vpop.permute.xlu1 %1598 }
 0x2c6   :  { %1118 = vadd.xlane.f32.xlu1 %v1117_v12  ;;  %v1624_v15 = vsel %vm259_vm2, %v1599_v13, 0.0  ;;  %v8097_v13 = vadd.f32 %v8053_v25, %v8055_v59  ;;  %v8103_v12 = vadd.f32 %v8033_v39, %v8066_v10 }
 0x2c8   :  { %v482_v14 = vpop.xlane.xlu0 %481 }
 0x2c9   :  { %1625 = vadd.xlane.f32.xlu0 %v1624_v15  ;;  %v2103_v16 = vpop.permute.xlu1 %2102  ;;  %v8107_v6 = vadd.f32 %v8039_v46, %v482_v14 }
 0x2ca   :  { %2131 = vadd.xlane.f32.xlu1 %v2130_v17  ;;  %v2127_v26 = vsel %vm259_vm2, %v2103_v16, 0.0 }
 0x2cc   :  { %v1094_v24 = vpop.permute.xlu0 %1093 }
 0x2cd   :  { %2128 = vadd.xlane.f32.xlu0 %v2127_v26  ;;  %v2109_v27 = vpop.permute.xlu1 %2108  ;;  %v1120_v31 = vsel %vm259_vm2, %v1094_v24, 0.0 }
 0x2ce   :  { %1631 = vadd.xlane.f32.xlu1 %v1630_v28  ;;  %v2136_v29 = vsel %vm259_vm2, %v2109_v27, 0.0 }
 0x2d0   :  { %v1098_v20 = vpop.permute.xlu0 %1097 }
 0x2d1   :  { %2137 = vadd.xlane.f32.xlu0 %v2136_v29  ;;  %v1601_v30 = vpop.permute.xlu1 %1600  ;;  %v1126_v41 = vsel %vm259_vm2, %v1098_v20, 0.0 }
 0x2d2   :  { %1121 = vadd.xlane.f32.xlu1 %v1120_v31  ;;  %v1627_v33 = vsel %vm259_vm2, %v1601_v30, 0.0 }
 0x2d4   :  { %v1100_v32 = vpop.permute.xlu0 %1099 }
 0x2d5   :  { %1628 = vadd.xlane.f32.xlu0 %v1627_v33  ;;  %v2107_v37 = vpop.permute.xlu1 %2106  ;;  %v1129_v51 = vsel %vm259_vm2, %v1100_v32, 0.0 }
 0x2d6   :  { %1127 = vadd.xlane.f32.xlu1 %v1126_v41  ;;  %v2133_v48 = vsel %vm259_vm2, %v2107_v37, 0.0 }
 0x2d8   :  { %v1605_v44 = vpop.permute.xlu0 %1604 }
 0x2d9   :  { %2134 = vadd.xlane.f32.xlu0 %v2133_v48  ;;  %v2111_v49 = vpop.permute.xlu1 %2110  ;;  %v1633_v57 = vsel %vm259_vm2, %v1605_v44, 0.0 }
 0x2da   :  { %1130 = vadd.xlane.f32.xlu1 %v1129_v51  ;;  %v2139_v52 = vsel %vm259_vm2, %v2111_v49, 0.0 }
 0x2dc   :  { %v1607_v3 = vpop.permute.xlu0 %1606 }
 0x2dd   :  { %2140 = vadd.xlane.f32.xlu0 %v2139_v52  ;;  %v2113_v56 = vpop.permute.xlu1 %2112  ;;  %v1636_v60 = vsel %vm259_vm2, %v1607_v3, 0.0 }
 0x2de   :  { %1634 = vadd.xlane.f32.xlu1 %v1633_v57  ;;  %v2142_v58 = vsel %vm259_vm2, %v2113_v56, 0.0 }
 0x2e1   :  { %2143 = vadd.xlane.f32.xlu0 %v2142_v58 }
 0x2e2   :  { %1637 = vadd.xlane.f32.xlu1 %v1636_v60 }
 0x30d   :  { %v488_v61 = vpop.xlane.xlu0 %487 }
 0x30e   :  { %v479_v35 = vpop.xlane.xlu1 %478  ;;  %v8093_v11 = vadd.f32 %v8047_v50, %v488_v61 }
 0x30f   :  { %v8111_v15 = vadd.f32 %v8037_v45, %v479_v35 }
 0x311   :  { %v1609_v62 = vpop.permute.xlu0 %1608 }
 0x312   :  { %v485_v63 = vpop.xlane.xlu1 %484  ;;  %v1639_v0 = vsel %vm259_vm2, %v1609_v62, 0.0 }
 0x313   :  { %1640 = vadd.xlane.f32.xlu1 %v1639_v0  ;;  %v8115_v59 = vadd.f32 %v8041_v47, %v485_v63 }
 0x315   :  { %v2115_v1 = vpop.permute.xlu0 %2114 }
 0x316   :  { %v1102_v5 = vpop.permute.xlu1 %1101  ;;  %v2145_v8 = vsel %vm259_vm2, %v2115_v1, 0.0 }
 0x317   :  { %2146 = vadd.xlane.f32.xlu1 %v2145_v8  ;;  %v1132_v9 = vsel %vm259_vm2, %v1102_v5, 0.0 }
 0x318   :  { %1133 = vadd.xlane.f32.xlu0 %v1132_v9 }
 0x328   :  { %577 = vperm.xlu1 %7294, %v8089_v7  }
 0x32c   :  { %592 = vperm.xlu1 %7294, %v8093_v11  }
 0x32e   :  { %574 = vperm.xlu0 %7293, %v8097_v13  }
 0x332   :  { %580 = vperm.xlu0 %7293, %v8103_v12  }
 0x336   :  { %586 = vperm.xlu0 %7293, %v8107_v6  }
 0x33a   :  { %583 = vperm.xlu0 %7293, %v8111_v15  }
 0x33e   :  { %589 = vperm.xlu0 %7293, %v8115_v59  }
 0x346   :  { %v491_v16 = vpop.xlane.xlu0 %490 }
 0x347   :  { %v8119_v10 = vadd.f32 %v8051_v55, %v491_v16  ;;  %v1620_v17 = vpop.xlane.xlu1 %1619 }
 0x348   :  { %v8122_v14 = vadd.f32 %v1620_v17, %v8053_v25 }
 0x349   :  { %595 = vperm.xlu1 %7294, %v8119_v10  }
 0x34a   :  { %v1113_v24 = vpop.xlane.xlu0 %1112  ;;  %1659 = vperm.xlu0 %7293, %v8122_v14  }
 0x34b   :  { %v8127_v26 = vadd.f32 %v1113_v24, %v8053_v25  ;;  %v2126_v27 = vpop.xlane.xlu1 %2125 }
 0x34c   :  { %v8130_v28 = vadd.f32 %v2126_v27, %v8053_v25 }
 0x34d   :  { %1152 = vperm.xlu1 %7294, %v8127_v26  }
 0x34e   :  { %v1125_v20 = vpop.xlane.xlu0 %1124  ;;  %2165 = vperm.xlu0 %7293, %v8130_v28  }
 0x34f   :  { %v8135_v29 = vadd.f32 %v1125_v20, %v8039_v46  ;;  %v1116_v30 = vpop.xlane.xlu1 %1115 }
 0x350   :  { %v8138_v31 = vadd.f32 %v1116_v30, %v8030_v34 }
 0x351   :  { %1164 = vperm.xlu1 %7294, %v8135_v29  }
 0x352   :  { %v1623_v32 = vpop.xlane.xlu0 %1622  ;;  %1155 = vperm.xlu0 %7293, %v8138_v31  }
 0x353   :  { %v8143_v33 = vadd.f32 %v1623_v32, %v8030_v34  ;;  %v1119_v37 = vpop.xlane.xlu1 %1118 }
 0x354   :  { %v8146_v41 = vadd.f32 %v1119_v37, %v8033_v39 }
 0x355   :  { %1662 = vperm.xlu1 %7294, %v8143_v33  }
 0x356   :  { %v1626_v44 = vpop.xlane.xlu0 %1625  ;;  %1158 = vperm.xlu0 %7293, %v8146_v41  }
 0x357   :  { %v8151_v48 = vadd.f32 %v1626_v44, %v8033_v39  ;;  %v2132_v49 = vpop.xlane.xlu1 %2131 }
 0x358   :  { %v8154_v51 = vadd.f32 %v2132_v49, %v8033_v39 }
 0x359   :  { %1665 = vperm.xlu1 %7294, %v8151_v48  }
 0x35a   :  { %v2129_v52 = vpop.xlane.xlu0 %2128  ;;  %2171 = vperm.xlu0 %7293, %v8154_v51  }
 0x35b   :  { %v8159_v56 = vadd.f32 %v2129_v52, %v8030_v34  ;;  %v1632_v57 = vpop.xlane.xlu1 %1631 }
 0x35c   :  { %v8162_v3 = vadd.f32 %v1632_v57, %v8039_v46 }
 0x35d   :  { %2168 = vperm.xlu1 %7294, %v8159_v56  }
 0x35e   :  { %10016 = vst [vmem:[#allocation34_spill] sm:$0xff] %v8162_v3  ;;  %v2138_v58 = vpop.xlane.xlu0 %2137  ;;  %1671 = vperm.xlu0 %7293, %v8162_v3  }
 0x35f   :  { %v8167_v60 = vadd.f32 %v2138_v58, %v8039_v46  ;;  %v1122_v61 = vpop.xlane.xlu1 %1121 }
 0x360   :  { %v8170_v35 = vadd.f32 %v1122_v61, %v8037_v45 }
 0x361   :  { %10017 = vst [vmem:[#allocation35_spill] sm:$0xff] %v8167_v60  ;;  %2177 = vperm.xlu1 %7294, %v8167_v60  }
 0x362   :  { %v1629_v62 = vpop.xlane.xlu0 %1628  ;;  %1161 = vperm.xlu0 %7293, %v8170_v35  }
 0x363   :  { %v8175_v63 = vadd.f32 %v1629_v62, %v8037_v45  ;;  %v1128_v0 = vpop.xlane.xlu1 %1127  ;;  %v8214_v62 = vld [vmem:[%s7698_s13] sm:$0xff]  ;;  %s10076_s13 = sld [smem:[#allocation10_spill]] }
 0x364   :  { %v8178_v1 = vadd.f32 %v1128_v0, %v8041_v47 }
 0x365   :  { %1668 = vperm.xlu1 %7294, %v8175_v63  }
 0x366   :  { %v2135_v5 = vpop.xlane.xlu0 %2134  ;;  %1167 = vperm.xlu0 %7293, %v8178_v1  }
 0x367   :  { %v8183_v8 = vadd.f32 %v2135_v5, %v8037_v45  ;;  %v1131_v9 = vpop.xlane.xlu1 %1130  ;;  %v719_v5 = vrot.slane %v8214_v62, %v7935_v42 }
 0x368   :  { %v8186_v16 = vadd.f32 %v1131_v9, %v8047_v50  ;;  %v726_v9 = vrot.slane %v8214_v62, %v7897_v21 }
 0x369   :  { %10018 = vst [vmem:[#allocation36_spill] sm:$0xff] %v8183_v8  ;;  %2174 = vperm.xlu1 %7294, %v8183_v8  }
 0x36a   :  { %v2141_v17 = vpop.xlane.xlu0 %2140  ;;  %1170 = vperm.xlu0 %7293, %v8186_v16  }
 0x36b   :  { %v8191_v24 = vadd.f32 %v2141_v17, %v8041_v47  ;;  %v1635_v27 = vpop.xlane.xlu1 %1634  ;;  %v740_v17 = vrot.slane %v8214_v62, %v7900_v22 }
 0x36c   :  { %v8194_v20 = vadd.f32 %v1635_v27, %v8041_v47  ;;  %v733_v27 = vrot.slane %v8214_v62, %v7903_v23 }
 0x36d   :  { %10019 = vst [vmem:[#allocation37_spill] sm:$0xff] %v8191_v24  ;;  %2180 = vperm.xlu1 %7294, %v8191_v24  }
 0x36e   :  { %10020 = vst [vmem:[#allocation38_spill] sm:$0xff] %v8194_v20  ;;  %v2144_v30 = vpop.xlane.xlu0 %2143  ;;  %1674 = vperm.xlu0 %7293, %v8194_v20  }
 0x36f   :  { %v8199_v32 = vadd.f32 %v2144_v30, %v8047_v50  ;;  %v1638_v37 = vpop.xlane.xlu1 %1637  ;;  %v754_v30 = vrot.slane %v8214_v62, %v7927_v38 }
 0x370   :  { %v8202_v44 = vadd.f32 %v1638_v37, %v8047_v50  ;;  %v747_v37 = vrot.slane %v8214_v62, %v7923_v36 }
 0x371   :  { %10021 = vst [vmem:[#allocation39_spill] sm:$0xff] %v8199_v32  ;;  %2183 = vperm.xlu1 %7294, %v8199_v32  }
 0x372   :  { %10022 = vst [vmem:[#allocation40_spill] sm:$0xff] %v8202_v44  ;;  %1677 = vperm.xlu0 %7293, %v8202_v44  }
 0x3a0   :  { %v1641_v49 = vpop.xlane.xlu1 %1640 }
 0x3a1   :  { %v8207_v52 = vadd.f32 %v1641_v49, %v8051_v55 }
 0x3a3   :  { %10023 = vst [vmem:[#allocation41_spill] sm:$0xff] %v8207_v52  ;;  %1680 = vperm.xlu0 %7293, %v8207_v52  }
 0x3a4   :  { %v2147_v57 = vpop.xlane.xlu1 %2146 }
 0x3a5   :  { %v8211_v58 = vadd.f32 %v2147_v57, %v8051_v55  ;;  %v1134_v61 = vpop.xlane.xlu0 %1133 }
 0x3a6   :  { %v8217_v0 = vadd.f32 %v1134_v61, %v8051_v55 }
 0x3a7   :  { %10024 = vst [vmem:[#allocation42_spill] sm:$0xff] %v8211_v58  ;;  %2186 = vperm.xlu0 %7293, %v8211_v58  }
 0x3a8   :  { %1173 = vperm.xlu1 %7294, %v8217_v0   ;;  %v578_v2 = vpop.permute.xlu1 %577 }
 0x3ab   :  { %721 = vbcast.lane.b32.xlu0 %v719_v5, 256  ;;  %v598_v5 = vand.u32 127, %v249_v18 }
 0x3ac   :  { %728 = vbcast.lane.b32.xlu1 %v726_v9, 256 }
 0x3ad   :  { %v575_v49 = vpop.permute.xlu0 %574  ;;  %v8235_v4 = vsub.s32 %v598_v5, %v7891_v19 }
 0x3af   :  { %742 = vbcast.lane.b32.xlu0 %v740_v17, 256  ;;  %v602_v17 = vrot.slane %v575_v49, %v8235_v4  ;;  %v606_v47 = vrot.slane %v578_v2, %v8235_v4 }
 0x3b0   :  { %735 = vbcast.lane.b32.xlu1 %v733_v27, 256 }
 0x3b1   :  { %v581_v57 = vpop.permute.xlu0 %580  ;;  %v632_v18 = vsel %vm631_vm11, %v606_v47, %v602_v17 }
 0x3b2   :  { %v610_v27 = vrot.slane %v581_v57, %v8235_v4 }
 0x3b3   :  { %756 = vbcast.lane.b32.xlu0 %v754_v30, 256 }
 0x3b4   :  { %749 = vbcast.lane.b32.xlu1 %v747_v37, 256  ;;  %v593_v37 = vpop.permute.xlu1 %592  ;;  %v634_v39 = vsel %vm633_vm12, %v610_v27, %v632_v18  ;;  %v761_v27 = vrot.slane %v8214_v62, %v7931_v40 }
 0x3b5   :  { %v587_v61 = vpop.permute.xlu0 %586  ;;  %v626_v47 = vrot.slane %v593_v37, %v8235_v4 }
 0x3b6   :  { %v618_v49 = vrot.slane %v587_v61, %v8235_v4 }
 0x3b9   :  { %v584_v9 = vpop.permute.xlu0 %583 }
 0x3ba   :  { %v614_v30 = vrot.slane %v584_v9, %v8235_v4 }
 0x3bc   :  { %v636_v19 = vsel %vm635_vm13, %v614_v30, %v634_v39 }
 0x3bd   :  { %v590_v45 = vpop.permute.xlu0 %589  ;;  %v638_v2 = vsel %vm637_vm14, %v618_v49, %v636_v19 }
 0x3be   :  { %v622_v5 = vrot.slane %v590_v45, %v8235_v4 }
 0x3c0   :  { %v640_v25 = vsel %vm639_vm15, %v622_v5, %v638_v2 }
 0x3c1   :  { %v642_v17 = vsel %vm641_vm3, %v626_v47, %v640_v25 }
 0x3c8   :  { %v596_v57 = vpop.permute.xlu1 %595 }
 0x3c9   :  { %v630_v9 = vrot.slane %v596_v57, %v8235_v4  ;;  %v1660_v61 = vpop.permute.xlu0 %1659 }
 0x3ca   :  { %v1685_v60 = vrot.slane %v1660_v61, %v8235_v4 }
 0x3cb   :  { %v644_v39 = vsel %vm643_vm4, %v630_v9, %v642_v17 }
 0x3cc   :  { %v647_v45 = vsel %vm646_vm5, %v644_v39, -inf  ;;  %v1153_v18 = vpop.permute.xlu1 %1152 }
 0x3cd   :  { %v2166_v30 = vpop.permute.xlu0 %2165  ;;  %v1178_v20 = vrot.slane %v1153_v18, %v8235_v4 }
 0x3d0   :  { %v1165_v5 = vpop.permute.xlu1 %1164 }
 0x3d1   :  { %v1156_v19 = vpop.permute.xlu0 %1155 }
 0x3d2   :  { %v1182_v54 = vrot.slane %v1156_v19, %v8235_v4 }
 0x3d4   :  { %v1663_v37 = vpop.permute.xlu1 %1662  ;;  %v1207_v8 = vsel %vm631_vm11, %v1182_v54, %v1178_v20  ;;  %v1194_v20 = vrot.slane %v1165_v5, %v8235_v4 }
 0x3d5   :  { %v1159_v49 = vpop.permute.xlu0 %1158  ;;  %v1689_v52 = vrot.slane %v1663_v37, %v8235_v4 }
 0x3d6   :  { %v1186_v32 = vrot.slane %v1159_v49, %v8235_v4 }
 0x3d8   :  { %648 = vmax.xlane.f32.xlu1 %v647_v45  ;;  %v1666_v2 = vpop.permute.xlu1 %1665  ;;  %v1208_v18 = vsel %vm633_vm12, %v1186_v32, %v1207_v8 }
 0x3d9   :  { %v2172_v57 = vpop.permute.xlu0 %2171 }
 0x3da   :  { %v2199_v3 = vrot.slane %v2172_v57, %v8235_v4 }
 0x3dc   :  { %v2169_v47 = vpop.permute.xlu1 %2168 }
 0x3dd   :  { %v1672_v25 = vpop.permute.xlu0 %1671  ;;  %v2195_v34 = vrot.slane %v2169_v47, %v8235_v4 }
 0x3de   :  { %v1701_v8 = vrot.slane %v1672_v25, %v8235_v4 }
 0x3e0   :  { %v2178_v17 = vpop.permute.xlu1 %2177 }
 0x3e1   :  { %v1162_v9 = vpop.permute.xlu0 %1161  ;;  %v2207_v61 = vrot.slane %v2178_v17, %v8235_v4 }
 0x3e2   :  { %v1190_v47 = vrot.slane %v1162_v9, %v8235_v4 }
 0x3e4   :  { %v1669_v39 = vpop.permute.xlu1 %1668 }
 0x3e5   :  { %v1168_v55 = vpop.permute.xlu0 %1167  ;;  %v1697_v37 = vrot.slane %v1669_v39, %v8235_v4 }
 0x3e8   :  { %v2175_v50 = vpop.permute.xlu1 %2174 }
 0x3e9   :  { %763 = vbcast.lane.b32.xlu1 %v761_v27, 256  ;;  %v1171_v45 = vpop.permute.xlu0 %1170  ;;  %v2191_v27 = vrot.slane %v2166_v30, %v8235_v4  ;;  %v2203_v24 = vrot.slane %v2175_v50, %v8235_v4  ;;  %v1693_v30 = vrot.slane %v1666_v2, %v8235_v4  ;;  %v1714_v50 = vsel %vm631_vm11, %v1689_v52, %v1685_v60 }
 0x3ea   :  { %v1209_v2 = vsel %vm635_vm13, %v1190_v47, %v1208_v18  ;;  %v1202_v60 = vrot.slane %v1171_v45, %v8235_v4 }
 0x3eb   :  { %v2220_v44 = vsel %vm631_vm11, %v2195_v34, %v2191_v27  ;;  %v1198_v27 = vrot.slane %v1168_v55, %v8235_v4  ;;  %v1210_v52 = vsel %vm637_vm14, %v1194_v20, %v1209_v2 }
 0x3ec   :  { %v2181_v53 = vpop.permute.xlu1 %2180  ;;  %v2221_v49 = vsel %vm633_vm12, %v2199_v3, %v2220_v44  ;;  %v1715_v3 = vsel %vm633_vm12, %v1693_v30, %v1714_v50 }
 0x3ed   :  { %v1675_v46 = vpop.permute.xlu0 %1674  ;;  %v2222_v57 = vsel %vm635_vm13, %v2203_v24, %v2221_v49  ;;  %v2211_v9 = vrot.slane %v2181_v53, %v8235_v4  ;;  %v1716_v24 = vsel %vm635_vm13, %v1697_v37, %v1715_v3  ;;  %v1211_v45 = vsel %vm639_vm15, %v1198_v27, %v1210_v52 }
 0x3ee   :  { %v2223_v53 = vsel %vm637_vm14, %v2207_v61, %v2222_v57  ;;  %v1705_v32 = vrot.slane %v1675_v46, %v8235_v4  ;;  %v1717_v46 = vsel %vm637_vm14, %v1701_v8, %v1716_v24  ;;  %v1212_v37 = vsel %vm641_vm3, %v1202_v60, %v1211_v45 }
 0x3ef   :  { %v2224_v55 = vsel %vm639_vm15, %v2211_v9, %v2223_v53  ;;  %v768_v61 = vrot.slane %v8214_v62, %v7938_v43 }
 0x3f0   :  { %v2184_v19 = vpop.permute.xlu1 %2183  ;;  %v1718_v49 = vsel %vm639_vm15, %v1705_v32, %v1717_v46 }
 0x3f1   :  { %v1678_v58 = vpop.permute.xlu0 %1677  ;;  %v2215_v54 = vrot.slane %v2184_v19, %v8235_v4 }
 0x3f2   :  { %v1709_v17 = vrot.slane %v1678_v58, %v8235_v4 }
 0x3f3   :  { %v2225_v30 = vsel %vm641_vm3, %v2215_v54, %v2224_v55 }
 0x422   :  { %v1681_v34 = vpop.permute.xlu0 %1680 }
 0x423   :  { %v1713_v25 = vrot.slane %v1681_v34, %v8235_v4  ;;  %v1719_v34 = vsel %vm641_vm3, %v1709_v17, %v1718_v49 }
 0x425   :  { %v1720_v57 = vsel %vm643_vm4, %v1713_v25, %v1719_v34 }
 0x426   :  { %v2187_v44 = vpop.permute.xlu0 %2186  ;;  %v1722_v9 = vsel %vm646_vm5, %v1720_v57, -inf }
 0x427   :  { %v2219_v5 = vrot.slane %v2187_v44, %v8235_v4  ;;  %v1174_v39 = vpop.permute.xlu1 %1173 }
 0x428   :  { %v1206_v47 = vrot.slane %v1174_v39, %v8235_v4 }
 0x429   :  { %v2226_v19 = vsel %vm643_vm4, %v2219_v5, %v2225_v30 }
 0x42a   :  { %v2228_v58 = vsel %vm646_vm5, %v2226_v19, -inf  ;;  %v1213_v50 = vsel %vm643_vm4, %v1206_v47, %v1212_v37  ;;  %v8325_v46 = vpop.permute.xlu0 %721 }
 0x42b   :  { %2229 = vmax.xlane.f32.xlu1 %v2228_v58  ;;  %v1215_v18 = vsel %vm646_vm5, %v1213_v50, -inf  ;;  %v8305_v2 = vpop.permute.xlu1 %728  ;;  %10028 = vst [vmem:[#allocation46_spill] sm:$0xff] %v8325_v46 }
 0x42c   :  { %1216 = vmax.xlane.f32.xlu0 %v1215_v18  ;;  %10025 = vst [vmem:[#allocation43_spill] sm:$0xff] %v8305_v2 }
 0x42f   :  { %v8307_v27 = vpop.permute.xlu1 %735 }
 0x430   :  { %1723 = vmax.xlane.f32.xlu0 %v1722_v9  ;;  %10026 = vst [vmem:[#allocation44_spill] sm:$0xff] %v8307_v27 }
 0x433   :  { %v8309_v54 = vpop.permute.xlu1 %749 }
 0x434   :  { %10027 = vst [vmem:[#allocation45_spill] sm:$0xff] %v8309_v54 }
 0x446   :  { %770 = vbcast.lane.b32.xlu0 %v768_v61, 256 }
 0x465   :  { %v649_v20 = vpop.xlane.xlu1 %648 }
 0x466   :  { %v658_v3 = vrot.slane %v649_v20, %v7897_v21  ;;  %v654_v60 = vrot.slane %v649_v20, %v7935_v42  ;;  %v666_v8 = vrot.slane %v649_v20, %v7900_v22  ;;  %v662_v24 = vrot.slane %v649_v20, %v7903_v23 }
 0x467   :  { %v674_v53 = vrot.slane %v649_v20, %v7927_v38  ;;  %v670_v62 = vrot.slane %v649_v20, %v7923_v36  ;;  %v678_v30 = vrot.slane %v649_v20, %v7931_v40 }
 0x468   :  { %v692_v32 = vsub.f32 %v8089_v7, %v658_v3  ;;  %v691_v44 = vsub.f32 %v8097_v13, %v654_v60  ;;  %v694_v52 = vsub.f32 %v8111_v15, %v666_v8  ;;  %v693_v55 = vsub.f32 %v8103_v12, %v662_v24 }
 0x469   :  { %v696_v45 = vsub.f32 %v8115_v59, %v674_v53  ;;  %v695_v47 = vsub.f32 %v8107_v6, %v670_v62  ;;  %v697_v15 = vsub.f32 %v8093_v11, %v678_v30  ;;  %v8327_v59 = vpop.permute.xlu0 %742  ;;  %v8353_v8 = vpop.permute.xlu1 %763  ;;  %v682_v53 = vrot.slane %v649_v20, %v7938_v43 }
 0x46a   :  { %v701_v17 = vmul.f32 1.442695, %v692_v32  ;;  %v699_v5 = vmul.f32 1.442695, %v691_v44  ;;  %v705_v39 = vmul.f32 1.442695, %v694_v52 }
 0x46b   :  { %v703_v25 = vmul.f32 1.442695, %v693_v55  ;;  %v709_v7 = vmul.f32 1.442695, %v696_v45  ;;  %v707_v13 = vmul.f32 1.442695, %v695_v47  ;;  %v698_v62 = vsub.f32 %v8119_v10, %v682_v53 }
 0x46c   :  { %7295 = vpow2.f32 %v701_v17  ;;  %v711_v12 = vmul.f32 1.442695, %v697_v15  ;;  %10029 = vst [vmem:[#allocation47_spill] sm:$0xff] %v8327_v59  ;;  %10031 = vst [vmem:[#allocation49_spill] sm:$0xff] %v8353_v8 }
 0x46d   :  { %7297 = vpow2.f32 %v699_v5  ;;  %v8340_v34 = vpop.permute.xlu0 %756  ;;  %v713_v32 = vmul.f32 1.442695, %v698_v62 }
 0x46e   :  { %7299 = vpow2.f32 %v705_v39  ;;  %10030 = vst [vmem:[#allocation48_spill] sm:$0xff] %v8340_v34 }
 0x46f   :  { %7301 = vpow2.f32 %v703_v25 }
 0x470   :  { %7303 = vpow2.f32 %v709_v7 }
 0x471   :  { %7305 = vpow2.f32 %v707_v13 }
 0x472   :  { %7307 = vpow2.f32 %v711_v12 }
 0x473   :  { %7309 = vpow2.f32 %v713_v32 }
 0x476   :  { %v7296_v19 = vpop.eup %7295 }
 0x477   :  { %v7298_v37 = vpop.eup %7297  ;;  %v8330_v6 = vmul.f32 %v7296_v19, %v8305_v2 }
 0x478   :  { %v7300_v49 = vpop.eup %7299  ;;  %v8333_v58 = vmul.f32 %v7298_v37, %v8325_v46 }
 0x479   :  { %v7302_v50 = vpop.eup %7301  ;;  %800 = vperm.xlu0 %7293, %v8330_v6   ;;  %v8338_v11 = vmul.f32 %v7300_v49, %v8327_v59 }
 0x47a   :  { %797 = vperm.xlu1 %7294, %v8333_v58   ;;  %v7304_v18 = vpop.eup %7303  ;;  %v8343_v57 = vmul.f32 %v7302_v50, %v8307_v27 }
 0x47b   :  { %v7306_v9 = vpop.eup %7305  ;;  %v8348_v61 = vmul.f32 %v7304_v18, %v8340_v34 }
 0x47c   :  { %v8351_v3 = vmul.f32 %v7306_v9, %v8309_v54  ;;  %v7308_v60 = vpop.eup %7307 }
 0x47d   :  { %806 = vperm.xlu0 %7293, %v8338_v11   ;;  %v8358_v24 = vmul.f32 %v7308_v60, %v8353_v8 }
 0x47e   :  { %803 = vperm.xlu1 %7294, %v8343_v57  }
 0x481   :  { %812 = vperm.xlu0 %7293, %v8348_v61  }
 0x482   :  { %809 = vperm.xlu1 %7294, %v8351_v3  }
 0x486   :  { %815 = vperm.xlu1 %7294, %v8358_v24  }
 0x4b8   :  { %v8382_v7 = vpop.xlane.xlu1 %2229 }
 0x4b9   :  { %v8363_v44 = vpop.xlane.xlu0 %1216  ;;  %v2239_v50 = vrot.slane %v8382_v7, %v7897_v21  ;;  %v2235_v62 = vrot.slane %v8382_v7, %v7935_v42 }
 0x4ba   :  { %v1226_v52 = vrot.slane %v8363_v44, %v7897_v21  ;;  %v1222_v55 = vrot.slane %v8363_v44, %v7935_v42  ;;  %v1230_v17 = vrot.slane %v8363_v44, %v7903_v23  ;;  %v1238_v5 = vrot.slane %v8363_v44, %v7923_v36 }
 0x4bb   :  { %v1234_v20 = vrot.slane %v8363_v44, %v7900_v22  ;;  %v1242_v49 = vrot.slane %v8363_v44, %v7927_v38 }
 0x4bc   :  { %v1260_v10 = vsub.f32 %v8138_v31, %v1226_v52  ;;  %v1259_v39 = vsub.f32 %v8127_v26, %v1222_v55  ;;  %v1261_v45 = vsub.f32 %v8146_v41, %v1230_v17  ;;  %v1263_v25 = vsub.f32 %v8135_v29, %v1238_v5  ;;  %v7310_v41 = vpop.eup %7309 }
 0x4bd   :  { %v8379_v47 = vpop.xlane.xlu0 %1723  ;;  %v1262_v30 = vsub.f32 %v8170_v35, %v1234_v20  ;;  %v1264_v52 = vsub.f32 %v8178_v1, %v1242_v49  ;;  %v2273_v55 = vsub.f32 %v8159_v56, %v2239_v50  ;;  %v2272_v5 = vsub.f32 %v8130_v28, %v2235_v62 }
 0x4be   :  { %v1269_v13 = vmul.f32 1.442695, %v1260_v10  ;;  %v1267_v15 = vmul.f32 1.442695, %v1259_v39  ;;  %v1271_v12 = vmul.f32 1.442695, %v1261_v45  ;;  %v1733_v19 = vrot.slane %v8379_v47, %v7897_v21 }
 0x4bf   :  { %v1275_v37 = vmul.f32 1.442695, %v1263_v25  ;;  %v1729_v26 = vrot.slane %v8379_v47, %v7935_v42  ;;  %v1737_v31 = vrot.slane %v8379_v47, %v7903_v23  ;;  %v1273_v9 = vmul.f32 1.442695, %v1262_v30 }
 0x4c0   :  { %7311 = vpow2.f32 %v1269_v13  ;;  %v1767_v29 = vsub.f32 %v8143_v33, %v1733_v19  ;;  %v2282_v10 = vmul.f32 1.442695, %v2273_v55  ;;  %v1246_v39 = vrot.slane %v8363_v44, %v7931_v40  ;;  %v10034_v55 = vld [vmem:[#allocation35_spill] sm:$0xff] }
 0x4c1   :  { %v8391_v35 = vpop.permute.xlu0 %770  ;;  %7313 = vpow2.f32 %v1267_v15  ;;  %v1766_v60 = vsub.f32 %v8122_v14, %v1729_v26  ;;  %v1768_v33 = vsub.f32 %v8151_v48, %v1737_v31  ;;  %v1741_v14 = vrot.slane %v8379_v47, %v7900_v22 }
 0x4c2   :  { %10032 = vst [vmem:[#allocation50_spill] sm:$0xff] %v8391_v35  ;;  %v8398_v18 = vmul.f32 %v7310_v41, %v8391_v35  ;;  %7315 = vpow2.f32 %v1271_v12  ;;  %v1776_v53 = vmul.f32 1.442695, %v1767_v29  ;;  %v1277_v48 = vmul.f32 1.442695, %v1264_v52 }
 0x4c3   :  { %7317 = vpow2.f32 %v1275_v37  ;;  %v1774_v32 = vmul.f32 1.442695, %v1766_v60  ;;  %v1778_v17 = vmul.f32 1.442695, %v1768_v33  ;;  %v1769_v56 = vsub.f32 %v8175_v63, %v1741_v14  ;;  %v10035_v14 = vld [vmem:[#allocation34_spill] sm:$0xff] }
 0x4c4   :  { %818 = vperm.xlu1 %7294, %v8398_v18   ;;  %7319 = vpow2.f32 %v1273_v9  ;;  %v1250_v1 = vrot.slane %v8363_v44, %v7938_v43  ;;  %v2247_v15 = vrot.slane %v8382_v7, %v7900_v22  ;;  %v2280_v12 = vmul.f32 1.442695, %v2272_v5 }
 0x4c5   :  { %7321 = vpow2.f32 %v1776_v53  ;;  %v1265_v19 = vsub.f32 %v8186_v16, %v1246_v39  ;;  %v2243_v63 = vrot.slane %v8382_v7, %v7903_v23  ;;  %v1780_v37 = vmul.f32 1.442695, %v1769_v56  ;;  %v10033_v53 = vld [vmem:[#allocation36_spill] sm:$0xff] }
 0x4c6   :  { %7323 = vpow2.f32 %v1774_v32  ;;  %v1266_v26 = vsub.f32 %v8217_v0, %v1250_v1  ;;  %v2251_v16 = vrot.slane %v8382_v7, %v7923_v36  ;;  %v1745_v9 = vrot.slane %v8379_v47, %v7923_v36 }
 0x4c7   :  { %7325 = vpow2.f32 %v1778_v17  ;;  %v1279_v49 = vmul.f32 1.442695, %v1265_v19  ;;  %v2274_v50 = vsub.f32 %v8154_v51, %v2243_v63  ;;  %v2275_v33 = vsub.f32 %v10033_v53, %v2247_v15  ;;  %v10036_v15 = vld [vmem:[#allocation38_spill] sm:$0xff] }
 0x4c8   :  { %7327 = vpow2.f32 %v1277_v48  ;;  %v1281_v60 = vmul.f32 1.442695, %v1266_v26  ;;  %v2276_v17 = vsub.f32 %v10034_v55, %v2251_v16  ;;  %v1770_v5 = vsub.f32 %v10035_v14, %v1745_v9  ;;  %v10038_v9 = vld [vmem:[#allocation40_spill] sm:$0xff] }
 0x4c9   :  { %7329 = vpow2.f32 %v2282_v10  ;;  %v2284_v51 = vmul.f32 1.442695, %v2274_v50  ;;  %v2286_v10 = vmul.f32 1.442695, %v2275_v33  ;;  %v2255_v39 = vrot.slane %v8382_v7, %v7927_v38 }
 0x4ca   :  { %v7312_v20 = vpop.eup %7311  ;;  %7331 = vpow2.f32 %v2280_v12  ;;  %v1753_v19 = vrot.slane %v8379_v47, %v7931_v40  ;;  %v1757_v53 = vrot.slane %v8379_v47, %v7938_v43 }
 0x4cb   :  { %v7314_v45 = vpop.eup %7313  ;;  %v8413_v25 = vmul.f32 %v7312_v20, %v8305_v2  ;;  %7333 = vpow2.f32 %v1780_v37  ;;  %v1749_v20 = vrot.slane %v8379_v47, %v7927_v38  ;;  %v10037_v37 = vld [vmem:[#allocation37_spill] sm:$0xff] }
 0x4cc   :  { %v7316_v30 = vpop.eup %7315  ;;  %v8419_v28 = vmul.f32 %v7314_v45, %v8325_v46  ;;  %7335 = vpow2.f32 %v1279_v49  ;;  %v2277_v26 = vsub.f32 %v10037_v37, %v2255_v39 }
 0x4cd   :  { %v7318_v13 = vpop.eup %7317  ;;  %1303 = vperm.xlu0 %7293, %v8413_v25   ;;  %v8429_v44 = vmul.f32 %v7316_v30, %v8307_v27  ;;  %7337 = vpow2.f32 %v1281_v60  ;;  %v2288_v30 = vmul.f32 1.442695, %v2276_v17  ;;  %v1771_v12 = vsub.f32 %v10036_v15, %v1749_v20  ;;  %v10040_v20 = vld [vmem:[#allocation41_spill] sm:$0xff] }
 0x4ce   :  { %1300 = vperm.xlu1 %7294, %v8419_v28   ;;  %v7320_v31 = vpop.eup %7319  ;;  %v8433_v29 = vmul.f32 %v7318_v13, %v8309_v54  ;;  %7339 = vpow2.f32 %v2284_v51  ;;  %v1782_v13 = vmul.f32 1.442695, %v1770_v5  ;;  %v1772_v60 = vsub.f32 %v10038_v9, %v1753_v19 }
 0x4cf   :  { %v7322_v41 = vpop.eup %7321  ;;  %v8443_v0 = vmul.f32 %v7320_v31, %v8327_v59  ;;  %7341 = vpow2.f32 %v2286_v10  ;;  %v2259_v31 = vrot.slane %v8382_v7, %v7931_v40  ;;  %v1784_v50 = vmul.f32 1.442695, %v1771_v12  ;;  %v10041_v12 = vld [vmem:[#allocation42_spill] sm:$0xff] }
 0x4d0   :  { %v7324_v62 = vpop.eup %7323  ;;  %v8447_v32 = vmul.f32 %v7322_v41, %v8305_v2  ;;  %7343 = vpow2.f32 %v1782_v13  ;;  %v1786_v5 = vmul.f32 1.442695, %v1772_v60  ;;  %v1773_v47 = vsub.f32 %v10040_v20, %v1757_v53 }
 0x4d1   :  { %1306 = vperm.xlu0 %7293, %v8429_v44   ;;  %v7326_v52 = vpop.eup %7325  ;;  %v8456_v48 = vmul.f32 %v7324_v62, %v8325_v46  ;;  %7345 = vpow2.f32 %v2288_v30  ;;  %v2290_v62 = vmul.f32 1.442695, %v2277_v26  ;;  %v2263_v10 = vrot.slane %v8382_v7, %v7938_v43 }
 0x4d2   :  { %1312 = vperm.xlu1 %7294, %v8433_v29   ;;  %v7328_v45 = vpop.eup %7327  ;;  %v8461_v56 = vmul.f32 %v7326_v52, %v8307_v27  ;;  %v10039_v52 = vld [vmem:[#allocation39_spill] sm:$0xff]  ;;  %7347 = vpow2.f32 %v1784_v50  ;;  %v1788_v15 = vmul.f32 1.442695, %v1773_v47 }
 0x4d3   :  { %v7330_v1 = vpop.eup %7329  ;;  %v8469_v63 = vmul.f32 %v7328_v45, %v8340_v34  ;;  %v2278_v55 = vsub.f32 %v10039_v52, %v2259_v31  ;;  %7349 = vpow2.f32 %v2290_v62  ;;  %v2279_v19 = vsub.f32 %v10041_v12, %v2263_v10 }
 0x4d4   :  { %v7332_v41 = vpop.eup %7331  ;;  %v8475_v16 = vmul.f32 %v7330_v1, %v8305_v2  ;;  %7351 = vpow2.f32 %v1786_v5 }
 0x4d5   :  { %1309 = vperm.xlu0 %7293, %v8443_v0   ;;  %v7334_v49 = vpop.eup %7333  ;;  %v8483_v33 = vmul.f32 %v7332_v41, %v8325_v46  ;;  %v2292_v45 = vmul.f32 1.442695, %v2278_v55  ;;  %v2294_v41 = vmul.f32 1.442695, %v2279_v19 }
 0x4d6   :  { %1810 = vperm.xlu1 %7294, %v8447_v32   ;;  %v7336_v17 = vpop.eup %7335  ;;  %v8487_v51 = vmul.f32 %v7334_v49, %v8327_v59 }
 0x4d7   :  { %v7338_v14 = vpop.eup %7337  ;;  %v8495_v39 = vmul.f32 %v7336_v17, %v8353_v8  ;;  %7353 = vpow2.f32 %v2292_v45 }
 0x4d8   :  { %v7340_v1 = vpop.eup %7339  ;;  %v8498_v30 = vmul.f32 %v7338_v14, %v8391_v35  ;;  %7355 = vpow2.f32 %v1788_v15 }
 0x4d9   :  { %1807 = vperm.xlu0 %7293, %v8456_v48   ;;  %v7342_v13 = vpop.eup %7341  ;;  %v8504_v7 = vmul.f32 %v7340_v1, %v8307_v27  ;;  %7357 = vpow2.f32 %v2294_v41 }
 0x4da   :  { %1813 = vperm.xlu1 %7294, %v8461_v56   ;;  %v7344_v37 = vpop.eup %7343  ;;  %v8507_v26 = vmul.f32 %v7342_v13, %v8327_v59 }
 0x4db   :  { %v7346_v31 = vpop.eup %7345  ;;  %v8512_v49 = vmul.f32 %v7344_v37, %v8309_v54 }
 0x4dc   :  { %v7348_v50 = vpop.eup %7347  ;;  %v8515_v9 = vmul.f32 %v7346_v31, %v8309_v54 }
 0x4dd   :  { %1315 = vperm.xlu0 %7293, %v8469_v63   ;;  %v7350_v60 = vpop.eup %7349  ;;  %v8520_v53 = vmul.f32 %v7348_v50, %v8340_v34 }
 0x4de   :  { %2316 = vperm.xlu1 %7294, %v8475_v16   ;;  %v7352_v62 = vpop.eup %7351  ;;  %v8523_v52 = vmul.f32 %v7350_v60, %v8340_v34 }
 0x4df   :  { %v8528_v17 = vmul.f32 %v7352_v62, %v8353_v8 }
 0x4e1   :  { %2313 = vperm.xlu0 %7293, %v8483_v33   ;;  %v7354_v55 = vpop.eup %7353 }
 0x4e2   :  { %1816 = vperm.xlu1 %7294, %v8487_v51   ;;  %v7356_v14 = vpop.eup %7355  ;;  %v8531_v5 = vmul.f32 %v7354_v55, %v8353_v8 }
 0x4e3   :  { %v8536_v20 = vmul.f32 %v7356_v14, %v8391_v35  ;;  %v7358_v47 = vpop.eup %7357 }
 0x4e4   :  { %v8540_v10 = vmul.f32 %v7358_v47, %v8391_v35 }
 0x4e5   :  { %1318 = vperm.xlu0 %7293, %v8495_v39  }
 0x4e6   :  { %1321 = vperm.xlu1 %7294, %v8498_v30  }
 0x4e9   :  { %2319 = vperm.xlu0 %7293, %v8504_v7  }
 0x4ea   :  { %2322 = vperm.xlu1 %7294, %v8507_v26  }
 0x4ed   :  { %1819 = vperm.xlu0 %7293, %v8512_v49  }
 0x4ee   :  { %2325 = vperm.xlu1 %7294, %v8515_v9  }
 0x4f1   :  { %1822 = vperm.xlu0 %7293, %v8520_v53  }
 0x4f2   :  { %2328 = vperm.xlu1 %7294, %v8523_v52  }
 0x4f5   :  { %1825 = vperm.xlu0 %7293, %v8528_v17  }
 0x4f6   :  { %2331 = vperm.xlu1 %7294, %v8531_v5  }
 0x4f8   :  { %v801_v1 = vpop.permute.xlu0 %800 }
 0x4f9   :  { %1828 = vperm.xlu0 %7293, %v8536_v20   ;;  %v798_v45 = vpop.permute.xlu1 %797  ;;  %v827_v12 = vrot.slane %v801_v1, %v8235_v4 }
 0x4fa   :  { %v823_v19 = vrot.slane %v798_v45, %v8235_v4 }
 0x4fc   :  { %v807_v15 = vpop.permute.xlu0 %806  ;;  %v852_v41 = vsel %vm631_vm11, %v827_v12, %v823_v19 }
 0x4fd   :  { %2334 = vperm.xlu0 %7293, %v8540_v10   ;;  %v804_v13 = vpop.permute.xlu1 %803  ;;  %v835_v50 = vrot.slane %v807_v15, %v8235_v4 }
 0x4fe   :  { %v831_v31 = vrot.slane %v804_v13, %v8235_v4 }
 0x500   :  { %v853_v60 = vsel %vm633_vm12, %v831_v31, %v852_v41  ;;  %v813_v62 = vpop.permute.xlu0 %812 }
 0x501   :  { %v810_v37 = vpop.permute.xlu1 %809  ;;  %v843_v47 = vrot.slane %v813_v62, %v8235_v4  ;;  %v854_v35 = vsel %vm635_vm13, %v835_v50, %v853_v60 }
 0x502   :  { %v839_v55 = vrot.slane %v810_v37, %v8235_v4 }
 0x504   :  { %v855_v1 = vsel %vm637_vm14, %v839_v55, %v854_v35 }
 0x505   :  { %v816_v14 = vpop.permute.xlu1 %815  ;;  %v856_v12 = vsel %vm639_vm15, %v843_v47, %v855_v1 }
 0x506   :  { %v847_v45 = vrot.slane %v816_v14, %v8235_v4 }
 0x508   :  { %v857_v15 = vsel %vm641_vm3, %v847_v45, %v856_v12 }
 0x543   :  { %v819_v34 = vpop.permute.xlu1 %818 }
 0x544   :  { %v851_v13 = vrot.slane %v819_v34, %v8235_v4 }
 0x546   :  { %v858_v19 = vsel %vm643_vm4, %v851_v13, %v857_v15 }
 0x547   :  { %v860_v37 = vsel %vm646_vm5, %v858_v19, 0.0 }
 0x548   :  { %861 = vadd.xlane.f32.xlu1 %v860_v37 }
 0x54c   :  { %v1304_v31 = vpop.permute.xlu0 %1303 }
 0x54d   :  { %v1301_v41 = vpop.permute.xlu1 %1300  ;;  %v1330_v8 = vrot.slane %v1304_v31, %v8235_v4 }
 0x54e   :  { %v1326_v34 = vrot.slane %v1301_v41, %v8235_v4 }
 0x550   :  { %v1307_v62 = vpop.permute.xlu0 %1306  ;;  %v1355_v12 = vsel %vm631_vm11, %v1330_v8, %v1326_v34 }
 0x551   :  { %v1313_v50 = vpop.permute.xlu1 %1312  ;;  %v1334_v1 = vrot.slane %v1307_v62, %v8235_v4 }
 0x552   :  { %v1342_v31 = vrot.slane %v1313_v50, %v8235_v4 }
 0x553   :  { %v1356_v19 = vsel %vm633_vm12, %v1334_v1, %v1355_v12 }
 0x554   :  { %v1310_v60 = vpop.permute.xlu0 %1309 }
 0x555   :  { %v1811_v35 = vpop.permute.xlu1 %1810  ;;  %v1338_v13 = vrot.slane %v1310_v60, %v8235_v4 }
 0x557   :  { %v1357_v59 = vsel %vm635_vm13, %v1338_v13, %v1356_v19 }
 0x558   :  { %v1808_v55 = vpop.permute.xlu0 %1807  ;;  %v1358_v41 = vsel %vm637_vm14, %v1342_v31, %v1357_v59 }
 0x559   :  { %v1814_v14 = vpop.permute.xlu1 %1813  ;;  %v1833_v59 = vrot.slane %v1808_v55, %v8235_v4 }
 0x55c   :  { %v1316_v47 = vpop.permute.xlu0 %1315 }
 0x55d   :  { %v2317_v45 = vpop.permute.xlu1 %2316  ;;  %v1346_v54 = vrot.slane %v1316_v47, %v8235_v4 }
 0x55f   :  { %v1359_v60 = vsel %vm639_vm15, %v1346_v54, %v1358_v41  ;;  %v1841_v54 = vrot.slane %v1814_v14, %v8235_v4 }
 0x560   :  { %v2314_v15 = vpop.permute.xlu0 %2313 }
 0x561   :  { %v1817_v37 = vpop.permute.xlu1 %1816  ;;  %v2339_v41 = vrot.slane %v2314_v15, %v8235_v4 }
 0x564   :  { %v1319_v27 = vpop.permute.xlu0 %1318 }
 0x565   :  { %v1350_v62 = vrot.slane %v1319_v27, %v8235_v4  ;;  %v1322_v2 = vpop.permute.xlu1 %1321  ;;  %v1837_v27 = vrot.slane %v1811_v35, %v8235_v4 }
 0x566   :  { %v1354_v8 = vrot.slane %v1322_v2, %v8235_v4 }
 0x567   :  { %v1360_v34 = vsel %vm641_vm3, %v1350_v62, %v1359_v60  ;;  %v1862_v2 = vsel %vm631_vm11, %v1837_v27, %v1833_v59  ;;  %v1845_v62 = vrot.slane %v1817_v37, %v8235_v4 }
 0x568   :  { %v2320_v1 = vpop.permute.xlu0 %2319  ;;  %v1361_v12 = vsel %vm643_vm4, %v1354_v8, %v1360_v34  ;;  %v1863_v35 = vsel %vm633_vm12, %v1841_v54, %v1862_v2 }
 0x569   :  { %v2323_v13 = vpop.permute.xlu1 %2322  ;;  %v1363_v47 = vsel %vm646_vm5, %v1361_v12, 0.0  ;;  %v2347_v60 = vrot.slane %v2320_v1, %v8235_v4  ;;  %v2343_v12 = vrot.slane %v2317_v45, %v8235_v4  ;;  %v1864_v59 = vsel %vm635_vm13, %v1845_v62, %v1863_v35 }
 0x56a   :  { %1364 = vadd.xlane.f32.xlu0 %v1363_v47  ;;  %v2351_v15 = vrot.slane %v2323_v13, %v8235_v4 }
 0x56b   :  { %v2368_v14 = vsel %vm631_vm11, %v2343_v12, %v2339_v41 }
 0x56c   :  { %v1820_v50 = vpop.permute.xlu0 %1819  ;;  %v2369_v1 = vsel %vm633_vm12, %v2347_v60, %v2368_v14 }
 0x56d   :  { %v2326_v19 = vpop.permute.xlu1 %2325  ;;  %v1849_v8 = vrot.slane %v1820_v50, %v8235_v4  ;;  %v2370_v13 = vsel %vm635_vm13, %v2351_v15, %v2369_v1 }
 0x56e   :  { %v2355_v27 = vrot.slane %v2326_v19, %v8235_v4 }
 0x56f   :  { %v1865_v50 = vsel %vm637_vm14, %v1849_v8, %v1864_v59 }
 0x570   :  { %v1823_v31 = vpop.permute.xlu0 %1822  ;;  %v2371_v60 = vsel %vm637_vm14, %v2355_v27, %v2370_v13 }
 0x571   :  { %v2329_v46 = vpop.permute.xlu1 %2328  ;;  %v1853_v55 = vrot.slane %v1823_v31, %v8235_v4 }
 0x572   :  { %v2359_v54 = vrot.slane %v2329_v46, %v8235_v4 }
 0x573   :  { %v1866_v31 = vsel %vm639_vm15, %v1853_v55, %v1865_v50 }
 0x574   :  { %v1826_v34 = vpop.permute.xlu0 %1825  ;;  %v2372_v12 = vsel %vm639_vm15, %v2359_v54, %v2371_v60 }
 0x575   :  { %v1857_v47 = vrot.slane %v1826_v34, %v8235_v4  ;;  %v2332_v37 = vpop.permute.xlu1 %2331 }
 0x576   :  { %v2363_v41 = vrot.slane %v2332_v37, %v8235_v4 }
 0x577   :  { %v1867_v62 = vsel %vm641_vm3, %v1857_v47, %v1866_v31 }
 0x578   :  { %v1829_v45 = vpop.permute.xlu0 %1828  ;;  %v2373_v46 = vsel %vm641_vm3, %v2363_v41, %v2372_v12 }
 0x579   :  { %v1861_v2 = vrot.slane %v1829_v45, %v8235_v4 }
 0x57b   :  { %v1868_v34 = vsel %vm643_vm4, %v1861_v2, %v1867_v62 }
 0x57c   :  { %v2335_v8 = vpop.permute.xlu0 %2334  ;;  %v1870_v19 = vsel %vm646_vm5, %v1868_v34, 0.0 }
 0x57d   :  { %v2367_v55 = vrot.slane %v2335_v8, %v8235_v4  ;;  %1871 = vadd.xlane.f32.xlu0 %v1870_v19 }
 0x57f   :  { %v2374_v35 = vsel %vm643_vm4, %v2367_v55, %v2373_v46 }
 0x580   :  { %v2376_v47 = vsel %vm646_vm5, %v2374_v35, 0.0 }
 0x581   :  { %2377 = vadd.xlane.f32.xlu1 %v2376_v47 }
 0x5d5   :  { %v862_v14 = vpop.xlane.xlu1 %861 }
 0x5d6   :  { %v871_v59 = vrot.slane %v862_v14, %v7897_v21  ;;  %v867_v15 = vrot.slane %v862_v14, %v7935_v42  ;;  %v875_v37 = vrot.slane %v862_v14, %v7903_v23  ;;  %v879_v1 = vrot.slane %v862_v14, %v7900_v22 }
 0x5d7   :  { %v883_v50 = vrot.slane %v862_v14, %v7923_v36  ;;  %v887_v27 = vrot.slane %v862_v14, %v7927_v38  ;;  %v891_v45 = vrot.slane %v862_v14, %v7931_v40  ;;  %v895_v54 = vrot.slane %v862_v14, %v7938_v43 }
 0x5d8   :  { %7359 = vrcp.f32 %v871_v59 }
 0x5d9   :  { %7361 = vrcp.f32 %v867_v15 }
 0x5da   :  { %7363 = vrcp.f32 %v875_v37 }
 0x5db   :  { %7365 = vrcp.f32 %v879_v1 }
 0x5dc   :  { %7367 = vrcp.f32 %v883_v50 }
 0x5dd   :  { %7369 = vrcp.f32 %v887_v27 }
 0x5de   :  { %7371 = vrcp.f32 %v891_v45 }
 0x5df   :  { %7373 = vrcp.f32 %v895_v54 }
 0x5e2   :  { %v7360_v31 = vpop.eup %7359 }
 0x5e3   :  { %v7362_v2 = vpop.eup %7361  ;;  %v907_v41 = vmul.f32 %v7360_v31, %v8330_v6 }
 0x5e4   :  { %v7364_v62 = vpop.eup %7363  ;;  %v905_v13 = vmul.f32 %v7362_v2, %v8333_v58 }
 0x5e5   :  { %v7366_v34 = vpop.eup %7365  ;;  %932 = vperm.xlu1 %7294, %v907_v41   ;;  %v909_v60 = vmul.f32 %v7364_v62, %v8343_v57 }
 0x5e6   :  { %929 = vperm.xlu0 %7293, %v905_v13   ;;  %v7368_v8 = vpop.eup %7367  ;;  %v911_v19 = vmul.f32 %v7366_v34, %v8338_v11 }
 0x5e7   :  { %v7370_v12 = vpop.eup %7369  ;;  %v913_v55 = vmul.f32 %v7368_v8, %v8351_v3 }
 0x5e8   :  { %v7372_v46 = vpop.eup %7371  ;;  %v915_v6 = vmul.f32 %v7370_v12, %v8348_v61 }
 0x5e9   :  { %935 = vperm.xlu1 %7294, %v909_v60   ;;  %v917_v58 = vmul.f32 %v7372_v46, %v8358_v24  ;;  %v7374_v35 = vpop.eup %7373 }
 0x5ea   :  { %938 = vperm.xlu0 %7293, %v911_v19   ;;  %v919_v47 = vmul.f32 %v7374_v35, %v8398_v18 }
 0x5ed   :  { %941 = vperm.xlu1 %7294, %v913_v55  }
 0x5ee   :  { %944 = vperm.xlu0 %7293, %v915_v6  }
 0x5f1   :  { %947 = vperm.xlu1 %7294, %v917_v58  }
 0x5f5   :  { %950 = vperm.xlu1 %7294, %v919_v47  }
 0x5f7   :  { %v1365_v57 = vpop.xlane.xlu0 %1364 }
 0x5f8   :  { %v1370_v11 = vrot.slane %v1365_v57, %v7935_v42  ;;  %v1374_v14 = vrot.slane %v1365_v57, %v7897_v21  ;;  %v1386_v59 = vrot.slane %v1365_v57, %v7923_v36  ;;  %v1378_v3 = vrot.slane %v1365_v57, %v7903_v23 }
 0x5f9   :  { %v1382_v61 = vrot.slane %v1365_v57, %v7900_v22  ;;  %v1390_v41 = vrot.slane %v1365_v57, %v7927_v38  ;;  %v1394_v60 = vrot.slane %v1365_v57, %v7931_v40 }
 0x5fa   :  { %7375 = vrcp.f32 %v1370_v11 }
 0x5fb   :  { %7377 = vrcp.f32 %v1374_v14 }
 0x5fc   :  { %7379 = vrcp.f32 %v1386_v59 }
 0x5fd   :  { %7381 = vrcp.f32 %v1378_v3 }
 0x5fe   :  { %7383 = vrcp.f32 %v1382_v61 }
 0x604   :  { %v7376_v24 = vpop.eup %7375 }
 0x605   :  { %v7378_v15 = vpop.eup %7377  ;;  %v1408_v18 = vmul.f32 %v7376_v24, %v8419_v28 }
 0x606   :  { %v7380_v37 = vpop.eup %7379  ;;  %v1410_v1 = vmul.f32 %v7378_v15, %v8413_v25 }
 0x607   :  { %v7382_v50 = vpop.eup %7381  ;;  %1432 = vperm.xlu1 %7294, %v1408_v18   ;;  %v1416_v27 = vmul.f32 %v7380_v37, %v8433_v29 }
 0x608   :  { %1435 = vperm.xlu0 %7293, %v1410_v1   ;;  %v1412_v31 = vmul.f32 %v7382_v50, %v8429_v44  ;;  %v7384_v54 = vpop.eup %7383 }
 0x609   :  { %v1414_v62 = vmul.f32 %v7384_v54, %v8443_v0  ;;  %v1398_v0 = vrot.slane %v1365_v57, %v7938_v43 }
 0x60a   :  { %v8631_v45 = vpop.xlane.xlu0 %1871 }
 0x60b   :  { %1444 = vperm.xlu1 %7294, %v1416_v27   ;;  %v1881_v2 = vrot.slane %v8631_v45, %v7897_v21  ;;  %v1877_v28 = vrot.slane %v8631_v45, %v7935_v42  ;;  %v1885_v25 = vrot.slane %v8631_v45, %v7903_v23  ;;  %v1889_v34 = vrot.slane %v8631_v45, %v7900_v22 }
 0x60c   :  { %1438 = vperm.xlu0 %7293, %v1412_v31  }
 0x60d   :  { %7385 = vrcp.f32 %v1881_v2 }
 0x60e   :  { %v8641_v29 = vpop.xlane.xlu1 %2377  ;;  %7387 = vrcp.f32 %v1877_v28 }
 0x60f   :  { %7389 = vrcp.f32 %v1885_v25  ;;  %v2387_v44 = vrot.slane %v8641_v29, %v7897_v21  ;;  %v2383_v13 = vrot.slane %v8641_v29, %v7935_v42  ;;  %v2391_v55 = vrot.slane %v8641_v29, %v7903_v23 }
 0x610   :  { %1441 = vperm.xlu0 %7293, %v1414_v62   ;;  %7391 = vrcp.f32 %v1390_v41  ;;  %v2395_v35 = vrot.slane %v8641_v29, %v7900_v22  ;;  %v2411_v2 = vrot.slane %v8641_v29, %v7938_v43 }
 0x611   :  { %7393 = vrcp.f32 %v2387_v44 }
 0x612   :  { %7395 = vrcp.f32 %v2383_v13 }
 0x613   :  { %7397 = vrcp.f32 %v1889_v34 }
 0x614   :  { %7399 = vrcp.f32 %v1394_v60  ;;  %v10042_v60 = vld [vmem:[#allocation25_spill] sm:$0xff] }
 0x615   :  { %7401 = vrcp.f32 %v1398_v0 }
 0x616   :  { %7403 = vrcp.f32 %v2391_v55 }
 0x617   :  { %v7386_v8 = vpop.eup %7385  ;;  %7405 = vrcp.f32 %v2395_v35 }
 0x618   :  { %v7388_v19 = vpop.eup %7387  ;;  %v1917_v12 = vmul.f32 %v7386_v8, %v8447_v32  ;;  %v1893_v32 = vrot.slane %v8631_v45, %v7923_v36 }
 0x619   :  { %v7390_v46 = vpop.eup %7389  ;;  %v1915_v6 = vmul.f32 %v7388_v19, %v8456_v48  ;;  %v2399_v48 = vrot.slane %v8641_v29, %v7923_v36 }
 0x61a   :  { %v7392_v58 = vpop.eup %7391  ;;  %1942 = vperm.xlu1 %7294, %v1917_v12   ;;  %v1919_v47 = vmul.f32 %v7390_v46, %v8461_v56  ;;  %7407 = vrcp.f32 %v1893_v32  ;;  %v1897_v56 = vrot.slane %v8631_v45, %v7927_v38 }
 0x61b   :  { %1939 = vperm.xlu0 %7293, %v1915_v6   ;;  %v7394_v57 = vpop.eup %7393  ;;  %v1418_v11 = vmul.f32 %v7392_v58, %v8469_v63  ;;  %7409 = vrcp.f32 %v2399_v48  ;;  %v2403_v63 = vrot.slane %v8641_v29, %v7927_v38 }
 0x61c   :  { %v7396_v14 = vpop.eup %7395  ;;  %v2423_v59 = vmul.f32 %v7394_v57, %v8475_v16  ;;  %7411 = vrcp.f32 %v1897_v56  ;;  %v1901_v16 = vrot.slane %v8631_v45, %v7931_v40 }
 0x61d   :  { %v7398_v3 = vpop.eup %7397  ;;  %v2421_v61 = vmul.f32 %v7396_v14, %v8483_v33  ;;  %7413 = vrcp.f32 %v2403_v63  ;;  %v2407_v33 = vrot.slane %v8641_v29, %v7931_v40 }
 0x61e   :  { %1945 = vperm.xlu1 %7294, %v1919_v47   ;;  %v7400_v24 = vpop.eup %7399  ;;  %v1921_v15 = vmul.f32 %v7398_v3, %v8487_v51  ;;  %7415 = vrcp.f32 %v1901_v16  ;;  %v1905_v51 = vrot.slane %v8631_v45, %v7938_v43 }
 0x61f   :  { %1447 = vperm.xlu0 %7293, %v1418_v11   ;;  %v7402_v18 = vpop.eup %7401  ;;  %v1420_v37 = vmul.f32 %v7400_v24, %v8495_v39  ;;  %7417 = vrcp.f32 %v2407_v33 }
 0x620   :  { %v7404_v1 = vpop.eup %7403  ;;  %v1422_v50 = vmul.f32 %v7402_v18, %v8498_v30  ;;  %7419 = vrcp.f32 %v1905_v51 }
 0x621   :  { %v7406_v27 = vpop.eup %7405  ;;  %v2425_v31 = vmul.f32 %v7404_v1, %v8504_v7  ;;  %7421 = vrcp.f32 %v2411_v2 }
 0x622   :  { %2448 = vperm.xlu1 %7294, %v2423_v59   ;;  %v2427_v39 = vmul.f32 %v7406_v27, %v8507_v26 }
 0x623   :  { %2445 = vperm.xlu0 %7293, %v2421_v61   ;;  %v10043_v61 = vmov 0.0  }
 0x624   :  { %v7408_v54 = vpop.eup %7407 }
 0x625   :  { %v7410_v28 = vpop.eup %7409  ;;  %v1923_v30 = vmul.f32 %v7408_v54, %v8512_v49 }
 0x626   :  { %1948 = vperm.xlu1 %7294, %v1921_v15   ;;  %v7412_v25 = vpop.eup %7411  ;;  %v2429_v45 = vmul.f32 %v7410_v28, %v8515_v9 }
 0x627   :  { %1450 = vperm.xlu0 %7293, %v1420_v37   ;;  %v7414_v7 = vpop.eup %7413  ;;  %v1925_v41 = vmul.f32 %v7412_v25, %v8520_v53 }
 0x628   :  { %v7416_v62 = vpop.eup %7415  ;;  %v2431_v26 = vmul.f32 %v7414_v7, %v8523_v52 }
 0x629   :  { %v7418_v44 = vpop.eup %7417  ;;  %v1927_v29 = vmul.f32 %v7416_v62, %v8528_v17 }
 0x62a   :  { %1453 = vperm.xlu1 %7294, %v1422_v50   ;;  %v7420_v13 = vpop.eup %7419  ;;  %v2433_v49 = vmul.f32 %v7418_v44, %v8531_v5 }
 0x62b   :  { %2451 = vperm.xlu0 %7293, %v2425_v31   ;;  %v1929_v34 = vmul.f32 %v7420_v13, %v8536_v20  ;;  %v7422_v9 = vpop.eup %7421 }
 0x62c   :  { %v2435_v53 = vmul.f32 %v7422_v9, %v8540_v10 }
 0x62e   :  { %2454 = vperm.xlu1 %7294, %v2427_v39  }
 0x62f   :  { %1951 = vperm.xlu0 %7293, %v1923_v30  }
 0x632   :  { %2457 = vperm.xlu1 %7294, %v2429_v45  }
 0x633   :  { %1954 = vperm.xlu0 %7293, %v1925_v41  }
 0x636   :  { %2460 = vperm.xlu1 %7294, %v2431_v26  }
 0x637   :  { %1957 = vperm.xlu0 %7293, %v1927_v29  }
 0x63a   :  { %2463 = vperm.xlu1 %7294, %v2433_v49  }
 0x63b   :  { %1960 = vperm.xlu0 %7293, %v1929_v34  }
 0x63e   :  { %1495 = vrot.lane.b32.xlu1 %v10042_v60, %s7675_s5 }
 0x63f   :  { %2466 = vperm.xlu0 %7293, %v2435_v53  }
 0x642   :  { %2507 = vrot.lane.b32.xlu1 %v10042_v60, %s7674_s0 }
 0x643   :  { %2001 = vrot.lane.b32.xlu0 %v10042_v60, %s7676_s8 }
 0x664   :  { %v933_v52 = vpop.permute.xlu1 %932 }
 0x665   :  { %v930_v17 = vpop.permute.xlu0 %929  ;;  %v959_v8 = vrot.slane %v933_v52, %v8235_v4 }
 0x666   :  { %v955_v20 = vrot.slane %v930_v17, %v8235_v4 }
 0x668   :  { %v936_v5 = vpop.permute.xlu1 %935  ;;  %v984_v12 = vsel %vm631_vm11, %v959_v8, %v955_v20 }
 0x669   :  { %v939_v0 = vpop.permute.xlu0 %938  ;;  %v963_v10 = vrot.slane %v936_v5, %v8235_v4 }
 0x66a   :  { %v967_v55 = vrot.slane %v939_v0, %v8235_v4 }
 0x66b   :  { %v985_v46 = vsel %vm633_vm12, %v963_v10, %v984_v12 }
 0x66c   :  { %v942_v19 = vpop.permute.xlu1 %941  ;;  %v986_v32 = vsel %vm635_vm13, %v967_v55, %v985_v46 }
 0x66d   :  { %v945_v6 = vpop.permute.xlu0 %944  ;;  %v971_v58 = vrot.slane %v942_v19, %v8235_v4 }
 0x66e   :  { %v975_v47 = vrot.slane %v945_v6, %v8235_v4 }
 0x66f   :  { %v987_v57 = vsel %vm637_vm14, %v971_v58, %v986_v32 }
 0x670   :  { %v948_v35 = vpop.permute.xlu1 %947  ;;  %v988_v59 = vsel %vm639_vm15, %v975_v47, %v987_v57 }
 0x671   :  { %v979_v11 = vrot.slane %v948_v35, %v8235_v4 }
 0x673   :  { %v989_v56 = vsel %vm641_vm3, %v979_v11, %v988_v59 }
 0x674   :  { %v951_v14 = vpop.permute.xlu1 %950 }
 0x675   :  { %v983_v48 = vrot.slane %v951_v14, %v8235_v4 }
 0x677   :  { %v990_v3 = vsel %vm643_vm4, %v983_v48, %v989_v56 }
 0x678   :  { %6995 = vmatmul.mubr.msk.f32.vlgmr.msra.gmra.mrb[0].mxu0 %vm646_vm5, %v990_v3 }
 0x679   :  { %6999 = vmatprep.mubr.msk.f32.mxu0 %vm7672_vm0, %v10043_v61 }
 0x686   :  { %v1433_v63 = vpop.permute.xlu1 %1432 }
 0x687   :  { %v1436_v24 = vpop.permute.xlu0 %1435  ;;  %v1458_v7 = vrot.slane %v1433_v63, %v8235_v4 }
 0x688   :  { %v1462_v45 = vrot.slane %v1436_v24, %v8235_v4 }
 0x68a   :  { %v1445_v16 = vpop.permute.xlu1 %1444  ;;  %v1487_v29 = vsel %vm631_vm11, %v1462_v45, %v1458_v7  ;;  %v2615_v45 = vld [vmem:[%s7758_s12 + $0x8] sm:$0xff]  ;;  %v2617_v7 = vld [vmem:[%s7758_s12 + $0x18] sm:$0xff] }
 0x68b   :  { %v1439_v15 = vpop.permute.xlu0 %1438  ;;  %v1474_v20 = vrot.slane %v1445_v16, %v8235_v4 }
 0x68c   :  { %v1466_v62 = vrot.slane %v1439_v15, %v8235_v4 }
 0x68e   :  { %v1488_v9 = vsel %vm633_vm12, %v1466_v62, %v1487_v29  ;;  %v7159_v62 = vpack.c.bf16 %v2617_v7, %v2615_v45  ;;  %v2621_v29 = vld [vmem:[%s7758_s12 + $0x38] sm:$0xff]  ;;  %v2644_v45 = vld [vmem:[%s7758_s12 + $0xf0] sm:$0xff]  ;;  %v8808_v7 = vld [vmem:[%s7768_s27] sm:$0xf]  ;;  %s10097_s27 = sld [smem:[#allocation7_spill]] }
 0x68f   :  { %v1442_v18 = vpop.permute.xlu0 %1441 }
 0x690   :  { %v1470_v26 = vrot.slane %v1442_v18, %v8235_v4 }
 0x692   :  { %v1489_v60 = vsel %vm635_vm13, %v1470_v26, %v1488_v9  ;;  %v2616_v26 = vld [vmem:[%s7758_s12 + $0x10] sm:$0xff] }
 0x693   :  { %v1490_v58 = vsel %vm637_vm14, %v1474_v20, %v1489_v60  ;;  %v2620_v9 = vld [vmem:[%s7758_s12 + $0x30] sm:$0xff]  ;;  %v2622_v20 = vld [vmem:[%s7758_s12 + $0x40] sm:$0xff] }
 0x699   :  { %v1943_v37 = vpop.permute.xlu1 %1942 }
 0x69a   :  { %v1940_v1 = vpop.permute.xlu0 %1939  ;;  %v1969_v49 = vrot.slane %v1943_v37, %v8235_v4 }
 0x69b   :  { %v1965_v13 = vrot.slane %v1940_v1, %v8235_v4 }
 0x69d   :  { %v1946_v33 = vpop.permute.xlu1 %1945  ;;  %v1994_v19 = vsel %vm631_vm11, %v1969_v49, %v1965_v13 }
 0x69e   :  { %v1448_v50 = vpop.permute.xlu0 %1447  ;;  %v1973_v53 = vrot.slane %v1946_v33, %v8235_v4 }
 0x69f   :  { %v1478_v52 = vrot.slane %v1448_v50, %v8235_v4 }
 0x6a0   :  { %v1995_v35 = vsel %vm633_vm12, %v1973_v53, %v1994_v19 }
 0x6a1   :  { %v2449_v51 = vpop.permute.xlu1 %2448  ;;  %v1491_v32 = vsel %vm639_vm15, %v1478_v52, %v1490_v58 }
 0x6a2   :  { %v2446_v27 = vpop.permute.xlu0 %2445  ;;  %v2475_v5 = vrot.slane %v2449_v51, %v8235_v4 }
 0x6a3   :  { %v2471_v17 = vrot.slane %v2446_v27, %v8235_v4 }
 0x6a5   :  { %v1949_v31 = vpop.permute.xlu1 %1948  ;;  %v2500_v57 = vsel %vm631_vm11, %v2475_v5, %v2471_v17  ;;  %v2623_v17 = vld [vmem:[%s7758_s12 + $0x48] sm:$0xff]  ;;  %v2625_v5 = vld [vmem:[%s7758_s12 + $0x58] sm:$0xff] }
 0x6a6   :  { %v1451_v54 = vpop.permute.xlu0 %1450  ;;  %v1977_v12 = vrot.slane %v1949_v31, %v8235_v4 }
 0x6a7   :  { %v1482_v8 = vrot.slane %v1451_v54, %v8235_v4 }
 0x6a8   :  { %v1996_v63 = vsel %vm635_vm13, %v1977_v12, %v1995_v35  ;;  %v2628_v35 = vld [vmem:[%s7758_s12 + $0x70] sm:$0xff] }
 0x6a9   :  { %v1454_v39 = vpop.permute.xlu1 %1453  ;;  %v1492_v48 = vsel %vm641_vm3, %v1482_v8, %v1491_v32  ;;  %v7167_v8 = vpack.c.bf16 %v2625_v5, %v2623_v17  ;;  %v2633_v32 = vld [vmem:[%s7758_s12 + $0x98] sm:$0xff] }
 0x6aa   :  { %v2452_v2 = vpop.permute.xlu0 %2451  ;;  %v1486_v55 = vrot.slane %v1454_v39, %v8235_v4 }
 0x6ab   :  { %v2479_v0 = vrot.slane %v2452_v2, %v8235_v4 }
 0x6ac   :  { %v1493_v37 = vsel %vm643_vm4, %v1486_v55, %v1492_v48  ;;  %v2627_v55 = vld [vmem:[%s7758_s12 + $0x68] sm:$0xff]  ;;  %v2632_v48 = vld [vmem:[%s7758_s12 + $0x90] sm:$0xff] }
 0x6ad   :  { %v2455_v28 = vpop.permute.xlu1 %2454  ;;  %v2501_v59 = vsel %vm633_vm12, %v2479_v0, %v2500_v57  ;;  %v2624_v0 = vld [vmem:[%s7758_s12 + $0x50] sm:$0xff] }
 0x6ae   :  { %v1952_v30 = vpop.permute.xlu0 %1951  ;;  %v2483_v46 = vrot.slane %v2455_v28, %v8235_v4 }
 0x6af   :  { %v1981_v11 = vrot.slane %v1952_v30, %v8235_v4 }
 0x6b0   :  { %v2502_v15 = vsel %vm635_vm13, %v2483_v46, %v2501_v59  ;;  %v2629_v46 = vld [vmem:[%s7758_s12 + $0x78] sm:$0xff]  ;;  %v2635_v59 = vld [vmem:[%s7758_s12 + $0xa8] sm:$0xff] }
 0x6b1   :  { %v2458_v25 = vpop.permute.xlu1 %2457  ;;  %v1997_v51 = vsel %vm637_vm14, %v1981_v11, %v1996_v63  ;;  %v7171_v58 = vpack.c.bf16 %v2629_v46, %v2627_v55 }
 0x6b2   :  { %v1955_v41 = vpop.permute.xlu0 %1954  ;;  %v2487_v47 = vrot.slane %v2458_v25, %v8235_v4 }
 0x6b3   :  { %v1985_v56 = vrot.slane %v1955_v41, %v8235_v4  ;;  %v2614_v41 = vld [vmem:[%s7758_s12] sm:$0xff] }
 0x6b4   :  { %v2503_v1 = vsel %vm637_vm14, %v2487_v47, %v2502_v15  ;;  %v7161_v13 = vpack.c.bf16 %v2616_v26, %v2614_v41  ;;  %v2631_v47 = vld [vmem:[%s7758_s12 + $0x88] sm:$0xff]  ;;  %v3321_v41 = vrot.slane %v8808_v7, %v7897_v21 }
 0x6b5   :  { %v2461_v44 = vpop.permute.xlu1 %2460  ;;  %v1998_v31 = vsel %vm639_vm15, %v1985_v56, %v1997_v51  ;;  %v7175_v11 = vpack.c.bf16 %v2633_v32, %v2631_v47  ;;  %v10045_v47 = vld [vmem:[#allocation24_spill] sm:$0xff] }
 0x6b6   :  { %v1958_v34 = vpop.permute.xlu0 %1957  ;;  %v2491_v14 = vrot.slane %v2461_v44, %v8235_v4  ;;  %v2619_v44 = vld [vmem:[%s7758_s12 + $0x28] sm:$0xff] }
 0x6b7   :  { %v1989_v16 = vrot.slane %v1958_v34, %v8235_v4  ;;  %v7163_v49 = vpack.c.bf16 %v2621_v29, %v2619_v44  ;;  %v2618_v34 = vld [vmem:[%s7758_s12 + $0x20] sm:$0xff]  ;;  %v4334_v44 = vrot.slane %v8808_v7, %v7900_v22 }
 0x6b8   :  { %v2504_v27 = vsel %vm639_vm15, %v2491_v14, %v2503_v1  ;;  %v7165_v53 = vpack.c.bf16 %v2620_v9, %v2618_v34  ;;  %v2630_v14 = vld [vmem:[%s7758_s12 + $0x80] sm:$0xff]  ;;  %v2636_v1 = vld [vmem:[%s7758_s12 + $0xb0] sm:$0xff] }
 0x6b9   :  { %v2464_v10 = vpop.permute.xlu1 %2463  ;;  %v1999_v2 = vsel %vm641_vm3, %v1989_v16, %v1998_v31  ;;  %v7177_v15 = vpack.c.bf16 %v2632_v48, %v2630_v14  ;;  %v2638_v31 = vld [vmem:[%s7758_s12 + $0xc0] sm:$0xff] }
 0x6ba   :  { %v1961_v6 = vpop.permute.xlu0 %1960  ;;  %v2495_v3 = vrot.slane %v2464_v10, %v8235_v4  ;;  %v7169_v10 = vpack.c.bf16 %v2624_v0, %v2622_v20  ;;  %v6882_v34 = vld [vmem:[%s7753_s6] ss:$0 sm:$0xff]  ;;  %s10094_s6 = sld [smem:[#allocation14_spill]] }
 0x6bb   :  { %v1993_v33 = vrot.slane %v1961_v6, %v8235_v4  ;;  %v2626_v6 = vld [vmem:[%s7758_s12 + $0x60] sm:$0xff] }
 0x6bc   :  { %v2505_v54 = vsel %vm641_vm3, %v2495_v3, %v2504_v27  ;;  %v7173_v57 = vpack.c.bf16 %v2628_v35, %v2626_v6  ;;  %v2637_v3 = vld [vmem:[%s7758_s12 + $0xb8] sm:$0xff] }
 0x6bd   :  { %v1496_v24 = vpop.permute.xlu1 %1495  ;;  %v2000_v25 = vsel %vm643_vm4, %v1993_v33, %v1999_v2  ;;  %v2639_v33 = vld [vmem:[%s7758_s12 + $0xc8] sm:$0xff]  ;;  %v2645_v2 = vld [vmem:[%s7758_s12 + $0xf8] sm:$0xff] }
 0x6be   :  { %v2467_v18 = vpop.permute.xlu0 %2466  ;;  %6998 = vmatpush3.msra.mxu0 %v1496_v24 }
 0x6bf   :  { %v2499_v50 = vrot.slane %v2467_v18, %v8235_v4  ;;  %7000 = vmatmul.mubr.msk.f32.vlgmr.msra.gmra.mrb[2].mxu0 %vm646_vm5, %v1493_v37  ;;  %7007 = vmatprep.subr.mxu0 %v10043_v61  ;;  %v7179_v18 = vpack.c.bf16 %v2637_v3, %v2635_v59  ;;  %v2634_v37 = vld [vmem:[%s7758_s12 + $0xa0] sm:$0xff] }
 0x6c0   :  { %7009 = vmatprep.mubr.msk.f32.mxu0 %vm7672_vm0, %v10043_v61  ;;  %v7181_v51 = vpack.c.bf16 %v2636_v1, %v2634_v37 }
 0x6c1   :  { %v2508_v39 = vpop.permute.xlu1 %2507  ;;  %v2506_v30 = vsel %vm643_vm4, %v2499_v50, %v2505_v54  ;;  %v2641_v50 = vld [vmem:[%s7758_s12 + $0xd8] sm:$0xff]  ;;  %v2640_v54 = vld [vmem:[%s7758_s12 + $0xd0] sm:$0xff] }
 0x6c2   :  { %v2002_v28 = vpop.permute.xlu0 %2001  ;;  %7008 = vmatpush3.msra.mxu0 %v2508_v39  ;;  %v7183_v27 = vpack.c.bf16 %v2641_v50, %v2639_v33  ;;  %v2643_v39 = vld [vmem:[%s7758_s12 + $0xe8] sm:$0xff] }
 0x6c3   :  { %7003 = vmatpush3.msra.mxu1 %v2002_v28  ;;  %7010 = vmatmul.mubr.msk.f32.vlgmr.msra.gmra.mrb[4].mxu0 %vm646_vm5, %v2506_v30  ;;  %v7185_v28 = vpack.c.bf16 %v2640_v54, %v2638_v31  ;;  %v7187_v30 = vpack.c.bf16 %v2645_v2, %v2643_v39 }
 0x6c4   :  { %7005 = vmatmul.mubr.msk.f32.vlgmr.msra.gmra.mrb[4].mxu1 %vm646_vm5, %v2000_v25  ;;  %7012 = vmatprep.subr.mxu0 %v10043_v61  ;;  %v2642_v25 = vld [vmem:[%s7758_s12 + $0xe0] sm:$0xff]  ;;  %s10095_s12 = sld [smem:[#allocation17_spill]] }
 0x6c5   :  { %2722 = vmatprep.mubr.f32.mxu1 %v10043_v61  ;;  %7014 = vmatprep.mubr.msk.f32.mxu0 %vm7672_vm0, %v10043_v61  ;;  %v7189_v26 = vpack.c.bf16 %v2644_v45, %v2642_v25  ;;  %v2854_v45 = vrot.slane %v8808_v7, %v7935_v42 }
 0x6c6   :  { %7160 = vmatprep.subr.bf16.mxu1 %v7159_v62  ;;  %v3828_v62 = vrot.slane %v8808_v7, %v7903_v23 }
 0x6c7   :  { %7162 = vmatpush1.bf16.msra.mxu1 %v7161_v13 }
 0x6c8   :  { %7164 = vmatprep.subr.bf16.mxu1 %v7163_v49 }
 0x6cb   :  { %7166 = vmatpush1.bf16.msra.mxu1 %v7165_v53 }
 0x6cc   :  { %7168 = vmatprep.subr.bf16.mxu1 %v7167_v8 }
 0x6cf   :  { %7170 = vmatpush1.bf16.msra.mxu1 %v7169_v10 }
 0x6d0   :  { %7172 = vmatprep.subr.bf16.mxu1 %v7171_v58 }
 0x6d3   :  { %7174 = vmatpush1.bf16.msra.mxu1 %v7173_v57 }
 0x6d4   :  { %7176 = vmatprep.subr.bf16.mxu1 %v7175_v11 }
 0x6d7   :  { %7178 = vmatpush1.bf16.msra.mxu1 %v7177_v15 }
 0x6d8   :  { %7180 = vmatprep.subr.bf16.mxu1 %v7179_v18 }
 0x6db   :  { %7182 = vmatpush1.bf16.msra.mxu1 %v7181_v51 }
 0x6dc   :  { %7184 = vmatprep.subr.bf16.mxu1 %v7183_v27 }
 0x6df   :  { %7186 = vmatpush1.bf16.msra.mxu1 %v7185_v28 }
 0x6e0   :  { %7188 = vmatprep.subr.bf16.mxu1 %v7187_v30 }
 0x6e3   :  { %7190 = vmatpush1.bf16.msra.mxu1 %v7189_v26 }
 0x6e4   :  { %7067 = vmatprep.subr.mxu1 %v10043_v61 }
 0x74b   :  { %v8778_v60 = vpop.f32.mrb[0].mxu0 }
 0x74c   :  { %v6996_v52 = vpop.f32.mrb[1].mxu0 }
 0x792   :  { %v1566_v19 = vpop.f32.mrb[2].mxu0 }
 0x793   :  { %2583 = vrot.lane.b32.xlu0 %v1566_v19, %s7674_s0  ;;  %v7001_v12 = vpop.f32.mrb[3].mxu0  ;;  %v2646_v19 = vld [vmem:[%s7763_s20] sm:$0x3]  ;;  %s10096_s20 = sld [smem:[#allocation16_spill]] }
 0x794   :  { %v2655_v12 = vrot.slane %v2646_v19, %v7897_v21 }
 0x796   :  { %v2578_v56 = vpop.f32.mrb[4].mxu0 }
 0x797   :  { %v2072_v24 = vpop.f32.mrb[4].mxu1  ;;  %2591 = vrot.lane.b32.xlu0 %v2578_v56, %s7675_s5  ;;  %v7011_v63 = vpop.f32.mrb[5].mxu0 }
 0x798   :  { %2587 = vrot.lane.b32.xlu1 %v2072_v24, %s7676_s8  ;;  %v7006_v16 = vpop.f32.mrb[5].mxu1 }
 0x79b   :  { %3830 = vrot.lane.b32.xlu0 %v3828_v62, %s7676_s8 }
 0x79c   :  { %3323 = vrot.lane.b32.xlu1 %v3321_v41, %s7674_s0 }
 0x7a0   :  { %4336 = vrot.lane.b32.xlu1 %v4334_v44, %s7675_s5 }
 0x805   :  { %v2584_v29 = vpop.permute.xlu0 %2583 }
 0x806   :  { %v2594_v49 = vsel %vm259_vm2, %v8778_v60, %v2584_v29  ;;  %v2651_v60 = vrot.slane %v2646_v19, %v7935_v42 }
 0x809   :  { %v2592_v13 = vpop.permute.xlu0 %2591 }
 0x80a   :  { %v2588_v9 = vpop.permute.xlu1 %2587 }
 0x80b   :  { %v2596_v53 = vsel %vm9986_vm6, %v2594_v49, %v2588_v9 }
 0x80c   :  { %v2598_v52 = vsel %vm9985_vm7, %v2596_v53, %v2592_v13 }
 0x80d   :  { %v2606_v17 = vadd.f32 %v6882_v34, %v2598_v52  ;;  %v8861_v53 = vpop.permute.xlu0 %3830 }
 0x80e   :  { %v8854_v62 = vpop.permute.xlu1 %3323 }
 0x80f   :  { %v2608_v5 = vmin.f32 %v2606_v17, 0.0  ;;  %vm2607_vm8 = vcmp.gt.f32.partialorder %v2606_v17, 0.0 }
 0x811   :  { %v2609_v20 = vmul.f32 1.442695, %v2608_v5 }
 0x813   :  { %7423 = vpow2.f32 %v2609_v20 }
 0x81d   :  { %v7424_v8 = vpop.eup %7423 }
 0x81e   :  { %v6883_v0 = vadd.f32 -1.0, %v7424_v8 }
 0x820   :  { %v2612_v10 = vsel %vm2607_vm8, %v2606_v17, %v6883_v0 }
 0x821   :  { %2723 = vmatmul.mubr.f32.vlgmr.msra.gmra.mrb[6].mxu1 %v2612_v10 }
 0x822   :  { %7069 = vmatprep.mubr.msk.f32.mxu1 %vm7672_vm0, %v10043_v61 }
 0x8f4   :  { %v2724_v55 = vpop.f32.mrb[6].mxu1 }
 0x8f5   :  { %v8830_v46 = vadd.f32 %v2724_v55, %v2651_v60  ;;  %v2726_v6 = vpop.f32.mrb[7].mxu1 }
 0x8f6   :  { %v2727_v58 = vadd.f32 %v2726_v6, %v2655_v12  ;;  %v4337_v12 = vpop.permute.xlu1 %4336 }
 0x8f7   :  { %10044 = vst [vmem:[#allocation36_spill] sm:$0xff] %v8830_v46  ;;  %7013 = vmatpush3.msra.mxu0 %v8830_v46 }
 0x8f8   :  { %v2730_v35 = vcombine.high %v2727_v58, %v2727_v58  ;;  %v2737_v32 = vrot.slane %v2727_v58, %v10045_v47  ;;  %7017 = vmatprep.subr.mxu0 %v10043_v61 }
 0x8fa   :  { %v2744_v57 = vrot.slane %v2730_v35, %v10045_v47  ;;  %v2745_v11 = vcombine.high %v2737_v32, %v2737_v32  ;;  %v2753_v14 = vrot.slane %v2737_v32, %v10045_v47 }
 0x8fc   :  { %v2746_v48 = vcombine.high %v2744_v57, %v2744_v57  ;;  %v2760_v59 = vrot.slane %v2744_v57, %v10045_v47  ;;  %v2767_v56 = vrot.slane %v2745_v11, %v10045_v47  ;;  %v2775_v3 = vcombine.high %v2753_v14, %v2753_v14 }
 0x8fd   :  { %v2782_v24 = vrot.slane %v2753_v14, %v7935_v42 }
 0x8fe   :  { %v2774_v63 = vrot.slane %v2746_v48, %v10045_v47  ;;  %v2777_v15 = vcombine.high %v2767_v56, %v2767_v56  ;;  %v2786_v16 = vrot.slane %v2767_v56, %v7935_v42  ;;  %v2776_v18 = vcombine.high %v2760_v59, %v2760_v59 }
 0x8ff   :  { %v2790_v37 = vrot.slane %v2775_v3, %v7935_v42  ;;  %v2798_v1 = vrot.slane %v2760_v59, %v7935_v42  ;;  %v2819_v33 = vadd.f32 %v2782_v24, %v8830_v46 }
 0x900   :  { %v2794_v50 = vrot.slane %v2777_v15, %v7935_v42  ;;  %v2820_v51 = vadd.f32 %v2786_v16, %v8830_v46  ;;  %v2778_v54 = vcombine.high %v2774_v63, %v2774_v63  ;;  %v2802_v39 = vrot.slane %v2774_v63, %v7935_v42 }
 0x901   :  { %v2821_v27 = vadd.f32 %v2790_v37, %v8830_v46  ;;  %v2823_v31 = vadd.f32 %v2798_v1, %v8830_v46  ;;  %vm2827_vm9 = vcmp.gt.f32.partialorder %v2819_v33, 0.0  ;;  %v2806_v2 = vrot.slane %v2776_v18, %v7935_v42 }
 0x902   :  { %v2835_v28 = vmul.f32 0.2, %v2819_v33  ;;  %v2836_v30 = vmul.f32 0.2, %v2820_v51  ;;  %v2822_v41 = vadd.f32 %v2794_v50, %v8830_v46  ;;  %vm2828_vm10 = vcmp.gt.f32.partialorder %v2820_v51, 0.0 }
 0x903   :  { %v2837_v25 = vmul.f32 0.2, %v2821_v27  ;;  %vm2829_vm8 = vcmp.gt.f32.partialorder %v2821_v27, 0.0  ;;  %vm2831_vm1 = vcmp.gt.f32.partialorder %v2823_v31, 0.0  ;;  %v2839_v29 = vmul.f32 0.2, %v2823_v31 }
 0x904   :  { %v2843_v26 = vsel %vm2827_vm9, %v2819_v33, %v2835_v28  ;;  %v2844_v44 = vsel %vm2828_vm10, %v2820_v51, %v2836_v30  ;;  %v2810_v13 = vrot.slane %v2778_v54, %v7935_v42  ;;  %v2824_v9 = vadd.f32 %v2802_v39, %v8830_v46 }
 0x905   :  { %v3326_v49 = vmul.f32 %v8854_v62, %v2843_v26  ;;  %v3327_v34 = vmul.f32 %v8854_v62, %v2844_v44  ;;  %v2825_v7 = vadd.f32 %v2806_v2, %v8830_v46  ;;  %v2845_v52 = vsel %vm2829_vm8, %v2821_v27, %v2837_v25 }
 0x906   :  { %v2855_v17 = vmul.f32 %v2854_v45, %v2843_v26  ;;  %v2856_v5 = vmul.f32 %v2854_v45, %v2844_v44  ;;  %v2847_v20 = vsel %vm2831_vm1, %v2823_v31, %v2839_v29  ;;  %vm2830_vm9 = vcmp.gt.f32.partialorder %v2822_v41, 0.0 }
 0x907   :  { %3342 = vrot.lane.b32.xlu0 %v3326_v49, %s7675_s5  ;;  %3344 = vrot.lane.b32.xlu1 %v3327_v34, %s7675_s5  ;;  %v2859_v8 = vmul.f32 %v2854_v45, %v2847_v20  ;;  %v2826_v0 = vadd.f32 %v2810_v13, %v8830_v46  ;;  %v3833_v10 = vmul.f32 %v8861_v53, %v2843_v26  ;;  %v2838_v60 = vmul.f32 0.2, %v2822_v41 }
 0x908   :  { %v3834_v19 = vmul.f32 %v8861_v53, %v2844_v44  ;;  %vm2832_vm10 = vcmp.gt.f32.partialorder %v2824_v9, 0.0  ;;  %v2840_v55 = vmul.f32 0.2, %v2824_v9  ;;  %v2857_v6 = vmul.f32 %v2854_v45, %v2845_v52 }
 0x909   :  { %v2846_v58 = vsel %vm2830_vm9, %v2822_v41, %v2838_v60  ;;  %vm2833_vm8 = vcmp.gt.f32.partialorder %v2825_v7, 0.0  ;;  %v2841_v35 = vmul.f32 0.2, %v2825_v7  ;;  %v4339_v57 = vmul.f32 %v4337_v12, %v2843_v26 }
 0x90a   :  { %v2848_v32 = vsel %vm2832_vm10, %v2824_v9, %v2840_v55  ;;  %v3835_v11 = vmul.f32 %v8861_v53, %v2845_v52  ;;  %vm2834_vm1 = vcmp.gt.f32.partialorder %v2826_v0, 0.0  ;;  %v2842_v48 = vmul.f32 0.2, %v2826_v0 }
 0x90b   :  { %3849 = vrot.lane.b32.xlu0 %v3833_v10, %s7676_s8  ;;  %3851 = vrot.lane.b32.xlu1 %v3834_v19, %s7676_s8  ;;  %v2849_v14 = vsel %vm2833_vm8, %v2825_v7, %v2841_v35  ;;  %v2858_v59 = vmul.f32 %v2854_v45, %v2846_v58  ;;  %v2860_v56 = vmul.f32 %v2854_v45, %v2848_v32  ;;  %v2863_v18 = vsel %vm259_vm2, %v2855_v17, 0.0 }
 0x90c   :  { %v2861_v3 = vmul.f32 %v2854_v45, %v2849_v14  ;;  %v2850_v24 = vsel %vm2834_vm1, %v2826_v0, %v2842_v48  ;;  %v4340_v63 = vmul.f32 %v4337_v12, %v2844_v44  ;;  %v4341_v16 = vmul.f32 %v4337_v12, %v2845_v52 }
 0x90d   :  { %v2862_v15 = vmul.f32 %v2854_v45, %v2850_v24  ;;  %v2866_v37 = vsel %vm259_vm2, %v2856_v5, 0.0  ;;  %v2875_v1 = vsel %vm259_vm2, %v2859_v8, 0.0  ;;  %v3328_v33 = vmul.f32 %v8854_v62, %v2845_v52 }
 0x90e   :  { %v3330_v50 = vmul.f32 %v8854_v62, %v2847_v20  ;;  %v3837_v51 = vmul.f32 %v8861_v53, %v2847_v20  ;;  %v4343_v27 = vmul.f32 %v4337_v12, %v2847_v20  ;;  %v3329_v31 = vmul.f32 %v8854_v62, %v2846_v58 }
 0x90f   :  { %4355 = vrot.lane.b32.xlu0 %v4339_v57, %s7674_s0  ;;  %3853 = vrot.lane.b32.xlu1 %v3835_v11, %s7676_s8  ;;  %v3331_v54 = vmul.f32 %v8854_v62, %v2848_v32  ;;  %v3836_v39 = vmul.f32 %v8861_v53, %v2846_v58  ;;  %v3838_v2 = vmul.f32 %v8861_v53, %v2848_v32  ;;  %v2869_v25 = vsel %vm259_vm2, %v2857_v6, 0.0 }
 0x910   :  { %v4342_v28 = vmul.f32 %v4337_v12, %v2846_v58  ;;  %v4344_v30 = vmul.f32 %v4337_v12, %v2848_v32  ;;  %v3332_v45 = vmul.f32 %v8854_v62, %v2849_v14  ;;  %v3839_v41 = vmul.f32 %v8861_v53, %v2849_v14 }
 0x911   :  { %v2881_v26 = vsel %vm259_vm2, %v2861_v3, 0.0  ;;  %v4345_v44 = vmul.f32 %v4337_v12, %v2849_v14  ;;  %v4346_v29 = vmul.f32 %v4337_v12, %v2850_v24  ;;  %v2872_v49 = vsel %vm259_vm2, %v2858_v59, 0.0 }
 0x912   :  { %v2878_v34 = vsel %vm259_vm2, %v2860_v56, 0.0  ;;  %v2884_v17 = vsel %vm259_vm2, %v2862_v15, 0.0  ;;  %v3333_v8 = vmul.f32 %v8854_v62, %v2850_v24  ;;  %v3840_v19 = vmul.f32 %v8861_v53, %v2850_v24 }
 0x913   :  { %4357 = vrot.lane.b32.xlu1 %v4340_v63, %s7674_s0 }
 0x917   :  { %4359 = vrot.lane.b32.xlu1 %v4341_v16, %s7674_s0 }
 0x92e   :  { %2864 = vadd.xlane.f32.xlu0 %v2863_v18 }
 0x93b   :  { %2867 = vadd.xlane.f32.xlu1 %v2866_v37 }
 0x93f   :  { %2876 = vadd.xlane.f32.xlu1 %v2875_v1 }
 0x944   :  { %3346 = vrot.lane.b32.xlu0 %v3328_v33, %s7675_s5 }
 0x948   :  { %3350 = vrot.lane.b32.xlu0 %v3330_v50, %s7675_s5 }
 0x94c   :  { %3857 = vrot.lane.b32.xlu0 %v3837_v51, %s7676_s8 }
 0x950   :  { %4363 = vrot.lane.b32.xlu0 %v4343_v27, %s7674_s0  ;;  %3348 = vrot.lane.b32.xlu1 %v3329_v31, %s7675_s5 }
 0x954   :  { %3352 = vrot.lane.b32.xlu1 %v3331_v54, %s7675_s5 }
 0x958   :  { %3855 = vrot.lane.b32.xlu1 %v3836_v39, %s7676_s8 }
 0x95c   :  { %3859 = vrot.lane.b32.xlu1 %v3838_v2, %s7676_s8 }
 0x960   :  { %4361 = vrot.lane.b32.xlu1 %v4342_v28, %s7674_s0 }
 0x964   :  { %4365 = vrot.lane.b32.xlu1 %v4344_v30, %s7674_s0 }
 0x96f   :  { %2870 = vadd.xlane.f32.xlu0 %v2869_v25 }
 0x979   :  { %v3343_v13 = vpop.permute.xlu0 %3342  ;;  %v3345_v12 = vpop.permute.xlu1 %3344 }
 0x97a   :  { %v3366_v20 = vsel %vm259_vm2, %v3343_v13, 0.0  ;;  %v3369_v48 = vsel %vm259_vm2, %v3345_v12, 0.0 }
 0x97d   :  { %v3850_v9 = vpop.permute.xlu0 %3849  ;;  %v3852_v58 = vpop.permute.xlu1 %3851 }
 0x97e   :  { %v3873_v0 = vsel %vm259_vm2, %v3850_v9, 0.0  ;;  %v3876_v3 = vsel %vm259_vm2, %v3852_v58, 0.0 }
 0x981   :  { %v4356_v7 = vpop.permute.xlu0 %4355  ;;  %v3854_v57 = vpop.permute.xlu1 %3853 }
 0x982   :  { %v4379_v60 = vsel %vm259_vm2, %v4356_v7, 0.0  ;;  %v3879_v63 = vsel %vm259_vm2, %v3854_v57, 0.0  ;;  %v10047_v7 = vld [vmem:[#allocation29_spill] sm:$0xff] }
 0x985   :  { %3354 = vrot.lane.b32.xlu0 %v3332_v45, %s7675_s5  ;;  %v4358_v53 = vpop.permute.xlu1 %4357 }
 0x986   :  { %v4382_v15 = vsel %vm259_vm2, %v4358_v53, 0.0 }
 0x988   :  { %2882 = vadd.xlane.f32.xlu1 %v2881_v26 }
 0x989   :  { %3861 = vrot.lane.b32.xlu0 %v3839_v41, %s7676_s8  ;;  %v4360_v11 = vpop.permute.xlu1 %4359 }
 0x98a   :  { %v4385_v37 = vsel %vm259_vm2, %v4360_v11, 0.0 }
 0x98d   :  { %4367 = vrot.lane.b32.xlu0 %v4345_v44, %s7674_s0 }
 0x999   :  { %4369 = vrot.lane.b32.xlu1 %v4346_v29, %s7674_s0 }
 0x9ac   :  { %2873 = vadd.xlane.f32.xlu0 %v2872_v49 }
 0x9b0   :  { %2879 = vadd.xlane.f32.xlu0 %v2878_v34  ;;  %v10046_v34 = vld [vmem:[#allocation26_spill] sm:$0xff] }
 0x9bb   :  { %v8905_v52 = vpop.xlane.xlu0 %2864 }
 0x9bd   :  { %2885 = vadd.xlane.f32.xlu1 %v2884_v17 }
 0x9bf   :  { %v3347_v5 = vpop.permute.xlu0 %3346 }
 0x9c0   :  { %v3372_v59 = vsel %vm259_vm2, %v3347_v5, 0.0  ;;  %v10048_v5 = vld [vmem:[#allocation31_spill] sm:$0xff] }
 0x9c1   :  { %3367 = vadd.xlane.f32.xlu1 %v3366_v20 }
 0x9c3   :  { %v3351_v10 = vpop.permute.xlu0 %3350 }
 0x9c4   :  { %v3378_v6 = vsel %vm259_vm2, %v3351_v10, 0.0 }
 0x9c5   :  { %3874 = vadd.xlane.f32.xlu1 %v3873_v0 }
 0x9c6   :  { %3356 = vrot.lane.b32.xlu0 %v3333_v8, %s7675_s5 }
 0x9c7   :  { %v3858_v55 = vpop.permute.xlu0 %3857 }
 0x9c8   :  { %v3885_v62 = vsel %vm259_vm2, %v3858_v55, 0.0  ;;  %v2868_v14 = vpop.xlane.xlu1 %2867 }
 0x9c9   :  { %4380 = vadd.xlane.f32.xlu1 %v4379_v60  ;;  %v8935_v9 = vadd.f32 %v2868_v14, %v10046_v34 }
 0x9ca   :  { %3863 = vrot.lane.b32.xlu0 %v3840_v19, %s7676_s8 }
 0x9cb   :  { %v4364_v35 = vpop.permute.xlu0 %4363 }
 0x9cc   :  { %v4391_v32 = vsel %vm259_vm2, %v4364_v35, 0.0  ;;  %v2877_v56 = vpop.xlane.xlu1 %2876  ;;  %v10050_v35 = vld [vmem:[#allocation33_spill] sm:$0xff] }
 0x9cd   :  { %3379 = vadd.xlane.f32.xlu1 %v3378_v6  ;;  %v8939_v17 = vadd.f32 %v2877_v56, %v10047_v7  ;;  %v10049_v6 = vld [vmem:[#allocation32_spill] sm:$0xff]  ;;  %v8962_v11 = vadd.f32 %v8905_v52, %v10050_v35 }
 0x9ce   :  { %v10052_v52 = vld [vmem:[#allocation28_spill] sm:$0xff] }
 0x9d0   :  { %v3349_v24 = vpop.permute.xlu1 %3348 }
 0x9d1   :  { %3886 = vadd.xlane.f32.xlu1 %v3885_v62  ;;  %v3375_v50 = vsel %vm259_vm2, %v3349_v24, 0.0 }
 0x9d4   :  { %v3353_v16 = vpop.permute.xlu1 %3352 }
 0x9d5   :  { %4392 = vadd.xlane.f32.xlu1 %v4391_v32  ;;  %v3381_v31 = vsel %vm259_vm2, %v3353_v16, 0.0 }
 0x9d8   :  { %v3856_v1 = vpop.permute.xlu1 %3855 }
 0x9d9   :  { %v3882_v28 = vsel %vm259_vm2, %v3856_v1, 0.0 }
 0x9dc   :  { %v3860_v54 = vpop.permute.xlu1 %3859 }
 0x9dd   :  { %v3888_v45 = vsel %vm259_vm2, %v3860_v54, 0.0 }
 0x9e0   :  { %v4362_v25 = vpop.permute.xlu1 %4361 }
 0x9e1   :  { %v4388_v41 = vsel %vm259_vm2, %v4362_v25, 0.0 }
 0x9e4   :  { %v4366_v26 = vpop.permute.xlu1 %4365 }
 0x9e5   :  { %v4394_v44 = vsel %vm259_vm2, %v4366_v26, 0.0 }
 0x9e9   :  { %3370 = vadd.xlane.f32.xlu0 %v3369_v48 }
 0x9ed   :  { %3373 = vadd.xlane.f32.xlu0 %v3372_v59  ;;  %v10051_v59 = vld [vmem:[#allocation27_spill] sm:$0xff] }
 0x9f1   :  { %3877 = vadd.xlane.f32.xlu0 %v3876_v3 }
 0x9f5   :  { %3880 = vadd.xlane.f32.xlu0 %v3879_v63 }
 0x9f9   :  { %4383 = vadd.xlane.f32.xlu0 %v4382_v15 }
 0x9fc   :  { %v2871_v18 = vpop.xlane.xlu0 %2870 }
 0x9fd   :  { %4386 = vadd.xlane.f32.xlu0 %v4385_v37  ;;  %v8970_v56 = vadd.f32 %v2871_v18, %v10051_v59  ;;  %v10053_v18 = vld [vmem:[#allocation30_spill] sm:$0xff] }
 0xa00   :  { %v3355_v33 = vpop.permute.xlu0 %3354 }
 0xa01   :  { %3376 = vadd.xlane.f32.xlu0 %v3375_v50  ;;  %v3384_v51 = vsel %vm259_vm2, %v3355_v33, 0.0 }
 0xa02   :  { %3385 = vadd.xlane.f32.xlu1 %v3384_v51 }
 0xa04   :  { %v3862_v27 = vpop.permute.xlu0 %3861 }
 0xa05   :  { %3382 = vadd.xlane.f32.xlu0 %v3381_v31  ;;  %v3891_v39 = vsel %vm259_vm2, %v3862_v27, 0.0 }
 0xa06   :  { %3892 = vadd.xlane.f32.xlu1 %v3891_v39 }
 0xa08   :  { %v4368_v2 = vpop.permute.xlu0 %4367 }
 0xa09   :  { %3883 = vadd.xlane.f32.xlu0 %v3882_v28  ;;  %v4397_v30 = vsel %vm259_vm2, %v4368_v2, 0.0 }
 0xa0a   :  { %4398 = vadd.xlane.f32.xlu1 %v4397_v30 }
 0xa0d   :  { %3889 = vadd.xlane.f32.xlu0 %v3888_v45 }
 0xa11   :  { %4389 = vadd.xlane.f32.xlu0 %v4388_v41 }
 0xa15   :  { %4395 = vadd.xlane.f32.xlu0 %v4394_v44  ;;  %v2883_v29 = vpop.xlane.xlu1 %2882 }
 0xa16   :  { %v8943_v20 = vadd.f32 %v2883_v29, %v10048_v5 }
 0xa19   :  { %v4370_v13 = vpop.permute.xlu1 %4369 }
 0xa1a   :  { %v4400_v49 = vsel %vm259_vm2, %v4370_v13, 0.0 }
 0xa1b   :  { %4401 = vadd.xlane.f32.xlu0 %v4400_v49 }
 0xa31   :  { %2907 = vperm.xlu0 %7293, %v8935_v9  }
 0xa35   :  { %2916 = vperm.xlu0 %7293, %v8939_v17  }
 0xa39   :  { %v2874_v8 = vpop.xlane.xlu0 %2873  ;;  %2922 = vperm.xlu0 %7293, %v8943_v20  }
 0xa3a   :  { %v8978_v63 = vadd.f32 %v2874_v8, %v10052_v52 }
 0xa3d   :  { %v2880_v0 = vpop.xlane.xlu0 %2879 }
 0xa3e   :  { %v8986_v37 = vadd.f32 %v2880_v0, %v10053_v18 }
 0xa41   :  { %v3357_v10 = vpop.permute.xlu0 %3356 }
 0xa42   :  { %v3387_v19 = vsel %vm259_vm2, %v3357_v10, 0.0 }
 0xa43   :  { %3388 = vadd.xlane.f32.xlu1 %v3387_v19 }
 0xa45   :  { %v3864_v60 = vpop.permute.xlu0 %3863 }
 0xa46   :  { %v3894_v12 = vsel %vm259_vm2, %v3864_v60, 0.0 }
 0xa47   :  { %3895 = vadd.xlane.f32.xlu1 %v3894_v12 }
 0xa4a   :  { %v2886_v55 = vpop.xlane.xlu1 %2885 }
 0xa4b   :  { %v8949_v62 = vadd.f32 %v2886_v55, %v10049_v6 }
 0xa4d   :  { %2925 = vperm.xlu0 %7293, %v8949_v62  }
 0xa4e   :  { %v3368_v58 = vpop.xlane.xlu1 %3367 }
 0xa4f   :  { %v8953_v32 = vadd.f32 %v3368_v58, %v10050_v35 }
 0xa51   :  { %3407 = vperm.xlu0 %7293, %v8953_v32  }
 0xa52   :  { %v3875_v57 = vpop.xlane.xlu1 %3874 }
 0xa53   :  { %v8957_v53 = vadd.f32 %v3875_v57, %v10050_v35 }
 0xa55   :  { %3914 = vperm.xlu0 %7293, %v8957_v53  }
 0xa56   :  { %v4381_v14 = vpop.xlane.xlu1 %4380 }
 0xa57   :  { %v8965_v48 = vadd.f32 %v4381_v14, %v10050_v35 }
 0xa58   :  { %2904 = vperm.xlu1 %7294, %v8962_v11  }
 0xa59   :  { %4420 = vperm.xlu0 %7293, %v8965_v48  }
 0xa5a   :  { %v3380_v3 = vpop.xlane.xlu1 %3379 }
 0xa5b   :  { %v8973_v24 = vadd.f32 %v3380_v3, %v10047_v7 }
 0xa5c   :  { %2910 = vperm.xlu1 %7294, %v8970_v56  }
 0xa5d   :  { %3419 = vperm.xlu0 %7293, %v8973_v24  }
 0xa5e   :  { %v3887_v15 = vpop.xlane.xlu1 %3886 }
 0xa5f   :  { %v8981_v16 = vadd.f32 %v3887_v15, %v10047_v7 }
 0xa60   :  { %2913 = vperm.xlu1 %7294, %v8978_v63  }
 0xa61   :  { %3926 = vperm.xlu0 %7293, %v8981_v16  }
 0xa62   :  { %v4393_v1 = vpop.xlane.xlu1 %4392 }
 0xa63   :  { %v8989_v33 = vadd.f32 %v4393_v1, %v10047_v7 }
 0xa64   :  { %2919 = vperm.xlu1 %7294, %v8986_v37  }
 0xa65   :  { %10054 = vst [vmem:[#allocation35_spill] sm:$0xff] %v8989_v33  ;;  %4432 = vperm.xlu0 %7293, %v8989_v33  }
 0xa76   :  { %v3371_v50 = vpop.xlane.xlu0 %3370 }
 0xa77   :  { %v8994_v51 = vadd.f32 %v3371_v50, %v10046_v34 }
 0xa79   :  { %3410 = vperm.xlu1 %7294, %v8994_v51  }
 0xa7a   :  { %v3374_v27 = vpop.xlane.xlu0 %3373 }
 0xa7b   :  { %v8998_v31 = vadd.f32 %v3374_v27, %v10051_v59 }
 0xa7d   :  { %3413 = vperm.xlu1 %7294, %v8998_v31  }
 0xa7e   :  { %v3878_v54 = vpop.xlane.xlu0 %3877 }
 0xa7f   :  { %v9002_v39 = vadd.f32 %v3878_v54, %v10046_v34 }
 0xa81   :  { %3917 = vperm.xlu1 %7294, %v9002_v39  }
 0xa82   :  { %v3881_v2 = vpop.xlane.xlu0 %3880 }
 0xa83   :  { %v9006_v28 = vadd.f32 %v3881_v2, %v10051_v59 }
 0xa85   :  { %3920 = vperm.xlu1 %7294, %v9006_v28  }
 0xa86   :  { %v4384_v30 = vpop.xlane.xlu0 %4383 }
 0xa87   :  { %v9010_v25 = vadd.f32 %v4384_v30, %v10046_v34 }
 0xa89   :  { %4423 = vperm.xlu1 %7294, %v9010_v25  }
 0xa8a   :  { %v4387_v45 = vpop.xlane.xlu0 %4386 }
 0xa8b   :  { %v9014_v41 = vadd.f32 %v4387_v45, %v10051_v59 }
 0xa8d   :  { %4426 = vperm.xlu1 %7294, %v9014_v41  }
 0xa8e   :  { %v3377_v26 = vpop.xlane.xlu0 %3376 }
 0xa8f   :  { %v9018_v44 = vadd.f32 %v3377_v26, %v10052_v52  ;;  %v3386_v29 = vpop.xlane.xlu1 %3385 }
 0xa90   :  { %v9021_v13 = vadd.f32 %v3386_v29, %v10048_v5 }
 0xa91   :  { %3416 = vperm.xlu1 %7294, %v9018_v44  }
 0xa92   :  { %v3383_v49 = vpop.xlane.xlu0 %3382  ;;  %3425 = vperm.xlu0 %7293, %v9021_v13  }
 0xa93   :  { %v9026_v8 = vadd.f32 %v3383_v49, %v10053_v18  ;;  %v3893_v0 = vpop.xlane.xlu1 %3892 }
 0xa94   :  { %v9029_v10 = vadd.f32 %v3893_v0, %v10048_v5 }
 0xa95   :  { %3422 = vperm.xlu1 %7294, %v9026_v8  }
 0xa96   :  { %v3884_v19 = vpop.xlane.xlu0 %3883  ;;  %3932 = vperm.xlu0 %7293, %v9029_v10  }
 0xa97   :  { %v9034_v60 = vadd.f32 %v3884_v19, %v10052_v52  ;;  %v4399_v50 = vpop.xlane.xlu1 %4398 }
 0xa98   :  { %v9062_v26 = vadd.f32 %v4399_v50, %v10048_v5 }
 0xa99   :  { %3923 = vperm.xlu1 %7294, %v9034_v60  }
 0xa9a   :  { %v3890_v12 = vpop.xlane.xlu0 %3889  ;;  %10058 = vst [vmem:[#allocation40_spill] sm:$0xff] %v9062_v26 }
 0xa9b   :  { %v9038_v55 = vadd.f32 %v3890_v12, %v10053_v18 }
 0xa9d   :  { %3929 = vperm.xlu1 %7294, %v9038_v55  }
 0xa9e   :  { %v4390_v58 = vpop.xlane.xlu0 %4389 }
 0xa9f   :  { %v9042_v57 = vadd.f32 %v4390_v58, %v10052_v52 }
 0xaa1   :  { %10055 = vst [vmem:[#allocation34_spill] sm:$0xff] %v9042_v57  ;;  %4429 = vperm.xlu1 %7294, %v9042_v57  }
 0xaa2   :  { %v4396_v14 = vpop.xlane.xlu0 %4395 }
 0xaa3   :  { %v9046_v3 = vadd.f32 %v4396_v14, %v10053_v18 }
 0xaa5   :  { %10056 = vst [vmem:[#allocation38_spill] sm:$0xff] %v9046_v3  ;;  %4435 = vperm.xlu1 %7294, %v9046_v3  }
 0xaa8   :  { %v4402_v15 = vpop.xlane.xlu0 %4401 }
 0xaa9   :  { %v9050_v1 = vadd.f32 %v4402_v15, %v10049_v6 }
 0xaab   :  { %10057 = vst [vmem:[#allocation37_spill] sm:$0xff] %v9050_v1  ;;  %4441 = vperm.xlu1 %7294, %v9050_v1  }
 0xab0   :  { %v2908_v49 = vpop.permute.xlu0 %2907 }
 0xab1   :  { %v2934_v14 = vrot.slane %v2908_v49, %v8235_v4 }
 0xab4   :  { %v2917_v12 = vpop.permute.xlu0 %2916 }
 0xab5   :  { %v2946_v5 = vrot.slane %v2917_v12, %v8235_v4 }
 0xab8   :  { %v2923_v52 = vpop.permute.xlu0 %2922 }
 0xab9   :  { %v2954_v49 = vrot.slane %v2923_v52, %v8235_v4 }
 0xacc   :  { %v2926_v7 = vpop.permute.xlu0 %2925 }
 0xad0   :  { %v3389_v27 = vpop.xlane.xlu1 %3388 }
 0xad1   :  { %v9054_v54 = vadd.f32 %v3389_v27, %v10049_v6 }
 0xad3   :  { %3428 = vperm.xlu0 %7293, %v9054_v54  }
 0xad4   :  { %v3896_v2 = vpop.xlane.xlu1 %3895 }
 0xad5   :  { %v9058_v30 = vadd.f32 %v3896_v2, %v10049_v6 }
 0xad7   :  { %3935 = vperm.xlu0 %7293, %v9058_v30  }
 0xad8   :  { %v2905_v45 = vpop.permute.xlu1 %2904 }
 0xad9   :  { %v2930_v19 = vrot.slane %v2905_v45, %v8235_v4 }
 0xadb   :  { %4438 = vperm.xlu0 %7293, %v9062_v26   ;;  %v2959_v2 = vsel %vm631_vm11, %v2934_v14, %v2930_v19  ;;  %v2958_v19 = vrot.slane %v2926_v7, %v8235_v4 }
 0xadc   :  { %v2911_v29 = vpop.permute.xlu1 %2910 }
 0xadd   :  { %v2938_v58 = vrot.slane %v2911_v29, %v8235_v4 }
 0xadf   :  { %v2960_v50 = vsel %vm633_vm12, %v2938_v58, %v2959_v2 }
 0xae0   :  { %v2914_v0 = vpop.permute.xlu1 %2913 }
 0xae1   :  { %v2942_v15 = vrot.slane %v2914_v0, %v8235_v4 }
 0xae3   :  { %v2961_v6 = vsel %vm635_vm13, %v2942_v15, %v2960_v50  ;;  %v3408_v50 = vpop.permute.xlu0 %3407 }
 0xae4   :  { %v2920_v27 = vpop.permute.xlu1 %2919  ;;  %v2962_v45 = vsel %vm637_vm14, %v2946_v5, %v2961_v6 }
 0xae5   :  { %v2950_v18 = vrot.slane %v2920_v27, %v8235_v4 }
 0xae7   :  { %v2963_v29 = vsel %vm639_vm15, %v2950_v18, %v2962_v45  ;;  %v3915_v6 = vpop.permute.xlu0 %3914 }
 0xae8   :  { %v2964_v0 = vsel %vm641_vm3, %v2954_v49, %v2963_v29  ;;  %v3940_v26 = vrot.slane %v3915_v6, %v8235_v4 }
 0xae9   :  { %v2965_v58 = vsel %vm643_vm4, %v2958_v19, %v2964_v0 }
 0xaea   :  { %v2967_v14 = vsel %vm646_vm5, %v2965_v58, -inf }
 0xaeb   :  { %v4421_v45 = vpop.permute.xlu0 %4420 }
 0xaef   :  { %v3420_v59 = vpop.permute.xlu0 %3419 }
 0xaf3   :  { %v3927_v29 = vpop.permute.xlu0 %3926 }
 0xaf7   :  { %v4433_v7 = vpop.permute.xlu0 %4432 }
 0xaf8   :  { %v3411_v15 = vpop.permute.xlu1 %3410 }
 0xaf9   :  { %v3437_v0 = vrot.slane %v3411_v15, %v8235_v4 }
 0xafa   :  { %2968 = vmax.xlane.f32.xlu0 %v2967_v14  ;;  %v3433_v14 = vrot.slane %v3408_v50, %v8235_v4  ;;  %v3449_v50 = vrot.slane %v3420_v59, %v8235_v4 }
 0xafc   :  { %v3414_v27 = vpop.permute.xlu1 %3413  ;;  %v3462_v61 = vsel %vm631_vm11, %v3437_v0, %v3433_v14 }
 0xafd   :  { %v3441_v19 = vrot.slane %v3414_v27, %v8235_v4 }
 0xaff   :  { %v3463_v1 = vsel %vm633_vm12, %v3441_v19, %v3462_v61 }
 0xb00   :  { %v3918_v12 = vpop.permute.xlu1 %3917 }
 0xb01   :  { %v3944_v46 = vrot.slane %v3918_v12, %v8235_v4 }
 0xb03   :  { %v3969_v33 = vsel %vm631_vm11, %v3944_v46, %v3940_v26 }
 0xb04   :  { %v3921_v2 = vpop.permute.xlu1 %3920 }
 0xb05   :  { %v3948_v3 = vrot.slane %v3921_v2, %v8235_v4 }
 0xb07   :  { %v3970_v12 = vsel %vm633_vm12, %v3948_v3, %v3969_v33  ;;  %v4446_v33 = vrot.slane %v4421_v45, %v8235_v4 }
 0xb08   :  { %v4424_v5 = vpop.permute.xlu1 %4423 }
 0xb0c   :  { %v4427_v18 = vpop.permute.xlu1 %4426 }
 0xb0d   :  { %v4454_v46 = vrot.slane %v4427_v18, %v8235_v4 }
 0xb10   :  { %v3417_v52 = vpop.permute.xlu1 %3416 }
 0xb11   :  { %v3426_v58 = vpop.permute.xlu0 %3425  ;;  %v3445_v34 = vrot.slane %v3417_v52, %v8235_v4 }
 0xb12   :  { %v3457_v59 = vrot.slane %v3426_v58, %v8235_v4 }
 0xb13   :  { %v3464_v15 = vsel %vm635_vm13, %v3445_v34, %v3463_v1  ;;  %v4450_v1 = vrot.slane %v4424_v5, %v8235_v4 }
 0xb14   :  { %v3423_v35 = vpop.permute.xlu1 %3422  ;;  %v3465_v61 = vsel %vm637_vm14, %v3449_v50, %v3464_v15 }
 0xb15   :  { %v3453_v27 = vrot.slane %v3423_v35, %v8235_v4  ;;  %v3933_v52 = vpop.permute.xlu0 %3932  ;;  %v3956_v35 = vrot.slane %v3927_v29, %v8235_v4  ;;  %v4475_v58 = vsel %vm631_vm11, %v4450_v1, %v4446_v33 }
 0xb16   :  { %v3964_v14 = vrot.slane %v3933_v52, %v8235_v4  ;;  %v4476_v45 = vsel %vm633_vm12, %v4454_v46, %v4475_v58 }
 0xb17   :  { %v3466_v2 = vsel %vm639_vm15, %v3453_v27, %v3465_v61  ;;  %v4462_v61 = vrot.slane %v4433_v7, %v8235_v4 }
 0xb18   :  { %v3924_v49 = vpop.permute.xlu1 %3923 }
 0xb19   :  { %v3952_v57 = vrot.slane %v3924_v49, %v8235_v4 }
 0xb1b   :  { %v3971_v6 = vsel %vm635_vm13, %v3952_v57, %v3970_v12  ;;  %v3467_v57 = vsel %vm641_vm3, %v3457_v59, %v3466_v2 }
 0xb1c   :  { %v3930_v47 = vpop.permute.xlu1 %3929  ;;  %v3972_v3 = vsel %vm637_vm14, %v3956_v35, %v3971_v6 }
 0xb1d   :  { %v3960_v34 = vrot.slane %v3930_v47, %v8235_v4 }
 0xb1f   :  { %v3973_v47 = vsel %vm639_vm15, %v3960_v34, %v3972_v3 }
 0xb20   :  { %v4430_v0 = vpop.permute.xlu1 %4429  ;;  %v3974_v12 = vsel %vm641_vm3, %v3964_v14, %v3973_v47 }
 0xb21   :  { %v4458_v19 = vrot.slane %v4430_v0, %v8235_v4 }
 0xb23   :  { %v4477_v50 = vsel %vm635_vm13, %v4458_v19, %v4476_v45 }
 0xb24   :  { %v4436_v29 = vpop.permute.xlu1 %4435  ;;  %v4478_v35 = vsel %vm637_vm14, %v4462_v61, %v4477_v50 }
 0xb25   :  { %v4466_v0 = vrot.slane %v4436_v29, %v8235_v4 }
 0xb27   :  { %v4479_v59 = vsel %vm639_vm15, %v4466_v0, %v4478_v35 }
 0xb2a   :  { %v4442_v2 = vpop.permute.xlu1 %4441 }
 0xb52   :  { %v3429_v49 = vpop.permute.xlu0 %3428 }
 0xb53   :  { %v3461_v26 = vrot.slane %v3429_v49, %v8235_v4  ;;  %v4474_v49 = vrot.slane %v4442_v2, %v8235_v4 }
 0xb55   :  { %v3468_v5 = vsel %vm643_vm4, %v3461_v26, %v3467_v57 }
 0xb56   :  { %v3936_v18 = vpop.permute.xlu0 %3935  ;;  %v3470_v15 = vsel %vm646_vm5, %v3468_v5, -inf }
 0xb57   :  { %v3968_v27 = vrot.slane %v3936_v18, %v8235_v4  ;;  %3471 = vmax.xlane.f32.xlu1 %v3470_v15 }
 0xb59   :  { %v3975_v6 = vsel %vm643_vm4, %v3968_v27, %v3974_v12 }
 0xb5a   :  { %v4439_v52 = vpop.permute.xlu0 %4438  ;;  %v3977_v34 = vsel %vm646_vm5, %v3975_v6, -inf }
 0xb5b   :  { %v4470_v1 = vrot.slane %v4439_v52, %v8235_v4  ;;  %3978 = vmax.xlane.f32.xlu0 %v3977_v34 }
 0xb5d   :  { %v4480_v46 = vsel %vm641_vm3, %v4470_v1, %v4479_v59 }
 0xb5e   :  { %v4481_v26 = vsel %vm643_vm4, %v4474_v49, %v4480_v46  ;;  %v10060_v49 = vld [vmem:[#allocation43_spill] sm:$0xff] }
 0xb5f   :  { %v4483_v7 = vsel %vm646_vm5, %v4481_v26, -inf }
 0xb60   :  { %4484 = vmax.xlane.f32.xlu0 %v4483_v7 }
 0xb87   :  { %v2969_v33 = vpop.xlane.xlu0 %2968 }
 0xb88   :  { %v2974_v3 = vrot.slane %v2969_v33, %v7935_v42  ;;  %v2978_v19 = vrot.slane %v2969_v33, %v7897_v21  ;;  %v2982_v57 = vrot.slane %v2969_v33, %v7903_v23  ;;  %v2990_v47 = vrot.slane %v2969_v33, %v7923_v36 }
 0xb89   :  { %v2986_v29 = vrot.slane %v2969_v33, %v7900_v22  ;;  %v2998_v5 = vrot.slane %v2969_v33, %v7931_v40  ;;  %v2994_v45 = vrot.slane %v2969_v33, %v7927_v38  ;;  %v3002_v6 = vrot.slane %v2969_v33, %v7938_v43  ;;  %v10062_v33 = vld [vmem:[#allocation45_spill] sm:$0xff] }
 0xb8a   :  { %v3011_v58 = vsub.f32 %v8962_v11, %v2974_v3  ;;  %v3012_v14 = vsub.f32 %v8935_v9, %v2978_v19  ;;  %v3013_v18 = vsub.f32 %v8970_v56, %v2982_v57  ;;  %v3015_v15 = vsub.f32 %v8939_v17, %v2990_v47  ;;  %v10063_v57 = vld [vmem:[#allocation47_spill] sm:$0xff] }
 0xb8b   :  { %v3014_v12 = vsub.f32 %v8978_v63, %v2986_v29  ;;  %v3017_v2 = vsub.f32 %v8943_v20, %v2998_v5  ;;  %v3016_v11 = vsub.f32 %v8986_v37, %v2994_v45  ;;  %v3018_v56 = vsub.f32 %v8949_v62, %v3002_v6  ;;  %v10059_v20 = vld [vmem:[#allocation46_spill] sm:$0xff]  ;;  %v10061_v62 = vld [vmem:[#allocation44_spill] sm:$0xff]  ;;  %v10064_v5 = vld [vmem:[#allocation49_spill] sm:$0xff] }
 0xb8c   :  { %v3019_v27 = vmul.f32 1.442695, %v3011_v58  ;;  %v3021_v50 = vmul.f32 1.442695, %v3012_v14  ;;  %v3023_v0 = vmul.f32 1.442695, %v3013_v18 }
 0xb8d   :  { %v3027_v61 = vmul.f32 1.442695, %v3015_v15  ;;  %v3025_v9 = vmul.f32 1.442695, %v3014_v12  ;;  %v3031_v17 = vmul.f32 1.442695, %v3017_v2 }
 0xb8e   :  { %7425 = vpow2.f32 %v3019_v27  ;;  %v3029_v52 = vmul.f32 1.442695, %v3016_v11  ;;  %v3033_v34 = vmul.f32 1.442695, %v3018_v56  ;;  %v10065_v18 = vld [vmem:[#allocation48_spill] sm:$0xff]  ;;  %v10066_v45 = vld [vmem:[#allocation50_spill] sm:$0xff] }
 0xb8f   :  { %7427 = vpow2.f32 %v3021_v50 }
 0xb90   :  { %7429 = vpow2.f32 %v3023_v0 }
 0xb91   :  { %7431 = vpow2.f32 %v3027_v61 }
 0xb92   :  { %7433 = vpow2.f32 %v3025_v9 }
 0xb93   :  { %7435 = vpow2.f32 %v3031_v17 }
 0xb94   :  { %7437 = vpow2.f32 %v3029_v52 }
 0xb95   :  { %7439 = vpow2.f32 %v3033_v34 }
 0xb98   :  { %v7426_v63 = vpop.eup %7425 }
 0xb99   :  { %v7428_v35 = vpop.eup %7427  ;;  %v9146_v1 = vmul.f32 %v7426_v63, %v10059_v20 }
 0xb9a   :  { %v7430_v59 = vpop.eup %7429  ;;  %v9149_v46 = vmul.f32 %v7428_v35, %v10060_v49 }
 0xb9b   :  { %v7432_v37 = vpop.eup %7431  ;;  %3052 = vperm.xlu1 %7294, %v9146_v1   ;;  %v9154_v26 = vmul.f32 %v7430_v59, %v10061_v62 }
 0xb9c   :  { %3055 = vperm.xlu0 %7293, %v9149_v46   ;;  %v7434_v7 = vpop.eup %7433  ;;  %v9157_v3 = vmul.f32 %v7432_v37, %v10062_v33 }
 0xb9d   :  { %v7436_v19 = vpop.eup %7435  ;;  %v9162_v47 = vmul.f32 %v7434_v7, %v10063_v57 }
 0xb9e   :  { %v7438_v29 = vpop.eup %7437  ;;  %v9165_v58 = vmul.f32 %v7436_v19, %v10064_v5 }
 0xb9f   :  { %3058 = vperm.xlu1 %7294, %v9154_v26   ;;  %v7440_v14 = vpop.eup %7439  ;;  %v9170_v15 = vmul.f32 %v7438_v29, %v10065_v18 }
 0xba0   :  { %3064 = vperm.xlu0 %7293, %v9157_v3   ;;  %v9173_v27 = vmul.f32 %v7440_v14, %v10066_v45 }
 0xba3   :  { %3061 = vperm.xlu1 %7294, %v9162_v47  }
 0xba4   :  { %3070 = vperm.xlu0 %7293, %v9165_v58  }
 0xba7   :  { %3067 = vperm.xlu1 %7294, %v9170_v15  }
 0xba8   :  { %3073 = vperm.xlu0 %7293, %v9173_v27  }
 0xbe4   :  { %v3472_v50 = vpop.xlane.xlu1 %3471 }
 0xbe5   :  { %v3481_v0 = vrot.slane %v3472_v50, %v7897_v21  ;;  %v3477_v12 = vrot.slane %v3472_v50, %v7935_v42  ;;  %v3485_v61 = vrot.slane %v3472_v50, %v7903_v23  ;;  %v3493_v2 = vrot.slane %v3472_v50, %v7923_v36 }
 0xbe6   :  { %v3489_v6 = vrot.slane %v3472_v50, %v7900_v22  ;;  %v3497_v63 = vrot.slane %v3472_v50, %v7927_v38 }
 0xbe7   :  { %v3515_v9 = vsub.f32 %v8994_v51, %v3481_v0  ;;  %v3514_v11 = vsub.f32 %v8953_v32, %v3477_v12  ;;  %v3516_v17 = vsub.f32 %v8998_v31, %v3485_v61  ;;  %v3518_v56 = vsub.f32 %v8973_v24, %v3493_v2 }
 0xbe8   :  { %v9186_v52 = vpop.xlane.xlu0 %3978  ;;  %v3517_v34 = vsub.f32 %v9018_v44, %v3489_v6  ;;  %v3501_v51 = vrot.slane %v3472_v50, %v7931_v40  ;;  %v3505_v24 = vrot.slane %v3472_v50, %v7938_v43  ;;  %v3519_v44 = vsub.f32 %v9026_v8, %v3497_v63 }
 0xbe9   :  { %v3524_v35 = vmul.f32 1.442695, %v3515_v9  ;;  %v3522_v59 = vmul.f32 1.442695, %v3514_v11  ;;  %v3526_v37 = vmul.f32 1.442695, %v3516_v17  ;;  %v3984_v7 = vrot.slane %v9186_v52, %v7935_v42 }
 0xbea   :  { %v3530_v19 = vmul.f32 1.442695, %v3518_v56  ;;  %v3528_v31 = vmul.f32 1.442695, %v3517_v34  ;;  %v3988_v29 = vrot.slane %v9186_v52, %v7897_v21  ;;  %v3520_v0 = vsub.f32 %v9021_v13, %v3501_v51 }
 0xbeb   :  { %7441 = vpow2.f32 %v3524_v35  ;;  %v4021_v32 = vsub.f32 %v8957_v53, %v3984_v7  ;;  %v3521_v12 = vsub.f32 %v9054_v54, %v3505_v24  ;;  %v3532_v61 = vmul.f32 1.442695, %v3519_v44 }
 0xbec   :  { %7443 = vpow2.f32 %v3522_v59  ;;  %v4022_v53 = vsub.f32 %v9002_v39, %v3988_v29  ;;  %v3992_v50 = vrot.slane %v9186_v52, %v7903_v23  ;;  %v3534_v2 = vmul.f32 1.442695, %v3520_v0 }
 0xbed   :  { %7445 = vpow2.f32 %v3526_v37  ;;  %v4029_v14 = vmul.f32 1.442695, %v4021_v32  ;;  %v4000_v8 = vrot.slane %v9186_v52, %v7923_v36  ;;  %v9205_v6 = vpop.xlane.xlu0 %4484  ;;  %v3536_v9 = vmul.f32 1.442695, %v3521_v12 }
 0xbee   :  { %7447 = vpow2.f32 %v3530_v19  ;;  %v4031_v13 = vmul.f32 1.442695, %v4022_v53  ;;  %v4023_v54 = vsub.f32 %v9006_v28, %v3992_v50  ;;  %v3996_v17 = vrot.slane %v9186_v52, %v7900_v22 }
 0xbef   :  { %7449 = vpow2.f32 %v3528_v31  ;;  %v4025_v34 = vsub.f32 %v8981_v16, %v4000_v8  ;;  %v4490_v63 = vrot.slane %v9205_v6, %v7935_v42  ;;  %v4004_v28 = vrot.slane %v9186_v52, %v7927_v38 }
 0xbf0   :  { %7451 = vpow2.f32 %v4029_v14  ;;  %v4033_v7 = vmul.f32 1.442695, %v4023_v54  ;;  %v4024_v19 = vsub.f32 %v9034_v60, %v3996_v17  ;;  %v4008_v16 = vrot.slane %v9186_v52, %v7931_v40 }
 0xbf1   :  { %7453 = vpow2.f32 %v3532_v61  ;;  %v4037_v32 = vmul.f32 1.442695, %v4025_v34  ;;  %v4527_v24 = vsub.f32 %v8965_v48, %v4490_v63  ;;  %v4026_v14 = vsub.f32 %v9038_v55, %v4004_v28 }
 0xbf2   :  { %7455 = vpow2.f32 %v3534_v2  ;;  %v4035_v60 = vmul.f32 1.442695, %v4024_v19  ;;  %v4027_v0 = vsub.f32 %v9029_v10, %v4008_v16  ;;  %v4494_v12 = vrot.slane %v9205_v6, %v7897_v21 }
 0xbf3   :  { %7457 = vpow2.f32 %v4031_v13  ;;  %v4535_v61 = vmul.f32 1.442695, %v4527_v24  ;;  %v4012_v53 = vrot.slane %v9186_v52, %v7938_v43  ;;  %v4498_v10 = vrot.slane %v9205_v6, %v7903_v23 }
 0xbf4   :  { %7459 = vpow2.f32 %v3536_v9  ;;  %v4039_v8 = vmul.f32 1.442695, %v4026_v14  ;;  %v4528_v9 = vsub.f32 %v9010_v25, %v4494_v12  ;;  %v4041_v13 = vmul.f32 1.442695, %v4027_v0  ;;  %v10069_v12 = vld [vmem:[#allocation40_spill] sm:$0xff] }
 0xbf5   :  { %v7442_v11 = vpop.eup %7441  ;;  %7461 = vpow2.f32 %v4033_v7  ;;  %v4028_v54 = vsub.f32 %v9058_v30, %v4012_v53  ;;  %v4529_v63 = vsub.f32 %v9014_v41, %v4498_v10  ;;  %v4502_v28 = vrot.slane %v9205_v6, %v7900_v22 }
 0xbf6   :  { %v7444_v39 = vpop.eup %7443  ;;  %v9211_v56 = vmul.f32 %v7442_v11, %v10060_v49  ;;  %7463 = vpow2.f32 %v4037_v32  ;;  %v4506_v11 = vrot.slane %v9205_v6, %v7923_v36  ;;  %v4537_v25 = vmul.f32 1.442695, %v4528_v9 }
 0xbf7   :  { %v7446_v35 = vpop.eup %7445  ;;  %v9217_v59 = vmul.f32 %v7444_v39, %v10059_v20  ;;  %7465 = vpow2.f32 %v4035_v60  ;;  %v4043_v7 = vmul.f32 1.442695, %v4028_v54  ;;  %v4514_v19 = vrot.slane %v9205_v6, %v7931_v40 }
 0xbf8   :  { %v7448_v37 = vpop.eup %7447  ;;  %3558 = vperm.xlu1 %7294, %v9211_v56   ;;  %v9227_v51 = vmul.f32 %v7446_v35, %v10061_v62  ;;  %7467 = vpow2.f32 %v4535_v61  ;;  %v10067_v35 = vld [vmem:[#allocation35_spill] sm:$0xff]  ;;  %v4539_v24 = vmul.f32 1.442695, %v4529_v63  ;;  %v4510_v14 = vrot.slane %v9205_v6, %v7927_v38 }
 0xbf9   :  { %3555 = vperm.xlu0 %7293, %v9217_v59   ;;  %v7450_v31 = vpop.eup %7449  ;;  %v9231_v44 = vmul.f32 %v7448_v37, %v10062_v33  ;;  %7469 = vpow2.f32 %v4039_v8  ;;  %v4531_v37 = vsub.f32 %v10067_v35, %v4506_v11  ;;  %v4533_v61 = vsub.f32 %v10069_v12, %v4514_v19  ;;  %v10070_v8 = vld [vmem:[#allocation38_spill] sm:$0xff]  ;;  %v10071_v35 = vld [vmem:[#allocation37_spill] sm:$0xff] }
 0xbfa   :  { %v7452_v29 = vpop.eup %7451  ;;  %v9240_v48 = vmul.f32 %v7450_v31, %v10063_v57  ;;  %7471 = vpow2.f32 %v4041_v13  ;;  %v10068_v31 = vld [vmem:[#allocation34_spill] sm:$0xff]  ;;  %v4532_v9 = vsub.f32 %v10070_v8, %v4510_v14  ;;  %v4518_v11 = vrot.slane %v9205_v6, %v7938_v43 }
 0xbfb   :  { %v7454_v50 = vpop.eup %7453  ;;  %v9245_v55 = vmul.f32 %v7452_v29, %v10059_v20  ;;  %7473 = vpow2.f32 %v4537_v25  ;;  %v4530_v29 = vsub.f32 %v10068_v31, %v4502_v28  ;;  %v4543_v0 = vmul.f32 1.442695, %v4531_v37 }
 0xbfc   :  { %3561 = vperm.xlu1 %7294, %v9227_v51   ;;  %v7456_v2 = vpop.eup %7455  ;;  %v9255_v52 = vmul.f32 %v7454_v50, %v10065_v18  ;;  %7475 = vpow2.f32 %v4043_v7  ;;  %v4547_v54 = vmul.f32 1.442695, %v4533_v61  ;;  %v4545_v25 = vmul.f32 1.442695, %v4532_v9 }
 0xbfd   :  { %3567 = vperm.xlu0 %7293, %v9231_v44   ;;  %v7458_v17 = vpop.eup %7457  ;;  %v9259_v39 = vmul.f32 %v7456_v2, %v10064_v5  ;;  %7477 = vpow2.f32 %v4539_v24  ;;  %v4541_v10 = vmul.f32 1.442695, %v4530_v29  ;;  %v4534_v37 = vsub.f32 %v10071_v35, %v4518_v11 }
 0xbfe   :  { %v7460_v34 = vpop.eup %7459  ;;  %v9268_v30 = vmul.f32 %v7458_v17, %v10060_v49  ;;  %7479 = vpow2.f32 %v4543_v0 }
 0xbff   :  { %v7462_v16 = vpop.eup %7461  ;;  %v9273_v41 = vmul.f32 %v7460_v34, %v10066_v45  ;;  %7481 = vpow2.f32 %v4541_v10 }
 0xc00   :  { %3564 = vperm.xlu1 %7294, %v9240_v48   ;;  %v7464_v32 = vpop.eup %7463  ;;  %v9281_v60 = vmul.f32 %v7462_v16, %v10061_v62  ;;  %7483 = vpow2.f32 %v4547_v54  ;;  %v4549_v16 = vmul.f32 1.442695, %v4534_v37 }
 0xc01   :  { %4062 = vperm.xlu0 %7293, %v9245_v55   ;;  %v7466_v53 = vpop.eup %7465  ;;  %v9285_v50 = vmul.f32 %v7464_v32, %v10062_v33  ;;  %7485 = vpow2.f32 %v4545_v25 }
 0xc02   :  { %v7468_v2 = vpop.eup %7467  ;;  %v9293_v13 = vmul.f32 %v7466_v53, %v10063_v57  ;;  %7487 = vpow2.f32 %v4549_v16 }
 0xc03   :  { %v7470_v17 = vpop.eup %7469  ;;  %v9296_v34 = vmul.f32 %v7468_v2, %v10059_v20 }
 0xc04   :  { %3570 = vperm.xlu1 %7294, %v9255_v52   ;;  %v7472_v63 = vpop.eup %7471  ;;  %v9302_v6 = vmul.f32 %v7470_v17, %v10065_v18 }
 0xc05   :  { %3573 = vperm.xlu0 %7293, %v9259_v39   ;;  %v7474_v28 = vpop.eup %7473  ;;  %v9305_v7 = vmul.f32 %v7472_v63, %v10064_v5 }
 0xc06   :  { %v7476_v19 = vpop.eup %7475  ;;  %v9310_v32 = vmul.f32 %v7474_v28, %v10060_v49 }
 0xc07   :  { %v7478_v24 = vpop.eup %7477  ;;  %v9313_v31 = vmul.f32 %v7476_v19, %v10066_v45 }
 0xc08   :  { %4065 = vperm.xlu1 %7294, %v9268_v30   ;;  %v7480_v29 = vpop.eup %7479  ;;  %v9318_v14 = vmul.f32 %v7478_v24, %v10061_v62 }
 0xc09   :  { %3576 = vperm.xlu0 %7293, %v9273_v41   ;;  %v7482_v0 = vpop.eup %7481  ;;  %v9321_v12 = vmul.f32 %v7480_v29, %v10062_v33 }
 0xc0a   :  { %v7484_v61 = vpop.eup %7483  ;;  %v9326_v2 = vmul.f32 %v7482_v0, %v10063_v57 }
 0xc0b   :  { %v7486_v10 = vpop.eup %7485  ;;  %v9329_v8 = vmul.f32 %v7484_v61, %v10064_v5 }
 0xc0c   :  { %4068 = vperm.xlu1 %7294, %v9281_v60   ;;  %v9334_v9 = vmul.f32 %v7486_v10, %v10065_v18  ;;  %v7488_v11 = vpop.eup %7487 }
 0xc0d   :  { %4074 = vperm.xlu0 %7293, %v9285_v50   ;;  %v9338_v63 = vmul.f32 %v7488_v11, %v10066_v45 }
 0xc10   :  { %4071 = vperm.xlu1 %7294, %v9293_v13  }
 0xc11   :  { %4568 = vperm.xlu0 %7293, %v9296_v34  }
 0xc14   :  { %4077 = vperm.xlu1 %7294, %v9302_v6  }
 0xc15   :  { %4080 = vperm.xlu0 %7293, %v9305_v7  }
 0xc18   :  { %4571 = vperm.xlu1 %7294, %v9310_v32  }
 0xc19   :  { %4083 = vperm.xlu0 %7293, %v9313_v31  }
 0xc1a   :  { %v3053_v53 = vpop.permute.xlu1 %3052 }
 0xc1b   :  { %v3056_v17 = vpop.permute.xlu0 %3055  ;;  %v3078_v28 = vrot.slane %v3053_v53, %v8235_v4 }
 0xc1c   :  { %4574 = vperm.xlu1 %7294, %v9318_v14   ;;  %v3082_v37 = vrot.slane %v3056_v17, %v8235_v4 }
 0xc1d   :  { %4580 = vperm.xlu0 %7293, %v9321_v12  }
 0xc1e   :  { %v3059_v54 = vpop.permute.xlu1 %3058  ;;  %v3107_v29 = vsel %vm631_vm11, %v3082_v37, %v3078_v28 }
 0xc1f   :  { %v3065_v35 = vpop.permute.xlu0 %3064  ;;  %v3086_v19 = vrot.slane %v3059_v54, %v8235_v4 }
 0xc20   :  { %4577 = vperm.xlu1 %7294, %v9326_v2   ;;  %v3094_v45 = vrot.slane %v3065_v35, %v8235_v4 }
 0xc21   :  { %4586 = vperm.xlu0 %7293, %v9329_v8   ;;  %v3108_v0 = vsel %vm633_vm12, %v3086_v19, %v3107_v29 }
 0xc22   :  { %v3062_v25 = vpop.permute.xlu1 %3061 }
 0xc23   :  { %v3090_v16 = vrot.slane %v3062_v25, %v8235_v4  ;;  %v3071_v61 = vpop.permute.xlu0 %3070 }
 0xc24   :  { %4583 = vperm.xlu1 %7294, %v9334_v9   ;;  %v3102_v54 = vrot.slane %v3071_v61, %v8235_v4 }
 0xc25   :  { %v3109_v10 = vsel %vm635_vm13, %v3090_v16, %v3108_v0 }
 0xc26   :  { %v3068_v24 = vpop.permute.xlu1 %3067  ;;  %v3110_v17 = vsel %vm637_vm14, %v3094_v45, %v3109_v10 }
 0xc27   :  { %v3098_v11 = vrot.slane %v3068_v24, %v8235_v4  ;;  %v3074_v5 = vpop.permute.xlu0 %3073 }
 0xc28   :  { %4589 = vperm.xlu1 %7294, %v9338_v63   ;;  %v3106_v37 = vrot.slane %v3074_v5, %v8235_v4 }
 0xc29   :  { %v3111_v53 = vsel %vm639_vm15, %v3098_v11, %v3110_v17 }
 0xc2a   :  { %v3112_v25 = vsel %vm641_vm3, %v3102_v54, %v3111_v53 }
 0xc2b   :  { %v3113_v28 = vsel %vm643_vm4, %v3106_v37, %v3112_v25 }
 0xc2c   :  { %v3115_v19 = vsel %vm646_vm5, %v3113_v28, 0.0 }
 0xc40   :  { %3116 = vadd.xlane.f32.xlu0 %v3115_v19 }
 0xc77   :  { %v3559_v16 = vpop.permute.xlu1 %3558 }
 0xc78   :  { %v3556_v24 = vpop.permute.xlu0 %3555  ;;  %v3585_v0 = vrot.slane %v3559_v16, %v8235_v4 }
 0xc79   :  { %v3581_v45 = vrot.slane %v3556_v24, %v8235_v4 }
 0xc7b   :  { %v3562_v29 = vpop.permute.xlu1 %3561  ;;  %v3610_v5 = vsel %vm631_vm11, %v3585_v0, %v3581_v45 }
 0xc7c   :  { %v3568_v35 = vpop.permute.xlu0 %3567  ;;  %v3589_v61 = vrot.slane %v3562_v29, %v8235_v4 }
 0xc7d   :  { %v3597_v37 = vrot.slane %v3568_v35, %v8235_v4 }
 0xc7e   :  { %v3611_v53 = vsel %vm633_vm12, %v3589_v61, %v3610_v5 }
 0xc7f   :  { %v3565_v10 = vpop.permute.xlu1 %3564 }
 0xc80   :  { %v4063_v11 = vpop.permute.xlu0 %4062  ;;  %v3593_v17 = vrot.slane %v3565_v10, %v8235_v4 }
 0xc82   :  { %v3612_v54 = vsel %vm635_vm13, %v3593_v17, %v3611_v53 }
 0xc83   :  { %v3571_v25 = vpop.permute.xlu1 %3570  ;;  %v3613_v24 = vsel %vm637_vm14, %v3597_v37, %v3612_v54  ;;  %v4088_v54 = vrot.slane %v4063_v11, %v8235_v4 }
 0xc84   :  { %v3574_v28 = vpop.permute.xlu0 %3573  ;;  %v3601_v19 = vrot.slane %v3571_v25, %v8235_v4 }
 0xc85   :  { %v3605_v16 = vrot.slane %v3574_v28, %v8235_v4 }
 0xc86   :  { %v3614_v29 = vsel %vm639_vm15, %v3601_v19, %v3613_v24 }
 0xc87   :  { %v4066_v18 = vpop.permute.xlu1 %4065  ;;  %v3615_v0 = vsel %vm641_vm3, %v3605_v16, %v3614_v29 }
 0xc88   :  { %v3577_v10 = vpop.permute.xlu0 %3576  ;;  %v4092_v53 = vrot.slane %v4066_v18, %v8235_v4 }
 0xc89   :  { %v3609_v45 = vrot.slane %v3577_v10, %v8235_v4 }
 0xc8a   :  { %v4117_v24 = vsel %vm631_vm11, %v4092_v53, %v4088_v54 }
 0xc8b   :  { %v4069_v61 = vpop.permute.xlu1 %4068  ;;  %v3616_v17 = vsel %vm643_vm4, %v3609_v45, %v3615_v0 }
 0xc8c   :  { %v4075_v5 = vpop.permute.xlu0 %4074  ;;  %v3618_v35 = vsel %vm646_vm5, %v3616_v17, 0.0  ;;  %v4096_v25 = vrot.slane %v4069_v61, %v8235_v4 }
 0xc8d   :  { %3619 = vadd.xlane.f32.xlu1 %v3618_v35  ;;  %v4104_v45 = vrot.slane %v4075_v5, %v8235_v4 }
 0xc8e   :  { %v4118_v16 = vsel %vm633_vm12, %v4096_v25, %v4117_v24 }
 0xc8f   :  { %v4072_v37 = vpop.permute.xlu1 %4071 }
 0xc90   :  { %v4569_v28 = vpop.permute.xlu0 %4568  ;;  %v4100_v19 = vrot.slane %v4072_v37, %v8235_v4 }
 0xc92   :  { %v4119_v29 = vsel %vm635_vm13, %v4100_v19, %v4118_v16 }
 0xc93   :  { %v4078_v10 = vpop.permute.xlu1 %4077  ;;  %v4120_v11 = vsel %vm637_vm14, %v4104_v45, %v4119_v29  ;;  %v4594_v29 = vrot.slane %v4569_v28, %v8235_v4 }
 0xc94   :  { %v4081_v0 = vpop.permute.xlu0 %4080  ;;  %v4108_v18 = vrot.slane %v4078_v10, %v8235_v4 }
 0xc95   :  { %v4112_v61 = vrot.slane %v4081_v0, %v8235_v4 }
 0xc96   :  { %v4121_v17 = vsel %vm639_vm15, %v4108_v18, %v4120_v11 }
 0xc97   :  { %v4572_v35 = vpop.permute.xlu1 %4571  ;;  %v4122_v25 = vsel %vm641_vm3, %v4112_v61, %v4121_v17 }
 0xc98   :  { %v4084_v37 = vpop.permute.xlu0 %4083  ;;  %v4598_v5 = vrot.slane %v4572_v35, %v8235_v4 }
 0xc99   :  { %v4116_v53 = vrot.slane %v4084_v37, %v8235_v4 }
 0xc9a   :  { %v4623_v0 = vsel %vm631_vm11, %v4598_v5, %v4594_v29 }
 0xc9b   :  { %v4575_v54 = vpop.permute.xlu1 %4574  ;;  %v4123_v19 = vsel %vm643_vm4, %v4116_v53, %v4122_v25 }
 0xc9c   :  { %v4125_v24 = vsel %vm646_vm5, %v4123_v19, 0.0  ;;  %v4602_v16 = vrot.slane %v4575_v54, %v8235_v4  ;;  %v4581_v10 = vpop.permute.xlu0 %4580 }
 0xc9d   :  { %4126 = vadd.xlane.f32.xlu0 %v4125_v24  ;;  %v4610_v17 = vrot.slane %v4581_v10, %v8235_v4 }
 0xc9e   :  { %v4624_v61 = vsel %vm633_vm12, %v4602_v16, %v4623_v0 }
 0xc9f   :  { %v4578_v45 = vpop.permute.xlu1 %4577 }
 0xca0   :  { %v4606_v18 = vrot.slane %v4578_v45, %v8235_v4  ;;  %v4587_v37 = vpop.permute.xlu0 %4586 }
 0xca1   :  { %v4618_v54 = vrot.slane %v4587_v37, %v8235_v4 }
 0xca2   :  { %v4625_v11 = vsel %vm635_vm13, %v4606_v18, %v4624_v61 }
 0xca3   :  { %v4584_v35 = vpop.permute.xlu1 %4583  ;;  %v4626_v25 = vsel %vm637_vm14, %v4610_v17, %v4625_v11 }
 0xca4   :  { %v4614_v53 = vrot.slane %v4584_v35, %v8235_v4 }
 0xca6   :  { %v4627_v28 = vsel %vm639_vm15, %v4614_v53, %v4626_v25 }
 0xca7   :  { %v4590_v19 = vpop.permute.xlu1 %4589  ;;  %v4628_v24 = vsel %vm641_vm3, %v4618_v54, %v4627_v28 }
 0xca8   :  { %v4622_v5 = vrot.slane %v4590_v19, %v8235_v4 }
 0xcaa   :  { %v4629_v16 = vsel %vm643_vm4, %v4622_v5, %v4628_v24 }
 0xcab   :  { %v4631_v29 = vsel %vm646_vm5, %v4629_v16, 0.0 }
 0xcac   :  { %4632 = vadd.xlane.f32.xlu0 %v4631_v29 }
 0xccd   :  { %v3117_v10 = vpop.xlane.xlu0 %3116 }
 0xcce   :  { %v3122_v45 = vrot.slane %v3117_v10, %v7935_v42  ;;  %v3126_v0 = vrot.slane %v3117_v10, %v7897_v21  ;;  %v3130_v18 = vrot.slane %v3117_v10, %v7903_v23  ;;  %v3138_v61 = vrot.slane %v3117_v10, %v7923_v36 }
 0xccf   :  { %v3134_v11 = vrot.slane %v3117_v10, %v7900_v22  ;;  %v3146_v17 = vrot.slane %v3117_v10, %v7931_v40  ;;  %v3142_v35 = vrot.slane %v3117_v10, %v7927_v38  ;;  %v3150_v37 = vrot.slane %v3117_v10, %v7938_v43 }
 0xcd0   :  { %7489 = vrcp.f32 %v3122_v45 }
 0xcd1   :  { %7491 = vrcp.f32 %v3126_v0 }
 0xcd2   :  { %7493 = vrcp.f32 %v3130_v18 }
 0xcd3   :  { %7495 = vrcp.f32 %v3138_v61 }
 0xcd4   :  { %7497 = vrcp.f32 %v3134_v11 }
 0xcd5   :  { %7499 = vrcp.f32 %v3146_v17 }
 0xcd6   :  { %7501 = vrcp.f32 %v3142_v35 }
 0xcd7   :  { %7503 = vrcp.f32 %v3150_v37 }
 0xcda   :  { %v7490_v53 = vpop.eup %7489 }
 0xcdb   :  { %v7492_v25 = vpop.eup %7491  ;;  %v3160_v28 = vmul.f32 %v7490_v53, %v9146_v1 }
 0xcdc   :  { %v7494_v54 = vpop.eup %7493  ;;  %v3162_v19 = vmul.f32 %v7492_v25, %v9149_v46 }
 0xcdd   :  { %v7496_v5 = vpop.eup %7495  ;;  %3184 = vperm.xlu1 %7294, %v3160_v28   ;;  %v3164_v24 = vmul.f32 %v7494_v54, %v9154_v26 }
 0xcde   :  { %3187 = vperm.xlu0 %7293, %v3162_v19   ;;  %v7498_v16 = vpop.eup %7497  ;;  %v3168_v29 = vmul.f32 %v7496_v5, %v9157_v3 }
 0xcdf   :  { %v7500_v45 = vpop.eup %7499  ;;  %v3166_v10 = vmul.f32 %v7498_v16, %v9162_v47 }
 0xce0   :  { %v7502_v0 = vpop.eup %7501  ;;  %v3172_v1 = vmul.f32 %v7500_v45, %v9165_v58 }
 0xce1   :  { %3190 = vperm.xlu1 %7294, %v3164_v24   ;;  %v7504_v18 = vpop.eup %7503  ;;  %v3170_v46 = vmul.f32 %v7502_v0, %v9170_v15 }
 0xce2   :  { %3196 = vperm.xlu0 %7293, %v3168_v29   ;;  %v3174_v61 = vmul.f32 %v7504_v18, %v9173_v27 }
 0xce5   :  { %3193 = vperm.xlu1 %7294, %v3166_v10  }
 0xce6   :  { %3202 = vperm.xlu0 %7293, %v3172_v1  }
 0xce9   :  { %3199 = vperm.xlu1 %7294, %v3170_v46  }
 0xcea   :  { %3205 = vperm.xlu0 %7293, %v3174_v61  }
 0xd1a   :  { %v3620_v26 = vpop.xlane.xlu1 %3619 }
 0xd1b   :  { %v3629_v3 = vrot.slane %v3620_v26, %v7897_v21  ;;  %v3625_v11 = vrot.slane %v3620_v26, %v7935_v42  ;;  %v3633_v17 = vrot.slane %v3620_v26, %v7903_v23  ;;  %v3641_v47 = vrot.slane %v3620_v26, %v7923_v36 }
 0xd1c   :  { %v3637_v58 = vrot.slane %v3620_v26, %v7900_v22  ;;  %v3645_v15 = vrot.slane %v3620_v26, %v7927_v38  ;;  %v3653_v0 = vrot.slane %v3620_v26, %v7938_v43 }
 0xd1d   :  { %7505 = vrcp.f32 %v3629_v3 }
 0xd1e   :  { %7507 = vrcp.f32 %v3625_v11 }
 0xd1f   :  { %7509 = vrcp.f32 %v3633_v17 }
 0xd20   :  { %7511 = vrcp.f32 %v3641_v47 }
 0xd21   :  { %7513 = vrcp.f32 %v3637_v58 }
 0xd22   :  { %7515 = vrcp.f32 %v3645_v15 }
 0xd27   :  { %v7506_v27 = vpop.eup %7505 }
 0xd28   :  { %v7508_v35 = vpop.eup %7507  ;;  %v3665_v37 = vmul.f32 %v7506_v27, %v9211_v56  ;;  %v3649_v56 = vrot.slane %v3620_v26, %v7931_v40 }
 0xd29   :  { %v7510_v53 = vpop.eup %7509  ;;  %v3663_v25 = vmul.f32 %v7508_v35, %v9217_v59 }
 0xd2a   :  { %v7512_v28 = vpop.eup %7511  ;;  %v9429_v54 = vpop.xlane.xlu0 %4126  ;;  %3690 = vperm.xlu1 %7294, %v3665_v37   ;;  %v3667_v16 = vmul.f32 %v7510_v53, %v9227_v51 }
 0xd2b   :  { %3687 = vperm.xlu0 %7293, %v3663_v25   ;;  %v4136_v19 = vrot.slane %v9429_v54, %v7897_v21  ;;  %v4132_v5 = vrot.slane %v9429_v54, %v7935_v42  ;;  %v4140_v24 = vrot.slane %v9429_v54, %v7903_v23  ;;  %v7514_v29 = vpop.eup %7513  ;;  %v3671_v59 = vmul.f32 %v7512_v28, %v9231_v44 }
 0xd2c   :  { %v4144_v45 = vrot.slane %v9429_v54, %v7900_v22  ;;  %v3669_v10 = vmul.f32 %v7514_v29, %v9240_v48  ;;  %v7516_v1 = vpop.eup %7515  ;;  %v4152_v51 = vrot.slane %v9429_v54, %v7927_v38  ;;  %v4148_v18 = vrot.slane %v9429_v54, %v7923_v36 }
 0xd2d   :  { %7517 = vrcp.f32 %v4136_v19  ;;  %v3673_v44 = vmul.f32 %v7516_v1, %v9255_v52 }
 0xd2e   :  { %3693 = vperm.xlu1 %7294, %v3667_v16   ;;  %7519 = vrcp.f32 %v4132_v5 }
 0xd2f   :  { %3699 = vperm.xlu0 %7293, %v3671_v59   ;;  %7521 = vrcp.f32 %v4140_v24 }
 0xd30   :  { %7523 = vrcp.f32 %v3649_v56 }
 0xd31   :  { %7525 = vrcp.f32 %v4144_v45 }
 0xd32   :  { %3696 = vperm.xlu1 %7294, %v3669_v10   ;;  %7527 = vrcp.f32 %v3653_v0 }
 0xd33   :  { %7529 = vrcp.f32 %v4152_v51 }
 0xd34   :  { %7531 = vrcp.f32 %v4148_v18 }
 0xd36   :  { %3702 = vperm.xlu1 %7294, %v3673_v44  }
 0xd37   :  { %v7518_v46 = vpop.eup %7517 }
 0xd38   :  { %v7520_v61 = vpop.eup %7519  ;;  %v4172_v48 = vmul.f32 %v7518_v46, %v9268_v30  ;;  %v4156_v30 = vrot.slane %v9429_v54, %v7931_v40 }
 0xd39   :  { %v7522_v26 = vpop.eup %7521  ;;  %v4633_v3 = vpop.xlane.xlu0 %4632  ;;  %v4170_v11 = vmul.f32 %v7520_v61, %v9245_v55 }
 0xd3a   :  { %v7524_v17 = vpop.eup %7523  ;;  %4197 = vperm.xlu1 %7294, %v4172_v48   ;;  %v4642_v47 = vrot.slane %v4633_v3, %v7897_v21  ;;  %v4638_v52 = vrot.slane %v4633_v3, %v7935_v42  ;;  %v4646_v58 = vrot.slane %v4633_v3, %v7903_v23  ;;  %v4174_v15 = vmul.f32 %v7522_v26, %v9281_v60 }
 0xd3b   :  { %4194 = vperm.xlu0 %7293, %v4170_v11   ;;  %v7526_v27 = vpop.eup %7525  ;;  %v3675_v35 = vmul.f32 %v7524_v17, %v9259_v39  ;;  %v4650_v37 = vrot.slane %v4633_v3, %v7900_v22  ;;  %v4160_v60 = vrot.slane %v9429_v54, %v7938_v43  ;;  %v4658_v39 = vrot.slane %v4633_v3, %v7927_v38 }
 0xd3c   :  { %7533 = vrcp.f32 %v4642_v47  ;;  %v7528_v55 = vpop.eup %7527  ;;  %v4176_v53 = vmul.f32 %v7526_v27, %v9293_v13  ;;  %v4654_v24 = vrot.slane %v4633_v3, %v7923_v36  ;;  %v4662_v59 = vrot.slane %v4633_v3, %v7931_v40 }
 0xd3d   :  { %7535 = vrcp.f32 %v4638_v52  ;;  %v7530_v25 = vpop.eup %7529  ;;  %v3677_v28 = vmul.f32 %v7528_v55, %v9273_v41  ;;  %v4666_v41 = vrot.slane %v4633_v3, %v7938_v43 }
 0xd3e   :  { %4200 = vperm.xlu1 %7294, %v4174_v15   ;;  %7537 = vrcp.f32 %v4646_v58  ;;  %v7532_v19 = vpop.eup %7531  ;;  %v4180_v5 = vmul.f32 %v7530_v25, %v9302_v6 }
 0xd3f   :  { %3705 = vperm.xlu0 %7293, %v3675_v35   ;;  %7539 = vrcp.f32 %v4156_v30  ;;  %v4178_v13 = vmul.f32 %v7532_v19, %v9285_v50 }
 0xd40   :  { %7541 = vrcp.f32 %v4650_v37 }
 0xd41   :  { %7543 = vrcp.f32 %v4160_v60 }
 0xd42   :  { %4203 = vperm.xlu1 %7294, %v4176_v53   ;;  %7545 = vrcp.f32 %v4658_v39  ;;  %v10073_v39 = vmov 0.0  }
 0xd43   :  { %3708 = vperm.xlu0 %7293, %v3677_v28   ;;  %7547 = vrcp.f32 %v4654_v24 }
 0xd44   :  { %7549 = vrcp.f32 %v4666_v41 }
 0xd45   :  { %7551 = vrcp.f32 %v4662_v59 }
 0xd46   :  { %v7534_v16 = vpop.eup %7533  ;;  %4209 = vperm.xlu1 %7294, %v4180_v5  }
 0xd47   :  { %v7536_v56 = vpop.eup %7535  ;;  %4206 = vperm.xlu0 %7293, %v4178_v13   ;;  %v4678_v54 = vmul.f32 %v7534_v16, %v9310_v32 }
 0xd48   :  { %v4676_v29 = vmul.f32 %v7536_v56, %v9296_v34  ;;  %v7538_v6 = vpop.eup %7537 }
 0xd49   :  { %v7540_v45 = vpop.eup %7539  ;;  %v4680_v50 = vmul.f32 %v7538_v6, %v9318_v14 }
 0xd4a   :  { %4703 = vperm.xlu1 %7294, %v4678_v54   ;;  %v7542_v10 = vpop.eup %7541  ;;  %v4182_v0 = vmul.f32 %v7540_v45, %v9305_v7 }
 0xd4b   :  { %4700 = vperm.xlu0 %7293, %v4676_v29   ;;  %v7544_v32 = vpop.eup %7543  ;;  %v4682_v1 = vmul.f32 %v7542_v10, %v9326_v2 }
 0xd4c   :  { %v7546_v34 = vpop.eup %7545  ;;  %v4184_v51 = vmul.f32 %v7544_v32, %v9313_v31  ;;  %v10072_v31 = vld [vmem:[#allocation36_spill] sm:$0xff] }
 0xd4d   :  { %v7548_v44 = vpop.eup %7547  ;;  %v4686_v18 = vmul.f32 %v7546_v34, %v9334_v9 }
 0xd4e   :  { %4706 = vperm.xlu1 %7294, %v4680_v50   ;;  %v7550_v46 = vpop.eup %7549  ;;  %v4684_v14 = vmul.f32 %v7548_v44, %v9321_v12 }
 0xd4f   :  { %4212 = vperm.xlu0 %7293, %v4182_v0   ;;  %v7552_v61 = vpop.eup %7551  ;;  %v4690_v7 = vmul.f32 %v7550_v46, %v9338_v63 }
 0xd50   :  { %v4688_v48 = vmul.f32 %v7552_v61, %v9329_v8 }
 0xd52   :  { %4709 = vperm.xlu1 %7294, %v4682_v1  }
 0xd53   :  { %4215 = vperm.xlu0 %7293, %v4184_v51  }
 0xd56   :  { %4715 = vperm.xlu1 %7294, %v4686_v18  }
 0xd57   :  { %4712 = vperm.xlu0 %7293, %v4684_v14  }
 0xd5a   :  { %4721 = vperm.xlu1 %7294, %v4690_v7  }
 0xd5b   :  { %4718 = vperm.xlu0 %7293, %v4688_v48  }
 0xd5c   :  { %v3185_v2 = vpop.permute.xlu1 %3184 }
 0xd5d   :  { %v3188_v26 = vpop.permute.xlu0 %3187  ;;  %v3210_v3 = vrot.slane %v3185_v2, %v8235_v4 }
 0xd5e   :  { %4256 = vrot.lane.b32.xlu1 %v10072_v31, %s7676_s8  ;;  %v3214_v12 = vrot.slane %v3188_v26, %v8235_v4 }
 0xd5f   :  { %3750 = vrot.lane.b32.xlu0 %v10072_v31, %s7675_s5 }
 0xd60   :  { %v3191_v9 = vpop.permute.xlu1 %3190  ;;  %v3239_v17 = vsel %vm631_vm11, %v3214_v12, %v3210_v3 }
 0xd61   :  { %v3197_v11 = vpop.permute.xlu0 %3196  ;;  %v3218_v63 = vrot.slane %v3191_v9, %v8235_v4 }
 0xd62   :  { %v3226_v30 = vrot.slane %v3197_v11, %v8235_v4 }
 0xd63   :  { %4762 = vrot.lane.b32.xlu0 %v10072_v31, %s7674_s0  ;;  %v3240_v58 = vsel %vm633_vm12, %v3218_v63, %v3239_v17 }
 0xd64   :  { %v3194_v8 = vpop.permute.xlu1 %3193 }
 0xd65   :  { %v3203_v47 = vpop.permute.xlu0 %3202  ;;  %v3222_v52 = vrot.slane %v3194_v8, %v8235_v4 }
 0xd66   :  { %v3234_v37 = vrot.slane %v3203_v47, %v8235_v4 }
 0xd67   :  { %v3241_v15 = vsel %vm635_vm13, %v3222_v52, %v3240_v58 }
 0xd68   :  { %v3200_v27 = vpop.permute.xlu1 %3199  ;;  %v3242_v53 = vsel %vm637_vm14, %v3226_v30, %v3241_v15 }
 0xd69   :  { %v3206_v35 = vpop.permute.xlu0 %3205  ;;  %v3230_v55 = vrot.slane %v3200_v27, %v8235_v4 }
 0xd6a   :  { %v3238_v60 = vrot.slane %v3206_v35, %v8235_v4 }
 0xd6b   :  { %v3243_v25 = vsel %vm639_vm15, %v3230_v55, %v3242_v53 }
 0xd6c   :  { %v3244_v28 = vsel %vm641_vm3, %v3234_v37, %v3243_v25 }
 0xd6d   :  { %v3245_v19 = vsel %vm643_vm4, %v3238_v60, %v3244_v28 }
 0xd6e   :  { %7015 = vmatmul.mubr.msk.f32.vlgmr.msra.gmra.mrb[6].mxu0 %vm646_vm5, %v3245_v19 }
 0xd6f   :  { %7019 = vmatprep.mubr.msk.f32.mxu0 %vm7672_vm0, %v10073_v39 }
 0xda9   :  { %v3691_v5 = vpop.permute.xlu1 %3690 }
 0xdaa   :  { %v3688_v13 = vpop.permute.xlu0 %3687  ;;  %v3717_v46 = vrot.slane %v3691_v5, %v8235_v4 }
 0xdab   :  { %v3713_v18 = vrot.slane %v3688_v13, %v8235_v4 }
 0xdad   :  { %v3694_v24 = vpop.permute.xlu1 %3693  ;;  %v3742_v2 = vsel %vm631_vm11, %v3717_v46, %v3713_v18 }
 0xdae   :  { %v3700_v54 = vpop.permute.xlu0 %3699  ;;  %v3721_v61 = vrot.slane %v3694_v24, %v8235_v4 }
 0xdaf   :  { %v3729_v52 = vrot.slane %v3700_v54, %v8235_v4 }
 0xdb0   :  { %v3743_v31 = vsel %vm633_vm12, %v3721_v61, %v3742_v2  ;;  %v10074_v61 = vmov 0.0|0.0   ;;  %v4868_v2 = vld [vmem:[%s7778_s3 + $0x8] sm:$0xff] }
 0xdb1   :  { %v3697_v16 = vpop.permute.xlu1 %3696 }
 0xdb2   :  { %v3725_v7 = vrot.slane %v3697_v16, %v8235_v4 }
 0xdb4   :  { %v3744_v3 = vsel %vm635_vm13, %v3725_v7, %v3743_v31 }
 0xdb5   :  { %v3703_v56 = vpop.permute.xlu1 %3702  ;;  %v3745_v60 = vsel %vm637_vm14, %v3729_v52, %v3744_v3  ;;  %v4870_v3 = vld [vmem:[%s7778_s3 + $0x18] sm:$0xff] }
 0xdb6   :  { %v3733_v63 = vrot.slane %v3703_v56, %v8235_v4 }
 0xdb8   :  { %v3746_v19 = vsel %vm639_vm15, %v3733_v63, %v3745_v60  ;;  %v4871_v63 = vld [vmem:[%s7778_s3 + $0x20] sm:$0xff]  ;;  %v4877_v60 = vld [vmem:[%s7778_s3 + $0x50] sm:$0xff] }
 0xdb9   :  { %v4198_v41 = vpop.permute.xlu1 %4197 }
 0xdba   :  { %v4195_v29 = vpop.permute.xlu0 %4194  ;;  %v4224_v12 = vrot.slane %v4198_v41, %v8235_v4 }
 0xdbb   :  { %v4220_v9 = vrot.slane %v4195_v29, %v8235_v4 }
 0xdbd   :  { %v4201_v59 = vpop.permute.xlu1 %4200  ;;  %v4249_v55 = vsel %vm631_vm11, %v4224_v12, %v4220_v9  ;;  %v4869_v12 = vld [vmem:[%s7778_s3 + $0x10] sm:$0xff] }
 0xdbe   :  { %v3706_v6 = vpop.permute.xlu0 %3705  ;;  %v4228_v11 = vrot.slane %v4201_v59, %v8235_v4 }
 0xdbf   :  { %v3737_v58 = vrot.slane %v3706_v6, %v8235_v4 }
 0xdc0   :  { %v4250_v25 = vsel %vm633_vm12, %v4228_v11, %v4249_v55  ;;  %v7195_v11 = vpack.c.bf16 %v4870_v3, %v4869_v12  ;;  %v4876_v55 = vld [vmem:[%s7778_s3 + $0x48] sm:$0xff] }
 0xdc1   :  { %v4204_v45 = vpop.permute.xlu1 %4203  ;;  %v3747_v16 = vsel %vm641_vm3, %v3737_v58, %v3746_v19  ;;  %v4873_v58 = vld [vmem:[%s7778_s3 + $0x30] sm:$0xff] }
 0xdc2   :  { %v3709_v50 = vpop.permute.xlu0 %3708  ;;  %v4232_v8 = vrot.slane %v4204_v45, %v8235_v4 }
 0xdc3   :  { %v3741_v37 = vrot.slane %v3709_v50, %v8235_v4 }
 0xdc4   :  { %v4251_v5 = vsel %vm635_vm13, %v4232_v8, %v4250_v25  ;;  %v4872_v8 = vld [vmem:[%s7778_s3 + $0x28] sm:$0xff]  ;;  %v4878_v25 = vld [vmem:[%s7778_s3 + $0x58] sm:$0xff] }
 0xdc5   :  { %v4210_v10 = vpop.permute.xlu1 %4209  ;;  %v3748_v50 = vsel %vm643_vm4, %v3741_v37, %v3747_v16 }
 0xdc6   :  { %v4207_v0 = vpop.permute.xlu0 %4206  ;;  %v4240_v24 = vrot.slane %v4210_v10, %v8235_v4 }
 0xdc7   :  { %v4236_v15 = vrot.slane %v4207_v0, %v8235_v4 }
 0xdc9   :  { %v4704_v32 = vpop.permute.xlu1 %4703  ;;  %v4252_v56 = vsel %vm637_vm14, %v4236_v15, %v4251_v5  ;;  %v4874_v15 = vld [vmem:[%s7778_s3 + $0x38] sm:$0xff]  ;;  %v7207_v5 = vpack.c.bf16 %v4878_v25, %v4877_v60 }
 0xdca   :  { %v4701_v1 = vpop.permute.xlu0 %4700  ;;  %v4730_v47 = vrot.slane %v4704_v32, %v8235_v4 }
 0xdcb   :  { %v4726_v17 = vrot.slane %v4701_v1, %v8235_v4  ;;  %v4253_v1 = vsel %vm639_vm15, %v4240_v24, %v4252_v56  ;;  %v4879_v24 = vld [vmem:[%s7778_s3 + $0x60] sm:$0xff]  ;;  %v4881_v56 = vld [vmem:[%s7778_s3 + $0x70] sm:$0xff] }
 0xdcd   :  { %v4707_v34 = vpop.permute.xlu1 %4706  ;;  %v4755_v13 = vsel %vm631_vm11, %v4730_v47, %v4726_v17  ;;  %v7198_v17 = vpack.c.bf16 %v4872_v8, %v4871_v63 }
 0xdce   :  { %v4213_v51 = vpop.permute.xlu0 %4212  ;;  %v4734_v30 = vrot.slane %v4707_v34, %v8235_v4 }
 0xdcf   :  { %v4244_v54 = vrot.slane %v4213_v51, %v8235_v4 }
 0xdd0   :  { %v4756_v41 = vsel %vm633_vm12, %v4734_v30, %v4755_v13  ;;  %v4875_v30 = vld [vmem:[%s7778_s3 + $0x40] sm:$0xff]  ;;  %v4880_v13 = vld [vmem:[%s7778_s3 + $0x68] sm:$0xff] }
 0xdd1   :  { %v4710_v44 = vpop.permute.xlu1 %4709  ;;  %v4254_v34 = vsel %vm641_vm3, %v4244_v54, %v4253_v1  ;;  %v7210_v16 = vpack.c.bf16 %v4880_v13, %v4879_v24  ;;  %v4882_v54 = vld [vmem:[%s7778_s3 + $0x78] sm:$0xff] }
 0xdd2   :  { %v4216_v14 = vpop.permute.xlu0 %4215  ;;  %v4738_v53 = vrot.slane %v4710_v44, %v8235_v4 }
 0xdd3   :  { %v4248_v59 = vrot.slane %v4216_v14, %v8235_v4 }
 0xdd4   :  { %v4757_v6 = vsel %vm635_vm13, %v4738_v53, %v4756_v41  ;;  %v7204_v53 = vpack.c.bf16 %v4876_v55, %v4875_v30  ;;  %v7213_v41 = vpack.c.bf16 %v4882_v54, %v4881_v56 }
 0xdd5   :  { %v4716_v48 = vpop.permute.xlu1 %4715  ;;  %v4255_v44 = vsel %vm643_vm4, %v4248_v59, %v4254_v34 }
 0xdd6   :  { %v4713_v26 = vpop.permute.xlu0 %4712  ;;  %v4746_v45 = vrot.slane %v4716_v48, %v8235_v4  ;;  %v4867_v48 = vld [vmem:[%s7778_s3] sm:$0xff]  ;;  %s10089_s3 = sld [smem:[#allocation12_spill]] }
 0xdd7   :  { %v4742_v28 = vrot.slane %v4713_v26, %v8235_v4  ;;  %v7192_v26 = vpack.c.bf16 %v4868_v2, %v4867_v48 }
 0xdd9   :  { %v4722_v35 = vpop.permute.xlu1 %4721  ;;  %v4758_v10 = vsel %vm637_vm14, %v4742_v28, %v4757_v6 }
 0xdda   :  { %v4719_v27 = vpop.permute.xlu0 %4718  ;;  %v4759_v18 = vsel %vm639_vm15, %v4746_v45, %v4758_v10  ;;  %v4754_v46 = vrot.slane %v4722_v35, %v8235_v4  ;;  %v7201_v35 = vpack.c.bf16 %v4874_v15, %v4873_v58  ;;  %v6888_v45 = vld [vmem:[%s7773_s4] ss:$0 sm:$0xff]  ;;  %s10098_s4 = sld [smem:[#allocation8_spill]] }
 0xddb   :  { %v4750_v0 = vrot.slane %v4719_v27, %v8235_v4 }
 0xddd   :  { %v4257_v32 = vpop.permute.xlu1 %4256  ;;  %v4760_v14 = vsel %vm641_vm3, %v4750_v0, %v4759_v18 }
 0xdde   :  { %v3751_v29 = vpop.permute.xlu0 %3750  ;;  %v4761_v7 = vsel %vm643_vm4, %v4754_v46, %v4760_v14  ;;  %v6891_v46 = vld [vmem:[%s10075_s9] ss:$0 sm:$0xff] }
 0xddf   :  { %7018 = vmatpush3.msra.mxu0 %v3751_v29  ;;  %v6890_v14 = vld [vmem:[%s10076_s13] ss:$0 sm:$0xff] }
 0xde0   :  { %7020 = vmatmul.mubr.msk.f32.vlgmr.msra.gmra.mrb[8].mxu0 %vm646_vm5, %v3748_v50  ;;  %7022 = vmatprep.subr.mxu0 %v10073_v39 }
 0xde1   :  { %7023 = vmatpush3.msra.mxu0 %v4257_v32  ;;  %7024 = vmatprep.mubr.msk.f32.mxu0 %vm7672_vm0, %v10073_v39 }
 0xde2   :  { %v4763_v51 = vpop.permute.xlu0 %4762  ;;  %7027 = vmatprep.subr.mxu0 %v10073_v39 }
 0xde4   :  { %7025 = vmatmul.mubr.msk.f32.vlgmr.msra.gmra.mrb[10].mxu0 %vm646_vm5, %v4255_v44 }
 0xde5   :  { %7028 = vmatpush3.msra.mxu0 %v4763_v51  ;;  %7029 = vmatprep.mubr.msk.f32.mxu0 %vm7672_vm0, %v10073_v39 }
 0xde6   :  { %7191 = vmatprep.subr.bf16.mxu0 %v10074_v61 }
 0xde8   :  { %7030 = vmatmul.mubr.msk.f32.vlgmr.msra.gmra.mrb[12].mxu0 %vm646_vm5, %v4761_v7 }
 0xde9   :  { %7064 = vmatprep.mubr.msk.f32.mxu0 %vm7672_vm0, %v10073_v39  ;;  %7193 = vmatpush3.bf16.msra.mxu0 %v7192_v26 }
 0xdea   :  { %7194 = vmatprep.subr.bf16.mxu0 %v10074_v61 }
 0xded   :  { %7196 = vmatpush3.bf16.msra.mxu0 %v7195_v11 }
 0xdee   :  { %7197 = vmatprep.subr.bf16.mxu0 %v10074_v61 }
 0xdf1   :  { %7199 = vmatpush3.bf16.msra.mxu0 %v7198_v17 }
 0xdf2   :  { %7200 = vmatprep.subr.bf16.mxu0 %v10074_v61 }
 0xdf5   :  { %7202 = vmatpush3.bf16.msra.mxu0 %v7201_v35 }
 0xdf6   :  { %7203 = vmatprep.subr.bf16.mxu0 %v10074_v61 }
 0xdf9   :  { %7205 = vmatpush3.bf16.msra.mxu0 %v7204_v53 }
 0xdfa   :  { %7206 = vmatprep.subr.bf16.mxu0 %v10074_v61 }
 0xdfd   :  { %7208 = vmatpush3.bf16.msra.mxu0 %v7207_v5 }
 0xdfe   :  { %7209 = vmatprep.subr.bf16.mxu0 %v10074_v61 }
 0xe01   :  { %7211 = vmatpush3.bf16.msra.mxu0 %v7210_v16 }
 0xe02   :  { %7212 = vmatprep.subr.bf16.mxu0 %v10074_v61 }
 0xe05   :  { %7214 = vmatpush3.bf16.msra.mxu0 %v7213_v41 }
 0xe06   :  { %7093 = vmatprep.subr.mxu0 %v10073_v39 }
 0xe41   :  { %v3314_v31 = vpop.f32.mrb[6].mxu0 }
 0xe42   :  { %v7016_v9 = vpop.f32.mrb[7].mxu0 }
 0xeb3   :  { %v3821_v47 = vpop.f32.mrb[8].mxu0 }
 0xeb4   :  { %4838 = vrot.lane.b32.xlu1 %v3821_v47, %s7674_s0  ;;  %v7021_v52 = vpop.f32.mrb[9].mxu0 }
 0xeb7   :  { %v4327_v27 = vpop.f32.mrb[10].mxu0 }
 0xeb8   :  { %4842 = vrot.lane.b32.xlu0 %v4327_v27, %s7676_s8  ;;  %v7026_v37 = vpop.f32.mrb[11].mxu0 }
 0xebb   :  { %v4833_v28 = vpop.f32.mrb[12].mxu0 }
 0xebc   :  { %4846 = vrot.lane.b32.xlu1 %v4833_v28, %s7675_s5  ;;  %v7031_v19 = vpop.f32.mrb[13].mxu0 }
 0xec0   :  { %5090 = vrot.lane.b32.xlu1 %v6891_v46, %s7674_s0 }
 0xf26   :  { %v4839_v29 = vpop.permute.xlu1 %4838 }
 0xf27   :  { %v4849_v6 = vsel %vm259_vm2, %v3314_v31, %v4839_v29  ;;  %v10077_v31 = vld [vmem:[#allocation24_spill] sm:$0xff] }
 0xf2a   :  { %v4843_v59 = vpop.permute.xlu0 %4842 }
 0xf2b   :  { %v4850_v50 = vsel %vm9986_vm6, %v4849_v6, %v4843_v59 }
 0xf2e   :  { %v4847_v10 = vpop.permute.xlu1 %4846 }
 0xf2f   :  { %v4851_v0 = vsel %vm9985_vm7, %v4850_v50, %v4847_v10 }
 0xf30   :  { %v4859_v32 = vadd.f32 %v6888_v45, %v4851_v0 }
 0xf32   :  { %v4861_v1 = vmin.f32 %v4859_v32, 0.0  ;;  %vm4860_vm9 = vcmp.gt.f32.partialorder %v4859_v32, 0.0  ;;  %v5091_v54 = vpop.permute.xlu1 %5090 }
 0xf34   :  { %v4862_v34 = vmul.f32 1.442695, %v4861_v1 }
 0xf36   :  { %7553 = vpow2.f32 %v4862_v34 }
 0xf40   :  { %v7554_v51 = vpop.eup %7553 }
 0xf41   :  { %v6889_v44 = vadd.f32 -1.0, %v7554_v51 }
 0xf43   :  { %v4865_v18 = vsel %vm4860_vm9, %v4859_v32, %v6889_v44 }
 0xf44   :  { %7065 = vmatmul.mubr.f32.vlgmr.msra.gmra.mrb[14].mxu0 %v4865_v18 }
 0xf45   :  { %7095 = vmatprep.mubr.msk.f32.mxu0 %vm7672_vm0, %v10073_v39 }
0x1017   :  { %v4956_v7 = vpop.f32.mrb[14].mxu0 }
0x1018   :  { %v4957_v48 = vadd.f32 %v6890_v14, %v4956_v7  ;;  %v7066_v2 = vpop.f32.mrb[15].mxu0 }
0x101a   :  { %5050 = vrot.lane.b32.xlu0 %v4957_v48, %s7674_s0  ;;  %7068 = vmatpush3.msra.mxu1 %v4957_v48  ;;  %v4961_v26 = vcombine.high %v4957_v48, %v4957_v48  ;;  %v4968_v9 = vrot.slane %v4957_v48, %v10077_v31 }
0x101b   :  { %7072 = vmatprep.subr.mxu1 %v10073_v39 }
0x101c   :  { %v4975_v12 = vrot.slane %v4961_v26, %v10077_v31  ;;  %v4976_v3 = vcombine.high %v4968_v9, %v4968_v9  ;;  %v4984_v63 = vrot.slane %v4968_v9, %v10077_v31 }
0x101e   :  { %v4977_v11 = vcombine.high %v4975_v12, %v4975_v12  ;;  %v4998_v8 = vrot.slane %v4976_v3, %v10077_v31  ;;  %v5006_v47 = vcombine.high %v4984_v63, %v4984_v63  ;;  %v4991_v58 = vrot.slane %v4975_v12, %v10077_v31 }
0x101f   :  { %v5013_v30 = vrot.slane %v4984_v63, %v7935_v42 }
0x1020   :  { %v5005_v17 = vrot.slane %v4977_v11, %v10077_v31  ;;  %v5008_v52 = vcombine.high %v4998_v8, %v4998_v8  ;;  %v5017_v27 = vrot.slane %v4998_v8, %v7935_v42  ;;  %v5021_v35 = vrot.slane %v5006_v47, %v7935_v42 }
0x1021   :  { %v5007_v37 = vcombine.high %v4991_v58, %v4991_v58  ;;  %v5029_v53 = vrot.slane %v4991_v58, %v7935_v42 }
0x1022   :  { %v5009_v15 = vcombine.high %v5005_v17, %v5005_v17  ;;  %v5025_v55 = vrot.slane %v5008_v52, %v7935_v42  ;;  %v5033_v25 = vrot.slane %v5005_v17, %v7935_v42 }
0x1023   :  { %v5037_v10 = vrot.slane %v5007_v37, %v7935_v42 }
0x1024   :  { %v5041_v56 = vrot.slane %v5009_v15, %v7935_v42 }
0x108c   :  { %v5051_v60 = vpop.permute.xlu0 %5050 }
0x108d   :  { %v5054_v28 = vadd.f32 %v5051_v60, %v5017_v27  ;;  %v5053_v19 = vadd.f32 %v5051_v60, %v5013_v30  ;;  %v5056_v5 = vadd.f32 %v5051_v60, %v5025_v55  ;;  %v5055_v24 = vadd.f32 %v5051_v60, %v5021_v35 }
0x108e   :  { %v5058_v13 = vadd.f32 %v5051_v60, %v5033_v25  ;;  %v5057_v16 = vadd.f32 %v5051_v60, %v5029_v53  ;;  %v5060_v1 = vadd.f32 %v5051_v60, %v5041_v56  ;;  %v5059_v18 = vadd.f32 %v5051_v60, %v5037_v10  ;;  %v10078_v56 = vld [vmem:[#allocation26_spill] sm:$0xff] }
0x108f   :  { %vm5062_vm10 = vcmp.gt.f32.partialorder %v5054_v28, 0.0  ;;  %v5070_v41 = vmul.f32 0.2, %v5054_v28  ;;  %vm5061_vm8 = vcmp.gt.f32.partialorder %v5053_v19, 0.0  ;;  %v5069_v29 = vmul.f32 0.2, %v5053_v19 }
0x1090   :  { %vm5064_vm1 = vcmp.gt.f32.partialorder %v5056_v5, 0.0  ;;  %v5072_v59 = vmul.f32 0.2, %v5056_v5  ;;  %vm5063_vm9 = vcmp.gt.f32.partialorder %v5055_v24, 0.0  ;;  %v5071_v6 = vmul.f32 0.2, %v5055_v24 }
0x1091   :  { %v5078_v45 = vsel %vm5062_vm10, %v5054_v28, %v5070_v41  ;;  %v5077_v50 = vsel %vm5061_vm8, %v5053_v19, %v5069_v29  ;;  %v5074_v44 = vmul.f32 0.2, %v5058_v13  ;;  %vm5066_vm7 = vcmp.gt.f32.partialorder %v5058_v13, 0.0  ;;  %v10079_v41 = vld [vmem:[#allocation33_spill] sm:$0xff] }
0x1092   :  { %v5094_v0 = vmul.f32 %v5091_v54, %v5078_v45  ;;  %v5093_v32 = vmul.f32 %v5091_v54, %v5077_v50  ;;  %v5080_v34 = vsel %vm5064_vm1, %v5056_v5, %v5072_v59  ;;  %v5079_v51 = vsel %vm5063_vm9, %v5055_v24, %v5071_v6  ;;  %v10080_v6 = vld [vmem:[#allocation27_spill] sm:$0xff] }
0x1093   :  { %vm5065_vm6 = vcmp.gt.f32.partialorder %v5057_v16, 0.0  ;;  %v5073_v46 = vmul.f32 0.2, %v5057_v16  ;;  %v5096_v14 = vmul.f32 %v5091_v54, %v5080_v34  ;;  %v5095_v7 = vmul.f32 %v5091_v54, %v5079_v51 }
0x1094   :  { %5111 = vrot.lane.b32.xlu1 %v5094_v0, %s7675_s5  ;;  %5109 = vrot.lane.b32.xlu0 %v5093_v32, %s7675_s5  ;;  %v5082_v48 = vsel %vm5066_vm7, %v5058_v13, %v5074_v44  ;;  %v5076_v26 = vmul.f32 0.2, %v5060_v1  ;;  %v5075_v9 = vmul.f32 0.2, %v5059_v18  ;;  %vm5068_vm10 = vcmp.gt.f32.partialorder %v5060_v1, 0.0  ;;  %v10081_v0 = vld [vmem:[#allocation29_spill] sm:$0xff] }
0x1095   :  { %v5081_v2 = vsel %vm5065_vm6, %v5057_v16, %v5073_v46  ;;  %vm5067_vm8 = vcmp.gt.f32.partialorder %v5059_v18, 0.0  ;;  %v5098_v12 = vmul.f32 %v5091_v54, %v5082_v48  ;;  %vm5682_vm6 = vcmask 1041408  }
0x1096   :  { %v5097_v3 = vmul.f32 %v5091_v54, %v5081_v2  ;;  %v5084_v11 = vsel %vm5068_vm10, %v5060_v1, %v5076_v26  ;;  %v5083_v63 = vsel %vm5067_vm8, %v5059_v18, %v5075_v9  ;;  %v10082_v1 = vld [vmem:[#allocation28_spill] sm:$0xff]  ;;  %v10083_v18 = vld [vmem:[#allocation31_spill] sm:$0xff] }
0x1097   :  { %v5100_v8 = vmul.f32 %v5091_v54, %v5084_v11  ;;  %v5099_v17 = vmul.f32 %v5091_v54, %v5083_v63  ;;  %v10085_v2 = vld [vmem:[#allocation32_spill] sm:$0xff] }
0x1098   :  { %5115 = vrot.lane.b32.xlu1 %v5096_v14, %s7675_s5  ;;  %5113 = vrot.lane.b32.xlu0 %v5095_v7, %s7675_s5  ;;  %v10084_v14 = vld [vmem:[#allocation30_spill] sm:$0xff] }
0x109c   :  { %5119 = vrot.lane.b32.xlu1 %v5098_v12, %s7675_s5  ;;  %5117 = vrot.lane.b32.xlu0 %v5097_v3, %s7675_s5 }
0x10a0   :  { %5123 = vrot.lane.b32.xlu1 %v5100_v8, %s7675_s5  ;;  %5121 = vrot.lane.b32.xlu0 %v5099_v17, %s7675_s5 }
0x1106   :  { %v5112_v47 = vpop.permute.xlu1 %5111  ;;  %v5110_v52 = vpop.permute.xlu0 %5109 }
0x1107   :  { %v5136_v58 = vsel %vm259_vm2, %v5112_v47, 0.0  ;;  %v5133_v15 = vsel %vm259_vm2, %v5110_v52, 0.0 }
0x1108   :  { %5137 = vadd.xlane.f32.xlu1 %v5136_v58  ;;  %5134 = vadd.xlane.f32.xlu0 %v5133_v15 }
0x110a   :  { %v5116_v30 = vpop.permute.xlu1 %5115  ;;  %v5114_v27 = vpop.permute.xlu0 %5113 }
0x110b   :  { %v5139_v35 = vsel %vm259_vm2, %v5114_v27, 0.0  ;;  %v5142_v53 = vsel %vm259_vm2, %v5116_v30, 0.0 }
0x110c   :  { %5140 = vadd.xlane.f32.xlu0 %v5139_v35 }
0x110e   :  { %v5120_v55 = vpop.permute.xlu1 %5119  ;;  %v5118_v37 = vpop.permute.xlu0 %5117 }
0x110f   :  { %v5145_v60 = vsel %vm259_vm2, %v5118_v37, 0.0  ;;  %v5148_v28 = vsel %vm259_vm2, %v5120_v55, 0.0 }
0x1110   :  { %5143 = vadd.xlane.f32.xlu0 %v5142_v53  ;;  %5146 = vadd.xlane.f32.xlu1 %v5145_v60 }
0x1112   :  { %v5122_v25 = vpop.permute.xlu0 %5121  ;;  %v5124_v5 = vpop.permute.xlu1 %5123 }
0x1113   :  { %v5151_v19 = vsel %vm259_vm2, %v5122_v25, 0.0  ;;  %v5154_v24 = vsel %vm259_vm2, %v5124_v5, 0.0 }
0x1114   :  { %5149 = vadd.xlane.f32.xlu0 %v5148_v28  ;;  %5152 = vadd.xlane.f32.xlu1 %v5151_v19 }
0x1118   :  { %5155 = vadd.xlane.f32.xlu0 %v5154_v24 }
0x1195   :  { %v5138_v13 = vpop.xlane.xlu1 %5137  ;;  %v5135_v16 = vpop.xlane.xlu0 %5134 }
0x1196   :  { %v5158_v54 = vadd.f32 %v5138_v13, %v10078_v56  ;;  %v5157_v29 = vadd.f32 %v5135_v16, %v10079_v41 }
0x1198   :  { %5177 = vperm.xlu0 %7293, %v5158_v54   ;;  %5174 = vperm.xlu1 %7294, %v5157_v29  }
0x1199   :  { %v5141_v59 = vpop.xlane.xlu0 %5140 }
0x119a   :  { %v5159_v45 = vadd.f32 %v5141_v59, %v10080_v6 }
0x119c   :  { %5180 = vperm.xlu1 %7294, %v5159_v45  }
0x119d   :  { %v5147_v50 = vpop.xlane.xlu1 %5146  ;;  %v5144_v10 = vpop.xlane.xlu0 %5143 }
0x119e   :  { %v5161_v32 = vadd.f32 %v5147_v50, %v10081_v0  ;;  %v5160_v34 = vadd.f32 %v5144_v10, %v10082_v1 }
0x11a0   :  { %5186 = vperm.xlu0 %7293, %v5161_v32   ;;  %5183 = vperm.xlu1 %7294, %v5160_v34  }
0x11a1   :  { %v5153_v51 = vpop.xlane.xlu1 %5152  ;;  %v5150_v44 = vpop.xlane.xlu0 %5149 }
0x11a2   :  { %v5163_v46 = vadd.f32 %v5153_v51, %v10083_v18  ;;  %v5162_v7 = vadd.f32 %v5150_v44, %v10084_v14 }
0x11a4   :  { %5192 = vperm.xlu0 %7293, %v5163_v46   ;;  %5189 = vperm.xlu1 %7294, %v5162_v7  }
0x11a5   :  { %v5156_v48 = vpop.xlane.xlu0 %5155 }
0x11a6   :  { %v9636_v26 = vadd.f32 %v5156_v48, %v10085_v2 }
0x11a8   :  { %5195 = vperm.xlu1 %7294, %v9636_v26  }
0x1217   :  { %v5175_v9 = vpop.permute.xlu1 %5174  ;;  %v5178_v12 = vpop.permute.xlu0 %5177 }
0x1218   :  { %v5200_v11 = vrot.slane %v5175_v9, %v8235_v4  ;;  %v5204_v63 = vrot.slane %v5178_v12, %v8235_v4 }
0x121a   :  { %v5229_v52 = vsel %vm631_vm11, %v5204_v63, %v5200_v11 }
0x121b   :  { %v5181_v3 = vpop.permute.xlu1 %5180 }
0x121c   :  { %v5208_v8 = vrot.slane %v5181_v3, %v8235_v4 }
0x121e   :  { %v5230_v15 = vsel %vm633_vm12, %v5208_v8, %v5229_v52 }
0x121f   :  { %v5184_v17 = vpop.permute.xlu1 %5183  ;;  %v5187_v47 = vpop.permute.xlu0 %5186 }
0x1220   :  { %v5212_v58 = vrot.slane %v5184_v17, %v8235_v4  ;;  %v5216_v30 = vrot.slane %v5187_v47, %v8235_v4 }
0x1222   :  { %v5231_v27 = vsel %vm635_vm13, %v5212_v58, %v5230_v15 }
0x1223   :  { %v5190_v35 = vpop.permute.xlu1 %5189  ;;  %v5193_v55 = vpop.permute.xlu0 %5192  ;;  %v5232_v53 = vsel %vm637_vm14, %v5216_v30, %v5231_v27 }
0x1224   :  { %v5220_v37 = vrot.slane %v5190_v35, %v8235_v4  ;;  %v5224_v60 = vrot.slane %v5193_v55, %v8235_v4  ;;  %v10087_v35 = vld [vmem:[#allocation49_spill] sm:$0xff] }
0x1226   :  { %v5233_v25 = vsel %vm639_vm15, %v5220_v37, %v5232_v53  ;;  %v10088_v37 = vld [vmem:[#allocation50_spill] sm:$0xff] }
0x1227   :  { %v5196_v28 = vpop.permute.xlu1 %5195  ;;  %v5234_v5 = vsel %vm641_vm3, %v5224_v60, %v5233_v25 }
0x1228   :  { %v5228_v19 = vrot.slane %v5196_v28, %v8235_v4 }
0x122a   :  { %v5235_v24 = vsel %vm643_vm4, %v5228_v19, %v5234_v5 }
0x122b   :  { %v5237_v13 = vsel %vm646_vm5, %v5235_v24, -inf }
0x122c   :  { %5238 = vmax.xlane.f32.xlu0 %v5237_v13 }
0x12b9   :  { %v5239_v16 = vpop.xlane.xlu0 %5238 }
0x12ba   :  { %v5244_v56 = vrot.slane %v5239_v16, %v7935_v42  ;;  %v5248_v41 = vrot.slane %v5239_v16, %v7897_v21  ;;  %v5252_v59 = vrot.slane %v5239_v16, %v7903_v23  ;;  %v5256_v10 = vrot.slane %v5239_v16, %v7900_v22 }
0x12bb   :  { %v5260_v44 = vrot.slane %v5239_v16, %v7923_v36  ;;  %v5264_v48 = vrot.slane %v5239_v16, %v7927_v38  ;;  %v5272_v63 = vrot.slane %v5239_v16, %v7938_v43 }
0x12bc   :  { %v5281_v6 = vsub.f32 %v5157_v29, %v5244_v56  ;;  %v5282_v50 = vsub.f32 %v5158_v54, %v5248_v41  ;;  %v5283_v51 = vsub.f32 %v5159_v45, %v5252_v59  ;;  %v5284_v14 = vsub.f32 %v5160_v34, %v5256_v10 }
0x12bd   :  { %v5285_v9 = vsub.f32 %v5161_v32, %v5260_v44  ;;  %v5268_v29 = vrot.slane %v5239_v16, %v7931_v40  ;;  %v5286_v3 = vsub.f32 %v5162_v7, %v5264_v48  ;;  %v5288_v7 = vsub.f32 %v9636_v26, %v5272_v63 }
0x12be   :  { %v5289_v0 = vmul.f32 1.442695, %v5281_v6  ;;  %v5291_v1 = vmul.f32 1.442695, %v5282_v50  ;;  %v5293_v18 = vmul.f32 1.442695, %v5283_v51 }
0x12bf   :  { %v5295_v2 = vmul.f32 1.442695, %v5284_v14  ;;  %v5297_v54 = vmul.f32 1.442695, %v5285_v9  ;;  %v5299_v34 = vmul.f32 1.442695, %v5286_v3  ;;  %v5287_v8 = vsub.f32 %v5163_v46, %v5268_v29 }
0x12c0   :  { %7555 = vpow2.f32 %v5289_v0  ;;  %v5303_v58 = vmul.f32 1.442695, %v5288_v7 }
0x12c1   :  { %7557 = vpow2.f32 %v5291_v1  ;;  %v5301_v47 = vmul.f32 1.442695, %v5287_v8 }
0x12c2   :  { %7559 = vpow2.f32 %v5293_v18 }
0x12c3   :  { %7561 = vpow2.f32 %v5295_v2 }
0x12c4   :  { %7563 = vpow2.f32 %v5297_v54 }
0x12c5   :  { %7565 = vpow2.f32 %v5299_v34 }
0x12c6   :  { %7567 = vpow2.f32 %v5301_v47 }
0x12c7   :  { %7569 = vpow2.f32 %v5303_v58 }
0x12ca   :  { %v7556_v12 = vpop.eup %7555 }
0x12cb   :  { %v9663_v11 = vmul.f32 %v7556_v12, %v10059_v20  ;;  %v7558_v45 = vpop.eup %7557 }
0x12cc   :  { %v9668_v17 = vmul.f32 %v7558_v45, %v10060_v49  ;;  %v7560_v32 = vpop.eup %7559 }
0x12cd   :  { %5322 = vperm.xlu1 %7294, %v9663_v11   ;;  %v9673_v20 = vmul.f32 %v7560_v32, %v10061_v62  ;;  %v7562_v52 = vpop.eup %7561  ;;  %v10086_v62 = vld [vmem:[#allocation48_spill] sm:$0xff] }
0x12ce   :  { %v9677_v46 = vmul.f32 %v7562_v52, %v10063_v57  ;;  %v7564_v49 = vpop.eup %7563 }
0x12cf   :  { %v9681_v15 = vmul.f32 %v7564_v49, %v10062_v33  ;;  %v7566_v30 = vpop.eup %7565 }
0x12d0   :  { %v9685_v26 = vmul.f32 %v7566_v30, %v10086_v62  ;;  %v7568_v27 = vpop.eup %7567 }
0x12d1   :  { %5325 = vperm.xlu1 %7294, %v9668_v17   ;;  %v9689_v55 = vmul.f32 %v7568_v27, %v10087_v35  ;;  %v7570_v57 = vpop.eup %7569 }
0x12d2   :  { %v5312_v53 = vmul.f32 %v7570_v57, %v10088_v37 }
0x12d5   :  { %5328 = vperm.xlu1 %7294, %v9673_v20  }
0x12d9   :  { %5331 = vperm.xlu1 %7294, %v9677_v46  }
0x12dd   :  { %5334 = vperm.xlu1 %7294, %v9681_v15  }
0x12e1   :  { %5337 = vperm.xlu1 %7294, %v9685_v26  }
0x12e5   :  { %5340 = vperm.xlu1 %7294, %v9689_v55  }
0x12e9   :  { %5343 = vperm.xlu1 %7294, %v5312_v53  }
0x134c   :  { %v5323_v33 = vpop.permute.xlu1 %5322 }
0x134d   :  { %v5348_v16 = vrot.slane %v5323_v33, %v8235_v4 }
0x1350   :  { %v5326_v60 = vpop.permute.xlu1 %5325 }
0x1351   :  { %v5352_v24 = vrot.slane %v5326_v60, %v8235_v4 }
0x1353   :  { %v5377_v6 = vsel %vm631_vm11, %v5352_v24, %v5348_v16 }
0x1354   :  { %v5329_v25 = vpop.permute.xlu1 %5328 }
0x1355   :  { %v5356_v13 = vrot.slane %v5329_v25, %v8235_v4 }
0x1357   :  { %v5378_v10 = vsel %vm633_vm12, %v5356_v13, %v5377_v6 }
0x1358   :  { %v5332_v28 = vpop.permute.xlu1 %5331 }
0x1359   :  { %v5360_v56 = vrot.slane %v5332_v28, %v8235_v4 }
0x135b   :  { %v5379_v1 = vsel %vm635_vm13, %v5360_v56, %v5378_v10 }
0x135c   :  { %v5335_v19 = vpop.permute.xlu1 %5334 }
0x135d   :  { %v5364_v41 = vrot.slane %v5335_v19, %v8235_v4 }
0x135f   :  { %v5380_v51 = vsel %vm637_vm14, %v5364_v41, %v5379_v1 }
0x1360   :  { %v5338_v5 = vpop.permute.xlu1 %5337 }
0x1361   :  { %v5368_v50 = vrot.slane %v5338_v5, %v8235_v4 }
0x1363   :  { %v5381_v18 = vsel %vm639_vm15, %v5368_v50, %v5380_v51 }
0x1364   :  { %v5341_v59 = vpop.permute.xlu1 %5340 }
0x1365   :  { %v5372_v0 = vrot.slane %v5341_v59, %v8235_v4 }
0x1367   :  { %v5382_v48 = vsel %vm641_vm3, %v5372_v0, %v5381_v18 }
0x1368   :  { %v5344_v44 = vpop.permute.xlu1 %5343 }
0x1369   :  { %v5376_v14 = vrot.slane %v5344_v44, %v8235_v4  ;;  %v6892_v44 = vld [vmem:[%s10089_s3] ss:$0 sm:$0xff] }
0x136b   :  { %v5383_v2 = vsel %vm643_vm4, %v5376_v14, %v5382_v48 }
0x136c   :  { %v5385_v9 = vsel %vm646_vm5, %v5383_v2, 0.0  ;;  %v5595_v2 = vld [vmem:[%s10090_s14] sm:$0x3] }
0x136d   :  { %5386 = vadd.xlane.f32.xlu0 %v5385_v9  ;;  %v5670_v9 = vld [vmem:[%s10091_s19] sm:$0x3] }
0x13fa   :  { %v5387_v12 = vpop.xlane.xlu0 %5386 }
0x13fb   :  { %v5396_v29 = vrot.slane %v5387_v12, %v7897_v21  ;;  %v5392_v54 = vrot.slane %v5387_v12, %v7935_v42  ;;  %v5420_v3 = vrot.slane %v5387_v12, %v7938_v43  ;;  %v5400_v45 = vrot.slane %v5387_v12, %v7903_v23 }
0x13fc   :  { %v5404_v63 = vrot.slane %v5387_v12, %v7900_v22  ;;  %v5408_v34 = vrot.slane %v5387_v12, %v7923_v36  ;;  %v5412_v7 = vrot.slane %v5387_v12, %v7927_v38  ;;  %v5416_v30 = vrot.slane %v5387_v12, %v7931_v40  ;;  %v5669_v12 = vld [vmem:[%s10092_s24] sm:$0x3f] }
0x13fd   :  { %7571 = vrcp.f32 %v5396_v29  ;;  %v5760_v29 = vld [vmem:[%s10093_s30] sm:$0xff] }
0x13fe   :  { %7573 = vrcp.f32 %v5392_v54  ;;  %v5761_v54 = vld [vmem:[%s10093_s30 + $0x8] sm:$0xff] }
0x13ff   :  { %7575 = vrcp.f32 %v5420_v3  ;;  %v7216_v3 = vpack.c.bf16 %v5761_v54, %v5760_v29 }
0x1400   :  { %7577 = vrcp.f32 %v5400_v45  ;;  %v5762_v45 = vld [vmem:[%s10093_s30 + $0x10] sm:$0xff] }
0x1401   :  { %7579 = vrcp.f32 %v5404_v63  ;;  %v5763_v63 = vld [vmem:[%s10093_s30 + $0x18] sm:$0xff] }
0x1402   :  { %7581 = vrcp.f32 %v5408_v34  ;;  %v7219_v34 = vpack.c.bf16 %v5763_v63, %v5762_v45  ;;  %v5757_v63 = vld [vmem:[%s10097_s27] sm:$0x3f] }
0x1403   :  { %7583 = vrcp.f32 %v5412_v7 }
0x1404   :  { %7585 = vrcp.f32 %v5416_v30  ;;  %v6898_v30 = vld [vmem:[%s10096_s20] ss:$0 sm:$0xff] }
0x1407   :  { %v7572_v8 = vpop.eup %7571 }
0x1408   :  { %v7574_v32 = vpop.eup %7573  ;;  %v5432_v47 = vmul.f32 %v7572_v8, %v9668_v17 }
0x1409   :  { %v7576_v52 = vpop.eup %7575  ;;  %v5430_v43 = vmul.f32 %v7574_v32, %v9663_v11 }
0x140a   :  { %v7578_v58 = vpop.eup %7577  ;;  %5464 = vperm.xlu0 %7293, %v5432_v47   ;;  %v5444_v49 = vmul.f32 %v7576_v52, %v5312_v53  ;;  %v6895_v47 = vld [vmem:[%s10094_s6] ss:$0 sm:$0xff] }
0x140b   :  { %5461 = vperm.xlu1 %7294, %v5430_v43   ;;  %v5434_v62 = vmul.f32 %v7578_v58, %v9673_v20  ;;  %v7580_v27 = vpop.eup %7579 }
0x140c   :  { %v5436_v17 = vmul.f32 %v7580_v27, %v9677_v46  ;;  %v7582_v35 = vpop.eup %7581 }
0x140d   :  { %v5438_v57 = vmul.f32 %v7582_v35, %v9681_v15  ;;  %v7584_v11 = vpop.eup %7583 }
0x140e   :  { %5482 = vperm.xlu0 %7293, %v5444_v49   ;;  %v5440_v37 = vmul.f32 %v7584_v11, %v9685_v26  ;;  %v7586_v53 = vpop.eup %7585  ;;  %v6900_v49 = vld [vmem:[%s10095_s12] ss:$0 sm:$0xff] }
0x140f   :  { %5467 = vperm.xlu1 %7294, %v5434_v62   ;;  %v5442_v40 = vmul.f32 %v7586_v53, %v9689_v55 }
0x1412   :  { %5954 = vrot.lane.b32.xlu0 %v6900_v49, %s7674_s0 }
0x1413   :  { %5470 = vperm.xlu1 %7294, %v5436_v17  }
0x1417   :  { %5473 = vperm.xlu1 %7294, %v5438_v57  }
0x141b   :  { %5476 = vperm.xlu1 %7294, %v5440_v37  }
0x141f   :  { %5479 = vperm.xlu1 %7294, %v5442_v40  }
0x1489   :  { %v5465_v25 = vpop.permute.xlu0 %5464 }
0x148a   :  { %v5462_v20 = vpop.permute.xlu1 %5461  ;;  %v5491_v46 = vrot.slane %v5465_v25, %v8235_v4 }
0x148b   :  { %v5487_v19 = vrot.slane %v5462_v20, %v8235_v4 }
0x148d   :  { %v5516_v55 = vsel %vm631_vm11, %v5491_v46, %v5487_v19  ;;  %v5483_v16 = vpop.permute.xlu0 %5482 }
0x148e   :  { %v5468_v33 = vpop.permute.xlu1 %5467  ;;  %v5515_v10 = vrot.slane %v5483_v16, %v8235_v4 }
0x148f   :  { %v5495_v15 = vrot.slane %v5468_v33, %v8235_v4 }
0x1491   :  { %v5517_v56 = vsel %vm633_vm12, %v5495_v15, %v5516_v55 }
0x1492   :  { %v5471_v60 = vpop.permute.xlu1 %5470 }
0x1493   :  { %v5499_v5 = vrot.slane %v5471_v60, %v8235_v4 }
0x1495   :  { %v5518_v41 = vsel %vm635_vm13, %v5499_v5, %v5517_v56 }
0x1496   :  { %v5474_v28 = vpop.permute.xlu1 %5473 }
0x1497   :  { %v5503_v26 = vrot.slane %v5474_v28, %v8235_v4 }
0x1499   :  { %v5519_v6 = vsel %vm637_vm14, %v5503_v26, %v5518_v41 }
0x149a   :  { %v5477_v24 = vpop.permute.xlu1 %5476 }
0x149b   :  { %v5507_v13 = vrot.slane %v5477_v24, %v8235_v4 }
0x149d   :  { %v5520_v0 = vsel %vm639_vm15, %v5507_v13, %v5519_v6 }
0x149e   :  { %v5480_v59 = vpop.permute.xlu1 %5479 }
0x149f   :  { %v5511_v50 = vrot.slane %v5480_v59, %v8235_v4 }
0x14a1   :  { %v5521_v1 = vsel %vm641_vm3, %v5511_v50, %v5520_v0  ;;  %vm5678_vm3 = vcmask 15360  }
0x14a2   :  { %v5522_v51 = vsel %vm643_vm4, %v5515_v10, %v5521_v1  ;;  %vm6386_vm4 = vcmask 1045504  }
0x14a3   :  { %7070 = vmatmul.mubr.msk.f32.vlgmr.msra.gmra.mrb[8].mxu1 %vm646_vm5, %v5522_v51 }
0x14a4   :  { %7074 = vmatprep.mubr.msk.f32.mxu1 %vm7672_vm0, %v10073_v39 }
0x1576   :  { %v5591_v18 = vpop.f32.mrb[8].mxu1 }
0x1577   :  { %v5592_v14 = vadd.f32 %v6892_v44, %v5591_v18  ;;  %v7071_v48 = vpop.f32.mrb[9].mxu1 }
0x1579   :  { %7073 = vmatpush3.msra.mxu1 %v5592_v14 }
0x157a   :  { %7075 = vmatmul.mubr.msk.f32.vlgmr.msra.gmra.mrb[10].mxu1 %vm646_vm5, %v5595_v2  ;;  %7077 = vmatprep.subr.mxu1 %v10073_v39 }
0x157b   :  { %7078 = vmatpush3.msk.msra.mxu1 %vm5682_vm6, %v5670_v9  ;;  %7079 = vmatprep.mubr.msk.f32.mxu1 %vm7672_vm0, %v10073_v39 }
0x157c   :  { %7215 = vmatprep.subr.bf16.mxu1 %v10074_v61 }
0x157e   :  { %7080 = vmatmul.mubr.msk.f32.vlgmr.msra.gmra.mrb[12].mxu1 %vm5678_vm3, %v5669_v12 }
0x157f   :  { %7090 = vmatprep.mubr.msk.f32.mxu1 %vm7672_vm0, %v10073_v39  ;;  %7217 = vmatpush3.bf16.msra.mxu1 %v7216_v3 }
0x1580   :  { %7218 = vmatprep.subr.bf16.mxu1 %v10074_v61 }
0x1583   :  { %7220 = vmatpush3.bf16.msra.mxu1 %v7219_v34 }
0x1584   :  { %7098 = vmatprep.subr.mxu1 %v10073_v39 }
0x164d   :  { %v9761_v8 = vpop.f32.mrb[10].mxu1 }
0x164e   :  { %v7076_v32 = vpop.f32.mrb[11].mxu1 }
0x1651   :  { %v5752_v7 = vpop.f32.mrb[12].mxu1 }
0x1652   :  { %v5753_v52 = vadd.f32 %v6895_v47, %v5752_v7  ;;  %v7081_v43 = vpop.f32.mrb[13].mxu1  ;;  %v6017_v47 = vrot.slane %v5757_v63, %v7897_v21  ;;  %v6010_v7 = vrot.slane %v5757_v63, %v7935_v42 }
0x1653   :  { %v6031_v43 = vrot.slane %v5757_v63, %v7900_v22 }
0x1654   :  { %v5756_v58 = vmax.f32 %v5753_v52, 0.0  ;;  %v6024_v52 = vrot.slane %v5757_v63, %v7903_v23 }
0x1656   :  { %7091 = vmatmul.mubr.msk.f32.vlgmr.msra.gmra.mrb[14].mxu1 %vm259_vm2, %v5756_v58 }
0x1657   :  { %7100 = vmatprep.mubr.msk.f32.mxu1 %vm7672_vm0, %v10073_v39 }
0x1729   :  { %v5840_v62 = vpop.f32.mrb[14].mxu1 }
0x172a   :  { %v5841_v27 = vadd.f32 %v6898_v30, %v5840_v62  ;;  %v7092_v17 = vpop.f32.mrb[15].mxu1 }
0x172c   :  { %5922 = vrot.lane.b32.xlu1 %v5841_v27, %s7674_s0  ;;  %7094 = vmatpush3.msk.msra.mxu0 %vm6386_vm4, %v5841_v27  ;;  %v5852_v35 = vrot.slane %v5841_v27, %v10077_v31  ;;  %v5845_v57 = vcombine.high %v5841_v27, %v5841_v27  ;;  %vm5987_vm4 = vcmask 259072  }
0x172d   :  { %7221 = vmatprep.subr.bf16.mxu0 %v10074_v61 }
0x172e   :  { %v5860_v11 = vcombine.high %v5852_v35, %v5852_v35  ;;  %v5859_v37 = vrot.slane %v5845_v57, %v10077_v31  ;;  %v5868_v53 = vrot.slane %v5852_v35, %v10077_v31 }
0x1730   :  { %v5882_v40 = vrot.slane %v5860_v11, %v10077_v31  ;;  %v5861_v20 = vcombine.high %v5859_v37, %v5859_v37  ;;  %v5890_v33 = vcombine.high %v5868_v53, %v5868_v53  ;;  %v5875_v25 = vrot.slane %v5859_v37, %v10077_v31 }
0x1731   :  { %v5895_v46 = vrot.slane %v5868_v53, %v7935_v42 }
0x1732   :  { %v5891_v60 = vcombine.high %v5882_v40, %v5882_v40  ;;  %v5889_v28 = vrot.slane %v5861_v20, %v10077_v31  ;;  %v5899_v19 = vrot.slane %v5882_v40, %v7935_v42  ;;  %v5903_v15 = vrot.slane %v5890_v33, %v7935_v42  ;;  %v5955_v31 = vpop.permute.xlu0 %5954 }
0x1733   :  { %v5911_v26 = vrot.slane %v5875_v25, %v7935_v42  ;;  %v6038_v20 = vrot.slane %v5757_v63, %v7923_v36  ;;  %v6045_v33 = vrot.slane %v5757_v63, %v7927_v38 }
0x1734   :  { %v5907_v5 = vrot.slane %v5891_v60, %v7935_v42  ;;  %v5915_v55 = vrot.slane %v5889_v28, %v7935_v42 }
0x179e   :  { %v5923_v24 = vpop.permute.xlu1 %5922 }
0x179f   :  { %v5925_v13 = vadd.f32 %v5923_v24, %v5895_v46  ;;  %v5926_v16 = vadd.f32 %v5923_v24, %v5899_v19  ;;  %v5927_v56 = vadd.f32 %v5923_v24, %v5903_v15  ;;  %v5928_v41 = vadd.f32 %v5923_v24, %v5907_v5 }
0x17a0   :  { %v5929_v59 = vadd.f32 %v5923_v24, %v5911_v26  ;;  %v5930_v6 = vadd.f32 %v5923_v24, %v5915_v55 }
0x17a1   :  { %vm5931_vm5 = vcmp.gt.f32.partialorder %v5925_v13, 0.0  ;;  %v5937_v50 = vmul.f32 0.2, %v5925_v13  ;;  %vm5932_vm7 = vcmp.gt.f32.partialorder %v5926_v16, 0.0  ;;  %v5938_v10 = vmul.f32 0.2, %v5926_v16 }
0x17a2   :  { %vm5933_vm1 = vcmp.gt.f32.partialorder %v5927_v56, 0.0  ;;  %v5939_v0 = vmul.f32 0.2, %v5927_v56  ;;  %vm5934_vm9 = vcmp.gt.f32.partialorder %v5928_v41, 0.0  ;;  %v5940_v1 = vmul.f32 0.2, %v5928_v41 }
0x17a3   :  { %v5943_v51 = vsel %vm5931_vm5, %v5925_v13, %v5937_v50  ;;  %v5944_v44 = vsel %vm5932_vm7, %v5926_v16, %v5938_v10  ;;  %v5941_v9 = vmul.f32 0.2, %v5929_v59  ;;  %vm5935_vm10 = vcmp.gt.f32.partialorder %v5929_v59, 0.0  ;;  %v5758_v10 = vld [vmem:[%s10098_s4] sm:$0x3f] }
0x17a4   :  { %v5957_v18 = vmul.f32 %v5955_v31, %v5943_v51  ;;  %v5958_v14 = vmul.f32 %v5955_v31, %v5944_v44  ;;  %v5945_v48 = vsel %vm5933_vm1, %v5927_v56, %v5939_v0  ;;  %v5946_v2 = vsel %vm5934_vm9, %v5928_v41, %v5940_v1 }
0x17a5   :  { %vm5936_vm8 = vcmp.gt.f32.partialorder %v5930_v6, 0.0  ;;  %v5942_v12 = vmul.f32 0.2, %v5930_v6  ;;  %v5959_v29 = vmul.f32 %v5955_v31, %v5945_v48  ;;  %v5960_v54 = vmul.f32 %v5955_v31, %v5946_v2 }
0x17a6   :  { %5969 = vrot.lane.b32.xlu1 %v5957_v18, %s7675_s5  ;;  %5971 = vrot.lane.b32.xlu0 %v5958_v14, %s7675_s5  ;;  %v5947_v3 = vsel %vm5935_vm10, %v5929_v59, %v5941_v9  ;;  %v6172_v0 = vrot.slane %v5758_v10, %v7935_v42  ;;  %v6179_v1 = vrot.slane %v5758_v10, %v7897_v21  ;;  %vm6115_vm5 = vcmask 46080  }
0x17a7   :  { %v5948_v45 = vsel %vm5936_vm8, %v5930_v6, %v5942_v12  ;;  %v5961_v34 = vmul.f32 %v5955_v31, %v5947_v3  ;;  %v6186_v51 = vrot.slane %v5758_v10, %v7903_v23  ;;  %v6193_v44 = vrot.slane %v5758_v10, %v7900_v22 }
0x17a8   :  { %v5962_v32 = vmul.f32 %v5955_v31, %v5948_v45  ;;  %v6200_v18 = vrot.slane %v5758_v10, %v7923_v36  ;;  %v6207_v14 = vrot.slane %v5758_v10, %v7927_v38 }
0x17aa   :  { %5973 = vrot.lane.b32.xlu1 %v5959_v29, %s7675_s5  ;;  %5975 = vrot.lane.b32.xlu0 %v5960_v54, %s7675_s5 }
0x17ae   :  { %5977 = vrot.lane.b32.xlu1 %v5961_v34, %s7675_s5  ;;  %5979 = vrot.lane.b32.xlu0 %v5962_v32, %s7675_s5 }
0x17b2   :  { %6019 = vbcast.lane.b32.xlu1 %v6017_v47, 256  ;;  %6012 = vbcast.lane.b32.xlu0 %v6010_v7, 256 }
0x17b6   :  { %6026 = vbcast.lane.b32.xlu1 %v6024_v52, 256  ;;  %6033 = vbcast.lane.b32.xlu0 %v6031_v43, 256 }
0x1818   :  { %v5970_v58 = vpop.permute.xlu1 %5969  ;;  %v5972_v49 = vpop.permute.xlu0 %5971 }
0x1819   :  { %v5988_v30 = vsel %vm5987_vm4, %v5970_v58, 0.0  ;;  %v5991_v62 = vsel %vm5987_vm4, %v5972_v49, 0.0 }
0x181a   :  { %5989 = vadd.xlane.f32.xlu1 %v5988_v30  ;;  %5992 = vadd.xlane.f32.xlu0 %v5991_v62 }
0x181c   :  { %v5974_v27 = vpop.permute.xlu1 %5973  ;;  %v5976_v17 = vpop.permute.xlu0 %5975 }
0x181d   :  { %v5994_v35 = vsel %vm5987_vm4, %v5974_v27, 0.0  ;;  %v5997_v57 = vsel %vm5987_vm4, %v5976_v17, 0.0 }
0x181e   :  { %5998 = vadd.xlane.f32.xlu1 %v5997_v57  ;;  %5995 = vadd.xlane.f32.xlu0 %v5994_v35 }
0x1820   :  { %v5978_v11 = vpop.permute.xlu1 %5977  ;;  %v5980_v37 = vpop.permute.xlu0 %5979 }
0x1821   :  { %v6000_v53 = vsel %vm5987_vm4, %v5978_v11, 0.0  ;;  %v6003_v40 = vsel %vm5987_vm4, %v5980_v37, 0.0 }
0x1822   :  { %6001 = vadd.xlane.f32.xlu0 %v6000_v53  ;;  %6004 = vadd.xlane.f32.xlu1 %v6003_v40 }
0x1824   :  { %v6020_v60 = vpop.permute.xlu1 %6019  ;;  %v6013_v25 = vpop.permute.xlu0 %6012 }
0x1828   :  { %v6027_v28 = vpop.permute.xlu1 %6026  ;;  %v6034_v46 = vpop.permute.xlu0 %6033 }
0x1833   :  { %6040 = vbcast.lane.b32.xlu1 %v6038_v20, 256 }
0x1838   :  { %6047 = vbcast.lane.b32.xlu0 %v6045_v33, 256 }
0x18a7   :  { %v5990_v19 = vpop.xlane.xlu1 %5989  ;;  %v5993_v15 = vpop.xlane.xlu0 %5992 }
0x18a8   :  { %v6055_v5 = vadd.f32 %v6013_v25, %v5990_v19  ;;  %v6056_v24 = vadd.f32 %v6020_v60, %v5993_v15 }
0x18aa   :  { %6068 = vperm.xlu1 %7294, %v6055_v5   ;;  %6071 = vperm.xlu0 %7293, %v6056_v24  }
0x18ab   :  { %v5999_v26 = vpop.xlane.xlu1 %5998  ;;  %v5996_v55 = vpop.xlane.xlu0 %5995 }
0x18ac   :  { %v6058_v13 = vadd.f32 %v6034_v46, %v5999_v26  ;;  %v6057_v16 = vadd.f32 %v6027_v28, %v5996_v55 }
0x18ae   :  { %6077 = vperm.xlu0 %7293, %v6058_v13   ;;  %6074 = vperm.xlu1 %7294, %v6057_v16  }
0x18af   :  { %v6005_v56 = vpop.xlane.xlu1 %6004  ;;  %v6002_v41 = vpop.xlane.xlu0 %6001 }
0x18b3   :  { %v6041_v59 = vpop.permute.xlu1 %6040  ;;  %v6048_v6 = vpop.permute.xlu0 %6047 }
0x18b4   :  { %v6059_v31 = vadd.f32 %v6041_v59, %v6002_v41  ;;  %v6060_v50 = vadd.f32 %v6048_v6, %v6005_v56 }
0x18b6   :  { %6080 = vperm.xlu1 %7294, %v6059_v31   ;;  %6083 = vperm.xlu0 %7293, %v6060_v50  }
0x18ba   :  { %6174 = vbcast.lane.b32.xlu0 %v6172_v0, 256 }
0x18be   :  { %6181 = vbcast.lane.b32.xlu0 %v6179_v1, 256 }
0x18c2   :  { %6188 = vbcast.lane.b32.xlu0 %v6186_v51, 256 }
0x18c6   :  { %6195 = vbcast.lane.b32.xlu0 %v6193_v44, 256 }
0x18ca   :  { %6202 = vbcast.lane.b32.xlu0 %v6200_v18, 256 }
0x18ce   :  { %6209 = vbcast.lane.b32.xlu0 %v6207_v14, 256 }
0x1929   :  { %v6069_v48 = vpop.permute.xlu1 %6068  ;;  %v6072_v2 = vpop.permute.xlu0 %6071 }
0x192a   :  { %v6088_v12 = vrot.slane %v6069_v48, %v8235_v4  ;;  %v6092_v29 = vrot.slane %v6072_v2, %v8235_v4 }
0x192c   :  { %v6109_v45 = vsel %vm631_vm11, %v6092_v29, %v6088_v12 }
0x192d   :  { %v6075_v9 = vpop.permute.xlu1 %6074  ;;  %v6078_v3 = vpop.permute.xlu0 %6077 }
0x192e   :  { %v6096_v54 = vrot.slane %v6075_v9, %v8235_v4  ;;  %v6100_v63 = vrot.slane %v6078_v3, %v8235_v4 }
0x1930   :  { %v6110_v34 = vsel %vm633_vm12, %v6096_v54, %v6109_v45 }
0x1931   :  { %v6111_v43 = vsel %vm635_vm13, %v6100_v63, %v6110_v34 }
0x1935   :  { %v6081_v32 = vpop.permute.xlu1 %6080  ;;  %v6084_v47 = vpop.permute.xlu0 %6083 }
0x1936   :  { %v6104_v7 = vrot.slane %v6081_v32, %v8235_v4  ;;  %v6108_v52 = vrot.slane %v6084_v47, %v8235_v4 }
0x1938   :  { %v6112_v58 = vsel %vm637_vm14, %v6104_v7, %v6111_v43 }
0x1939   :  { %v6113_v49 = vsel %vm639_vm15, %v6108_v52, %v6112_v58  ;;  %v6175_v27 = vpop.permute.xlu0 %6174 }
0x193a   :  { %v6116_v30 = vsel %vm6115_vm5, %v6113_v49, -inf }
0x193b   :  { %6117 = vmax.xlane.f32.xlu1 %v6116_v30 }
0x193d   :  { %v6182_v46 = vpop.permute.xlu0 %6181 }
0x1941   :  { %v6189_v55 = vpop.permute.xlu0 %6188 }
0x1945   :  { %v6196_v6 = vpop.permute.xlu0 %6195 }
0x19c8   :  { %v6118_v62 = vpop.xlane.xlu1 %6117 }
0x19c9   :  { %v6123_v17 = vrot.slane %v6118_v62, %v7935_v42  ;;  %v6127_v35 = vrot.slane %v6118_v62, %v7897_v21  ;;  %v6131_v57 = vrot.slane %v6118_v62, %v7903_v23  ;;  %v6135_v11 = vrot.slane %v6118_v62, %v7900_v22 }
0x19ca   :  { %v6139_v20 = vrot.slane %v6118_v62, %v7923_v36  ;;  %v6143_v19 = vrot.slane %v6118_v62, %v7927_v38 }
0x19cb   :  { %v6150_v37 = vsub.f32 %v6055_v5, %v6123_v17  ;;  %v6151_v53 = vsub.f32 %v6056_v24, %v6127_v35  ;;  %v6153_v40 = vsub.f32 %v6058_v13, %v6135_v11  ;;  %v6152_v25 = vsub.f32 %v6057_v16, %v6131_v57 }
0x19cc   :  { %v6154_v26 = vsub.f32 %v6059_v31, %v6139_v20  ;;  %v6155_v5 = vsub.f32 %v6060_v50, %v6143_v19  ;;  %v6203_v31 = vpop.permute.xlu0 %6202  ;;  %v6469_v19 = vld [vmem:[%s10099_s28] sm:$0x3] }
0x19cd   :  { %v6156_v33 = vmul.f32 1.442695, %v6150_v37  ;;  %v6158_v60 = vmul.f32 1.442695, %v6151_v53  ;;  %v6162_v28 = vmul.f32 1.442695, %v6153_v40  ;;  %7099 = vmatpush3.msk.msra.mxu1 %vm5682_vm6, %v6469_v19 }
0x19ce   :  { %v6160_v15 = vmul.f32 1.442695, %v6152_v25  ;;  %v6164_v56 = vmul.f32 1.442695, %v6154_v26  ;;  %v6166_v13 = vmul.f32 1.442695, %v6155_v5  ;;  %7239 = vmatprep.subr.bf16.mxu1 %v10074_v61 }
0x19cf   :  { %7587 = vpow2.f32 %v6156_v33  ;;  %vm6383_vm6 = vcmask 48128   ;;  %v6659_v19 = vld [vmem:[%s10104_s11 + $0x18] sm:$0xff] }
0x19d0   :  { %7589 = vpow2.f32 %v6158_v60  ;;  %v6210_v14 = vpop.permute.xlu0 %6209 }
0x19d1   :  { %7591 = vpow2.f32 %v6162_v28 }
0x19d2   :  { %7593 = vpow2.f32 %v6160_v15 }
0x19d3   :  { %7595 = vpow2.f32 %v6164_v56 }
0x19d4   :  { %7597 = vpow2.f32 %v6166_v13 }
0x19d9   :  { %v7588_v24 = vpop.eup %7587 }
0x19da   :  { %v6217_v41 = vmul.f32 %v7588_v24, %v6175_v27  ;;  %v7590_v59 = vpop.eup %7589 }
0x19db   :  { %v7592_v16 = vpop.eup %7591  ;;  %v6218_v0 = vmul.f32 %v7590_v59, %v6182_v46 }
0x19dc   :  { %6230 = vperm.xlu0 %7293, %v6217_v41   ;;  %v6220_v10 = vmul.f32 %v7592_v16, %v6196_v6  ;;  %v7594_v1 = vpop.eup %7593 }
0x19dd   :  { %v6219_v51 = vmul.f32 %v7594_v1, %v6189_v55  ;;  %v7596_v44 = vpop.eup %7595 }
0x19de   :  { %6239 = vperm.xlu1 %7294, %v6220_v10   ;;  %v6221_v18 = vmul.f32 %v7596_v44, %v6203_v31  ;;  %v7598_v50 = vpop.eup %7597 }
0x19df   :  { %v6222_v48 = vmul.f32 %v7598_v50, %v6210_v14 }
0x19e0   :  { %6233 = vperm.xlu0 %7293, %v6218_v0  }
0x19e4   :  { %6236 = vperm.xlu0 %7293, %v6219_v51  }
0x19e8   :  { %6242 = vperm.xlu0 %7293, %v6221_v18  }
0x19ec   :  { %6245 = vperm.xlu0 %7293, %v6222_v48  }
0x1a5b   :  { %v6231_v2 = vpop.permute.xlu0 %6230 }
0x1a5c   :  { %v6250_v3 = vrot.slane %v6231_v2, %v8235_v4  ;;  %v6564_v2 = vld [vmem:[%s10102_s7 + $0x8] sm:$0xff] }
0x1a5d   :  { %v6240_v45 = vpop.permute.xlu1 %6239 }
0x1a5e   :  { %v6262_v7 = vrot.slane %v6240_v45, %v8235_v4  ;;  %v6568_v45 = vld [vmem:[%s10102_s7 + $0x28] sm:$0xff] }
0x1a5f   :  { %v6234_v9 = vpop.permute.xlu0 %6233 }
0x1a60   :  { %v6254_v29 = vrot.slane %v6234_v9, %v8235_v4  ;;  %v6565_v9 = vld [vmem:[%s10102_s7 + $0x10] sm:$0xff] }
0x1a62   :  { %v6271_v34 = vsel %vm631_vm11, %v6254_v29, %v6250_v3  ;;  %v6566_v29 = vld [vmem:[%s10102_s7 + $0x18] sm:$0xff]  ;;  %v6567_v3 = vld [vmem:[%s10102_s7 + $0x20] sm:$0xff] }
0x1a63   :  { %v6237_v12 = vpop.permute.xlu0 %6236 }
0x1a64   :  { %v6258_v54 = vrot.slane %v6237_v12, %v8235_v4 }
0x1a66   :  { %v6272_v32 = vsel %vm633_vm12, %v6258_v54, %v6271_v34  ;;  %v7225_v54 = vpack.c.bf16 %v6566_v29, %v6565_v9  ;;  %v6569_v34 = vld [vmem:[%s10102_s7 + $0x30] sm:$0xff] }
0x1a67   :  { %v6243_v63 = vpop.permute.xlu0 %6242  ;;  %v6273_v58 = vsel %vm635_vm13, %v6262_v7, %v6272_v32  ;;  %v6570_v32 = vld [vmem:[%s10102_s7 + $0x38] sm:$0xff]  ;;  %v6571_v7 = vld [vmem:[%s10102_s7 + $0x40] sm:$0xff] }
0x1a68   :  { %v6266_v47 = vrot.slane %v6243_v63, %v8235_v4  ;;  %v7228_v63 = vpack.c.bf16 %v6568_v45, %v6567_v3 }
0x1a6a   :  { %v6274_v49 = vsel %vm637_vm14, %v6266_v47, %v6273_v58  ;;  %v7231_v47 = vpack.c.bf16 %v6570_v32, %v6569_v34  ;;  %v6573_v58 = vld [vmem:[%s10102_s7 + $0x50] sm:$0xff] }
0x1a6b   :  { %v6246_v52 = vpop.permute.xlu0 %6245 }
0x1a6c   :  { %v6270_v43 = vrot.slane %v6246_v52, %v8235_v4  ;;  %v6572_v52 = vld [vmem:[%s10102_s7 + $0x48] sm:$0xff] }
0x1a6e   :  { %v6275_v30 = vsel %vm639_vm15, %v6270_v43, %v6274_v49  ;;  %v7234_v43 = vpack.c.bf16 %v6572_v52, %v6571_v7  ;;  %v6574_v49 = vld [vmem:[%s10102_s7 + $0x58] sm:$0xff] }
0x1a6f   :  { %v6277_v62 = vsel %vm6115_vm5, %v6275_v30, 0.0  ;;  %v7237_v30 = vpack.c.bf16 %v6574_v49, %v6573_v58 }
0x1a70   :  { %6278 = vadd.xlane.f32.xlu0 %v6277_v62  ;;  %v6901_v62 = vld [vmem:[%s10103_s10] ss:$0 sm:$0xff] }
0x1afd   :  { %v6279_v27 = vpop.xlane.xlu0 %6278 }
0x1afe   :  { %v6284_v17 = vrot.slane %v6279_v27, %v7935_v42  ;;  %v6288_v35 = vrot.slane %v6279_v27, %v7897_v21  ;;  %v6292_v57 = vrot.slane %v6279_v27, %v7903_v23  ;;  %v6296_v11 = vrot.slane %v6279_v27, %v7900_v22 }
0x1aff   :  { %v6300_v53 = vrot.slane %v6279_v27, %v7923_v36  ;;  %v6304_v33 = vrot.slane %v6279_v27, %v7927_v38  ;;  %v6468_v38 = vld [vmem:[%s10100_s1] sm:$0x3] }
0x1b00   :  { %7599 = vrcp.f32 %v6284_v17  ;;  %7101 = vmatmul.mubr.msk.f32.vlgmr.msra.gmra.mrb[16].mxu1 %vm5678_vm3, %v6468_v38 }
0x1b01   :  { %7601 = vrcp.f32 %v6288_v35  ;;  %7138 = vmatprep.mubr.msk.f32.mxu1 %vm7672_vm0, %v10073_v39 }
0x1b02   :  { %7603 = vrcp.f32 %v6292_v57 }
0x1b03   :  { %7605 = vrcp.f32 %v6296_v11 }
0x1b04   :  { %7607 = vrcp.f32 %v6300_v53  ;;  %v6656_v53 = vld [vmem:[%s10104_s11] sm:$0xff] }
0x1b05   :  { %7609 = vrcp.f32 %v6304_v33 }
0x1b0a   :  { %v7600_v37 = vpop.eup %7599 }
0x1b0b   :  { %v6312_v40 = vmul.f32 %v7600_v37, %v6217_v41  ;;  %v7602_v20 = vpop.eup %7601 }
0x1b0c   :  { %v6314_v42 = vmul.f32 %v7602_v20, %v6218_v0  ;;  %v7604_v21 = vpop.eup %7603 }
0x1b0d   :  { %6337 = vperm.xlu1 %7294, %v6312_v40   ;;  %v6316_v23 = vmul.f32 %v7604_v21, %v6219_v51  ;;  %v7606_v60 = vpop.eup %7605  ;;  %v6657_v40 = vld [vmem:[%s10104_s11 + $0x8] sm:$0xff] }
0x1b0e   :  { %v6318_v22 = vmul.f32 %v7606_v60, %v6220_v10  ;;  %v7608_v25 = vpop.eup %7607  ;;  %v7240_v33 = vpack.c.bf16 %v6657_v40, %v6656_v53 }
0x1b0f   :  { %v6320_v36 = vmul.f32 %v7608_v25, %v6221_v18  ;;  %v7610_v28 = vpop.eup %7609  ;;  %v6904_v18 = vld [vmem:[%s10101_s2] ss:$0 sm:$0xff] }
0x1b10   :  { %v6322_v46 = vmul.f32 %v7610_v28, %v6222_v48  ;;  %7241 = vmatpush3.bf16.msra.mxu1 %v7240_v33 }
0x1b11   :  { %6340 = vperm.xlu1 %7294, %v6314_v42   ;;  %7242 = vmatprep.subr.bf16.mxu1 %v10074_v61 }
0x1b15   :  { %6343 = vperm.xlu1 %7294, %v6316_v23  }
0x1b19   :  { %6346 = vperm.xlu1 %7294, %v6318_v22  }
0x1b1d   :  { %6349 = vperm.xlu1 %7294, %v6320_v36  }
0x1b21   :  { %6352 = vperm.xlu1 %7294, %v6322_v46   ;;  %v6658_v46 = vld [vmem:[%s10104_s11 + $0x10] sm:$0xff] }
0x1b22   :  { %v7243_v38 = vpack.c.bf16 %v6659_v19, %v6658_v46 }
0x1b24   :  { %7244 = vmatpush3.bf16.msra.mxu1 %v7243_v38 }
0x1b25   :  { %7245 = vmatprep.subr.bf16.mxu1 %v10074_v61 }
0x1b8c   :  { %v6338_v15 = vpop.permute.xlu1 %6337 }
0x1b8d   :  { %v6357_v41 = vrot.slane %v6338_v15, %v8235_v4  ;;  %v6907_v15 = vld [vmem:[%s10105_s15] ss:$0 sm:$0xff] }
0x1b90   :  { %v6341_v26 = vpop.permute.xlu1 %6340 }
0x1b91   :  { %v6361_v5 = vrot.slane %v6341_v26, %v8235_v4 }
0x1b93   :  { %v6378_v16 = vsel %vm631_vm11, %v6361_v5, %v6357_v41  ;;  %vm10106_vm11 = vcmask 523264   ;;  %v6909_v41 = vld [vmem:[%s7853_s21] ss:$0 sm:$0xff] }
0x1b94   :  { %v6344_v55 = vpop.permute.xlu1 %6343 }
0x1b95   :  { %v6365_v24 = vrot.slane %v6344_v55, %v8235_v4 }
0x1b97   :  { %v6379_v10 = vsel %vm633_vm12, %v6365_v24, %v6378_v16  ;;  %vm10107_vm12 = vcmask 785408   ;;  %v6742_v24 = vld [vmem:[%s7858_s17 + $0x8] sm:$0xff] }
0x1b98   :  { %v6347_v56 = vpop.permute.xlu1 %6346 }
0x1b99   :  { %v6369_v59 = vrot.slane %v6347_v56, %v8235_v4 }
0x1b9b   :  { %v6380_v1 = vsel %vm635_vm13, %v6369_v59, %v6379_v10  ;;  %vm10108_vm13 = vcmask 130048   ;;  %v6911_v10 = vld [vmem:[%s7863_s29] ss:$0 sm:$0xff] }
0x1b9c   :  { %v6350_v13 = vpop.permute.xlu1 %6349 }
0x1b9d   :  { %v6373_v6 = vrot.slane %v6350_v13, %v8235_v4 }
0x1b9f   :  { %v6381_v51 = vsel %vm637_vm14, %v6373_v6, %v6380_v1  ;;  %vm6823_vm14 = vcmask 484352  }
0x1ba0   :  { %v6353_v0 = vpop.permute.xlu1 %6352 }
0x1ba1   :  { %v6377_v31 = vrot.slane %v6353_v0, %v8235_v4  ;;  %v6563_v4 = vld [vmem:[%s10102_s7] sm:$0xff] }
0x1ba2   :  { %v7222_v12 = vpack.c.bf16 %v6564_v2, %v6563_v4 }
0x1ba3   :  { %v6382_v44 = vsel %vm639_vm15, %v6377_v31, %v6381_v51 }
0x1ba4   :  { %7096 = vmatmul.mubr.msk.f32.vlgmr.msra.gmra.mrb[16].mxu0 %vm6383_vm6, %v6382_v44 }
0x1ba5   :  { %7127 = vmatprep.mubr.msk.f32.mxu0 %vm7672_vm0, %v10073_v39  ;;  %7223 = vmatpush3.bf16.msra.mxu0 %v7222_v12 }
0x1ba6   :  { %7224 = vmatprep.subr.bf16.mxu0 %v10074_v61 }
0x1ba9   :  { %7226 = vmatpush3.bf16.msra.mxu0 %v7225_v54 }
0x1baa   :  { %7227 = vmatprep.subr.bf16.mxu0 %v10074_v61 }
0x1bad   :  { %7229 = vmatpush3.bf16.msra.mxu0 %v7228_v63 }
0x1bae   :  { %7230 = vmatprep.subr.bf16.mxu0 %v10074_v61 }
0x1bb1   :  { %7232 = vmatpush3.bf16.msra.mxu0 %v7231_v47 }
0x1bb2   :  { %7233 = vmatprep.subr.bf16.mxu0 %v10074_v61 }
0x1bb5   :  { %7235 = vmatpush3.bf16.msra.mxu0 %v7234_v43 }
0x1bb6   :  { %7236 = vmatprep.subr.bf16.mxu0 %v10074_v61 }
0x1bb9   :  { %7238 = vmatpush3.bf16.msra.mxu0 %v7237_v30 }
0x1bd3   :  { %v6549_v50 = vpop.f32.mrb[16].mxu1 }
0x1bd4   :  { %v6550_v14 = vadd.f32 %v6904_v18, %v6549_v50  ;;  %v7102_v48 = vpop.f32.mrb[17].mxu1 }
0x1bd6   :  { %6558 = vrot.lane.b32.xlu0 %v6550_v14, %s7676_s8 }
0x1c48   :  { %v6559_v22 = vpop.permute.xlu0 %6558 }
0x1c77   :  { %v6455_v27 = vpop.f32.mrb[16].mxu0 }
0x1c78   :  { %v6456_v17 = vadd.f32 %v6901_v62, %v6455_v27  ;;  %v7097_v35 = vpop.f32.mrb[17].mxu0 }
0x1c7a   :  { %v6459_v57 = vsel %vm5987_vm4, %v6456_v17, 0.0 }
0x1c7b   :  { %v6460_v11 = vrot.slane %v6459_v57, 4 }
0x1c7d   :  { %v6461_v37 = vadd.f32 %v6460_v11, %v6459_v57 }
0x1c7f   :  { %v6462_v20 = vrot.slane %v6461_v37, 2 }
0x1c81   :  { %v6463_v42 = vadd.f32 %v6462_v20, %v6461_v37 }
0x1c83   :  { %v6464_v21 = vrot.slane %v6463_v42, 1 }
0x1c85   :  { %v6465_v23 = vadd.f32 %v6464_v21, %v6463_v42 }
0x1c87   :  { %v6467_v60 = vmul.f32 0.16666667, %v6465_v23 }
0x1c89   :  { %6554 = vrot.lane.b32.xlu1 %v6467_v60, %s7674_s0 }
0x1cfb   :  { %v6555_v25 = vpop.permute.xlu1 %6554 }
0x1cfc   :  { %v6561_v36 = vsel %vm259_vm2, %v9761_v8, %v6555_v25  ;;  %v6741_v8 = vld [vmem:[%s7858_s17] sm:$0xff] }
0x1cfd   :  { %v6562_v28 = vsel %vm10106_vm11, %v6561_v36, %v6559_v22  ;;  %v7246_v13 = vpack.c.bf16 %v6742_v24, %v6741_v8 }
0x1cfe   :  { %7128 = vmatmul.mubr.msk.f32.vlgmr.msra.gmra.mrb[18].mxu0 %vm10107_vm12, %v6562_v28 }
0x1dd1   :  { %v6651_v26 = vpop.f32.mrb[18].mxu0 }
0x1dd2   :  { %v6652_v55 = vadd.f32 %v6907_v15, %v6651_v26  ;;  %v7129_v56 = vpop.f32.mrb[19].mxu0 }
0x1dd4   :  { %v6655_v5 = vmax.f32 %v6652_v55, 0.0 }
0x1dd6   :  { %7139 = vmatmul.mubr.msk.f32.vlgmr.msra.gmra.mrb[18].mxu1 %vm259_vm2, %v6655_v5 }
0x1dd7   :  { %7145 = vmatprep.mubr.msk.f32.mxu1 %vm7672_vm0, %v10073_v39  ;;  %7247 = vmatpush3.bf16.msra.mxu1 %v7246_v13 }
0x1ea9   :  { %v6736_v59 = vpop.f32.mrb[18].mxu1 }
0x1eaa   :  { %v6737_v6 = vadd.f32 %v6909_v41, %v6736_v59  ;;  %v7140_v16 = vpop.f32.mrb[19].mxu1 }
0x1eac   :  { %v6740_v61 = vmax.f32 %v6737_v6, 0.0 }
0x1eae   :  { %7146 = vmatmul.mubr.msk.f32.vlgmr.msra.gmra.mrb[20].mxu1 %vm10108_vm13, %v6740_v61 }
0x1f81   :  { %v6819_v0 = vpop.f32.mrb[20].mxu1 }
0x1f82   :  { %v6820_v1 = vadd.f32 %v6911_v10, %v6819_v0  ;;  %v7147_v31 = vpop.f32.mrb[21].mxu1 }
0x1f84   :  { %6824 = vst.msk [vmem:[#allocation2] sm:$0x3] %vm6823_vm14, %v6820_v1 }
0x1f85   :  { %7622 = shalt.err (!%p7619_p4)
}
0x1f86   :  { %s7623_s17 = scalar_lea.hbm %s7868_s25, 32 }
0x1f87   :  { %p7624_p5 = scmp.ne.s32.totalorder %s7868_s25, %s7623_s17  ;;  %p7627_p6 = scmp.lt.u32.totalorder %s7623_s17, %s7868_s25 }
0x1f89   :  { %p7629_p7 = pnand %p7627_p6, %p7624_p5 }
0x1f8b   :  { %7632 = shalt.err (!%p7629_p7)
}
0x1f8c   :  { %6834 = dma.vmem_to_hbm [thread:$0]  %s6832_s18, 32, %s7868_s25, [#allocation3]  }
0x1f8d   :  { %7633 = dma.done.wait [#allocation3], 32  }
0x1f8e   :  { %7634 = vsyncadd [#allocation3], 4294967264 }
0x1f8f   :  { %6838 = vsyncpa [#allocation3], 1 }

</bundles_post_ra>
